<compile_context>
chip_gen: v5e
topology: v5e:2x2
jax: 0.10.0
libtpu: 0.0.40
codegen_flags: <defaults>
</compile_context>

<pallas_src>
import functools
import math

import numpy as np

import jax
import jax.numpy as jnp
from jax.experimental import pallas as pl
from jax.experimental.pallas import tpu as pltpu


def _compiler_params():
    # 32 MiB scoped VMEM: safe on v5e/v6e (128 MiB) and leaves headroom on v7x
    # (64 MiB) for double-buffered pipelining.  "parallel" lets the 1-D grid shard
    # across v7x's two TensorCores.
    return pltpu.CompilerParams(
        dimension_semantics=("parallel",),
        vmem_limit_bytes=32 * 1024 * 1024,
    )


def _pick_row_tile(n_rows, bytes_per_row, budget_bytes=8 * 1024 * 1024):
    """Largest divisor of n_rows whose double-buffered block fits the VMEM budget
    while keeping >= 2 grid steps (pipelining + both v7x TensorCores busy)."""
    cap = max(1, budget_bytes // max(1, 2 * bytes_per_row))
    if n_rows >= 2:
        cap = min(cap, n_rows // 2)
    best = 1
    for d in range(1, n_rows + 1):
        if n_rows % d == 0 and d <= cap:
            best = d
    return best


# -----------------------------------------------------------------------------
# Branch 1: DataEmbedding + TemFEM fused into a single kernel (grid over B*N).
# -----------------------------------------------------------------------------

def _temporal_branch_kernel(
        x_ref, emb_w_ref, emb_b_ref, pte_ref,
        wqkv_ref, bqkv_ref, wo_ref, bo_ref,
        ln1_g_ref, ln1_b_ref,
        ff1_w_ref, ff1_b_ref, ff2_w_ref, ff2_b_ref,
        ln2_g_ref, ln2_b_ref,
        o_ref, *, n_heads, d_head, t_len, eps):
    f32, bf16 = jnp.float32, jnp.bfloat16

    def mm(a_bf16, w_ref):
        # bf16 MXU operands (weights pre-cast in wrapper), f32 accumulation.
        return jnp.dot(a_bf16, w_ref[...], preferred_element_type=f32)

    x = x_ref[...].astype(bf16)                                  # (rows, C)
    h = mm(x, emb_w_ref) + emb_b_ref[...]                        # (rows, D) f32
    rows, d_model = h.shape
    bn = rows // t_len
    # positional + temporal embedding broadcast over the bn node-sequences
    h = (h.reshape(bn, t_len, d_model) + pte_ref[...]).reshape(rows, d_model)

    # Fused QKV projection: one matmul, one MXU weight push.
    qkv = mm(h.astype(bf16), wqkv_ref) + bqkv_ref[...]           # (rows, 3D) f32
    q = qkv[:, :d_model]
    k = qkv[:, d_model:2 * d_model]
    v = qkv[:, 2 * d_model:]

    scale = 1.0 / math.sqrt(d_head)
    head_outs = []
    for hh in range(n_heads):                                    # static unroll
        sl = slice(hh * d_head, (hh + 1) * d_head)
        qh = q[:, sl].astype(bf16).reshape(bn, t_len, d_head)
        kh = k[:, sl].astype(bf16).reshape(bn, t_len, d_head)
        vh = v[:, sl].reshape(bn, t_len, d_head)                 # f32 for PV fidelity
        s = jnp.einsum("bqd,bkd->bqk", qh, kh,
                       preferred_element_type=f32) * scale       # (bn, T, T) f32
        s = s - jnp.max(s, axis=-1, keepdims=True)
        p = jnp.exp(s)
        # divide -> EUP reciprocal (frees VALU slots)
        p = p * pl.reciprocal(jnp.sum(p, axis=-1, keepdims=True), approx=True)
        oh = jnp.einsum("bqk,bkd->bqd", p, vh,
                        preferred_element_type=f32)              # f32 probs kept
        head_outs.append(oh.reshape(rows, d_head))
    attn = jnp.concatenate(head_outs, axis=-1)                   # (rows, D)
    attn = mm(attn.astype(bf16), wo_ref) + bo_ref[...]

    def layernorm(y, g_ref, b_ref):
        mu = jnp.mean(y, axis=-1, keepdims=True)
        var = jnp.mean((y - mu) * (y - mu), axis=-1, keepdims=True)
        return (y - mu) * jax.lax.rsqrt(var + eps) * g_ref[...] + b_ref[...]

    h1 = layernorm(attn + h, ln1_g_ref, ln1_b_ref)               # residual + LN1
    ff = jnp.maximum(mm(h1.astype(bf16), ff1_w_ref) + ff1_b_ref[...], 0.0)
    ff = mm(ff.astype(bf16), ff2_w_ref) + ff2_b_ref[...]
    out = layernorm(ff + h1, ln2_g_ref, ln2_b_ref)               # residual + LN2
    o_ref[...] = out.astype(o_ref.dtype)                         # lane-dense (rows, D)


def temporal_branch(x, params, n_heads):
    B, N, T, C = x.shape
    d_model = params["emb_w"].shape[1]
    dh = d_model // n_heads
    BN = B * N

    bytes_per_bn = 4 * T * (C + 12 * d_model + n_heads * T)
    bn_tile = _pick_row_tile(BN, bytes_per_bn)
    rows = bn_tile * T
    grid = (BN // bn_tile,)

    bf16 = jnp.bfloat16
    x2d = x.reshape(BN * T, C)
    pte = (params["pos_emb"] + params["tem_emb"]).astype(jnp.float32)       # (T, D)
    wqkv = jnp.concatenate([params["wq"], params["wk"], params["wv"]], axis=1)
    bqkv = jnp.concatenate([params["bq"], params["bk"], params["bv"]]).reshape(1, -1)

    operands = [
        x2d,
        params["emb_w"].astype(bf16), params["emb_b"].reshape(1, -1), pte,
        wqkv.astype(bf16), bqkv,
        params["wo"].astype(bf16), params["bo"].reshape(1, -1),
        params["ln1_g"].reshape(1, -1), params["ln1_b"].reshape(1, -1),
        params["ff1_w"].astype(bf16), params["ff1_b"].reshape(1, -1),
        params["ff2_w"].astype(bf16), params["ff2_b"].reshape(1, -1),
        params["ln2_g"].reshape(1, -1), params["ln2_b"].reshape(1, -1),
    ]
    in_specs = ([pl.BlockSpec((rows, C), lambda i: (i, 0))]
                + [pl.BlockSpec(a.shape, lambda i: (0, 0)) for a in operands[1:]])

    M = BN * T
    flops = int(2 * M * (C * d_model + 3 * d_model * d_model + d_model * d_model
                         + 8 * d_model * d_model)
                + 4 * BN * n_heads * T * T * dh)
    transc = int(BN * n_heads * T * T + 2 * M)
    bytes_acc = int(4 * (x2d.size + M * d_model)
                    + sum(int(a.size) * a.dtype.itemsize for a in operands[1:]))

    out = pl.pallas_call(
        functools.partial(_temporal_branch_kernel, n_heads=n_heads, d_head=dh,
                          t_len=T, eps=1e-5),
        out_shape=jax.ShapeDtypeStruct((M, d_model), jnp.float32),
        grid=grid,
        in_specs=in_specs,
        out_specs=pl.BlockSpec((rows, d_model), lambda i: (i, 0)),
        compiler_params=_compiler_params(),
        cost_estimate=pl.CostEstimate(flops=flops, transcendentals=transc,
                                      bytes_accessed=bytes_acc),
    )(*operands)
    return out.reshape(B, N, T, d_model)


# -----------------------------------------------------------------------------
# Branch 2: SpaFEM Chebyshev graph convolution (grid over batch).
#   One wide graph matmul: stacked cheb (K*N, N) x x_b (N, T*C) -> (K*N, T*C);
#   then K dots against a block-diagonal theta (T*C, T*H) give the output directly
#   in the lane-dense (N, T*H) layout.  No broadcasts, no concatenates, no
#   wrapper transposes (x enters via a free reshape).
# -----------------------------------------------------------------------------

def _spatial_kernel(x_ref, cheb_ref, theta_bd_ref, o_ref, *, cheb_k, n_nodes):
    f32, bf16 = jnp.float32, jnp.bfloat16
    xb = x_ref[0].astype(bf16)                                   # (N, T*C)
    s = jnp.dot(cheb_ref[...], xb, preferred_element_type=f32)   # (K*N, T*C)
    acc = None
    for k in range(cheb_k):                                      # static unroll
        sk = s[k * n_nodes:(k + 1) * n_nodes, :].astype(bf16)    # (N, T*C)
        term = jnp.dot(sk, theta_bd_ref[k], preferred_element_type=f32)  # (N, T*H)
        acc = term if acc is None else acc + term
    o_ref[0] = jnp.maximum(acc, 0.0).astype(o_ref.dtype)         # lane-dense (N, T*H)


def spatial_branch(x, cheb, theta):
    B, N, T, C = x.shape
    K = cheb.shape[0]
    H = theta.shape[-1]
    bf16 = jnp.bfloat16

    x_r = x.reshape(B, N, T * C)                                 # free reshape
    cheb_stack = cheb.reshape(K * N, N).astype(bf16)
    # Block-diagonal theta (per time step): theta_bd[k, t*C+c, u*H+h] = eye[t,u]*theta[k,c,h]
    eye_t = jnp.eye(T, dtype=theta.dtype)
    theta_bd = jnp.einsum("tu,kch->ktcuh", eye_t, theta).reshape(K, T * C, T * H)
    theta_bd = theta_bd.astype(bf16)

    flops = int(B * (2 * K * N * N * T * C + 2 * K * N * (T * C) * (T * H)))
    bytes_acc = int(4 * (x_r.size + B * N * T * H)
                    + 2 * (cheb_stack.size + theta_bd.size))

    out = pl.pallas_call(
        functools.partial(_spatial_kernel, cheb_k=K, n_nodes=N),
        out_shape=jax.ShapeDtypeStruct((B, N, T * H), jnp.float32),
        grid=(B,),
        in_specs=[pl.BlockSpec((1, N, T * C), lambda b: (b, 0, 0)),
                  pl.BlockSpec((K * N, N), lambda b: (0, 0)),
                  pl.BlockSpec((K, T * C, T * H), lambda b: (0, 0, 0))],
        out_specs=pl.BlockSpec((1, N, T * H), lambda b: (b, 0, 0)),
        compiler_params=_compiler_params(),
        cost_estimate=pl.CostEstimate(flops=flops, transcendentals=0,
                                      bytes_accessed=bytes_acc),
    )(x_r, cheb_stack, theta_bd)
    return out.reshape(B, N, T, H)                               # free reshape


# -----------------------------------------------------------------------------
# Branch 3: Spectral_Attention (fused Q|K projection + per-head softmax +
#   head-mean + bmm on [real || imag]; grid over batch), then spectral_conv.
#   FFT / IFFT stay in plain JAX (no Pallas FFT primitive).
# -----------------------------------------------------------------------------

def _spectral_attn_kernel(feat_ref, xri_ref, wqk_ref, bqk_ref, o_ref,
                          *, n_heads, d_k):
    f32, bf16 = jnp.float32, jnp.bfloat16
    feat = feat_ref[...].astype(bf16)                            # (N, Dspec)
    qk = jnp.dot(feat, wqk_ref[...], preferred_element_type=f32) + bqk_ref[...]
    hd = n_heads * d_k
    q = qk[:, :hd]
    k = qk[:, hd:]
    n_nodes = q.shape[0]
    scale = 1.0 / math.sqrt(d_k)

    a_sum = None
    for hh in range(n_heads):                                    # static unroll
        sl = slice(hh * d_k, (hh + 1) * d_k)
        s = jax.lax.dot_general(q[:, sl], k[:, sl], (((1,), (1,)), ((), ())),
                                preferred_element_type=f32) * scale
        s = s - jnp.max(s, axis=-1, keepdims=True)
        p = jnp.exp(s)
        p = p * pl.reciprocal(jnp.sum(p, axis=-1, keepdims=True), approx=True)
        a_sum = p if a_sum is None else a_sum + p                # probs stay f32
    a_mean = a_sum * (1.0 / n_heads)                             # mean over heads

    xri = xri_ref[...]                                           # (N, 2*F*C) f32
    o_ref[...] = jnp.dot(a_mean, xri, preferred_element_type=f32).astype(o_ref.dtype)


def _linear_kernel(x_ref, w_ref, b_ref, o_ref):
    y = jnp.dot(x_ref[...].astype(jnp.bfloat16), w_ref[...],
                preferred_element_type=jnp.float32) + b_ref[...]
    o_ref[...] = y.astype(o_ref.dtype)


def spectral_branch(x, params, n_heads, d_k):
    B, N, T, C = x.shape
    d_model = params["spec_conv_w"].shape[1]
    bf16 = jnp.bfloat16

    # FFT over the lag axis (plain JAX — no Pallas FFT primitive).
    xf = jnp.fft.rfft(x.astype(jnp.float32), axis=2)             # (B, N, F, C) complex
    F = xf.shape[2]
    xr = jnp.real(xf).astype(jnp.float32)
    xi = jnp.imag(xf).astype(jnp.float32)
    feat = jnp.concatenate([xr, xi], axis=-1).reshape(B * N, F * 2 * C)
    xri = jnp.concatenate([xr.reshape(B, N, F * C), xi.reshape(B, N, F * C)],
                          axis=-1).reshape(B * N, 2 * F * C)

    d_spec = F * 2 * C
    hd = n_heads * d_k
    wqk = jnp.concatenate([params["spec_wq"], params["spec_wk"]], axis=1).astype(bf16)
    bqk = jnp.concatenate([params["spec_bq"], params["spec_bk"]]).reshape(1, -1)

    flops = int(2 * B * N * d_spec * 2 * hd + 4 * B * n_heads * N * N * d_k
                + 2 * B * N * N * 2 * F * C)
    transc = int(B * n_heads * N * N)
    bytes_acc = int(4 * (feat.size + xri.size + B * N * 2 * F * C)
                    + 2 * wqk.size + 4 * bqk.size)

    # NOTE: output lanes = 2*F*C (40 here) are inherently sub-128; this slab is tiny.
    y = pl.pallas_call(
        functools.partial(_spectral_attn_kernel, n_heads=n_heads, d_k=d_k),
        out_shape=jax.ShapeDtypeStruct((B * N, 2 * F * C), jnp.float32),
        grid=(B,),
        in_specs=[pl.BlockSpec((N, d_spec), lambda b: (b, 0)),
                  pl.BlockSpec((N, 2 * F * C), lambda b: (b, 0)),
                  pl.BlockSpec((d_spec, 2 * hd), lambda b: (0, 0)),
                  pl.BlockSpec((1, 2 * hd), lambda b: (0, 0))],
        out_specs=pl.BlockSpec((N, 2 * F * C), lambda b: (b, 0)),
        compiler_params=_compiler_params(),
        cost_estimate=pl.CostEstimate(flops=flops, transcendentals=transc,
                                      bytes_accessed=bytes_acc),
    )(feat, xri, wqk, bqk)

    y = y.reshape(B, N, 2 * F * C)
    yr = y[..., :F * C].reshape(B, N, F, C)
    yi = y[..., F * C:].reshape(B, N, F, C)
    x3 = jnp.fft.irfft(yr + 1j * yi, n=T, axis=2).astype(jnp.float32)   # (B, N, T, C)

    # spectral_conv: Linear(var_dim -> d_model) on the filtered signal.
    BN = B * N
    bn_tile = _pick_row_tile(BN, 4 * T * (C + 2 * d_model))
    rows = bn_tile * T
    flops2 = int(2 * BN * T * C * d_model)
    bytes2 = int(4 * (BN * T * C + BN * T * d_model) + 2 * C * d_model)
    out = pl.pallas_call(
        _linear_kernel,
        out_shape=jax.ShapeDtypeStruct((BN * T, d_model), jnp.float32),
        grid=(BN // bn_tile,),
        in_specs=[pl.BlockSpec((rows, C), lambda i: (i, 0)),
                  pl.BlockSpec((C, d_model), lambda i: (0, 0)),
                  pl.BlockSpec((1, d_model), lambda i: (0, 0))],
        out_specs=pl.BlockSpec((rows, d_model), lambda i: (i, 0)),
        compiler_params=_compiler_params(),
        cost_estimate=pl.CostEstimate(flops=flops2, transcendentals=0,
                                      bytes_accessed=bytes2),
    )(x3.reshape(BN * T, C), params["spec_conv_w"].astype(bf16),
      params["spec_conv_b"].reshape(1, -1))
    return out.reshape(B, N, T, d_model)


# -----------------------------------------------------------------------------
# EncoderLayer forward: the three branches (note: on one TensorCore the calls and
# the XLA FFTs execute serially — fusion keeps the call count minimal).
# -----------------------------------------------------------------------------

def encoder_forward(params, x, cheb_polynomials, n_heads, d_k):
    """x: (B, N, T, C) float32; cheb_polynomials: (K, N, N)."""
    x1 = temporal_branch(x, params, n_heads)                     # (B, N, T, d_model)
    x2 = spatial_branch(x, cheb_polynomials, params["theta"])    # (B, N, T, hid_dim)
    x3 = spectral_branch(x, params, n_heads, d_k)                # (B, N, T, d_model)
    return x1, x2, x3


# -----------------------------------------------------------------------------
# Deterministic parameter init + example run
# -----------------------------------------------------------------------------

def init_params(key, var_dim, hid_dim, num_nodes, lag, d_k, d_model, n_heads, cheb_k):
    keys = jax.random.split(key, 16)
    s = 0.1
    F = lag // 2 + 1
    d_spec = F * 2 * var_dim
    p = {
        # DataEmbedding
        "emb_w": s * jax.random.normal(keys[0], (var_dim, d_model), jnp.float32),
        "emb_b": jnp.zeros((d_model,), jnp.float32),
        "pos_emb": s * jax.random.normal(keys[1], (lag, d_model), jnp.float32),
        # TemFEM
        "tem_emb": s * jax.random.normal(keys[2], (lag, d_model), jnp.float32),
        "wq": s * jax.random.normal(keys[3], (d_model, d_model), jnp.float32),
        "wk": s * jax.random.normal(keys[4], (d_model, d_model), jnp.float32),
        "wv": s * jax.random.normal(keys[5], (d_model, d_model), jnp.float32),
        "wo": s * jax.random.normal(keys[6], (d_model, d_model), jnp.float32),
        "bq": jnp.zeros((d_model,), jnp.float32),
        "bk": jnp.zeros((d_model,), jnp.float32),
        "bv": jnp.zeros((d_model,), jnp.float32),
        "bo": jnp.zeros((d_model,), jnp.float32),
        "ln1_g": jnp.ones((d_model,), jnp.float32),
        "ln1_b": jnp.zeros((d_model,), jnp.float32),
        "ff1_w": s * jax.random.normal(keys[7], (d_model, 4 * d_model), jnp.float32),
        "ff1_b": jnp.zeros((4 * d_model,), jnp.float32),
        "ff2_w": s * jax.random.normal(keys[8], (4 * d_model, d_model), jnp.float32),
        "ff2_b": jnp.zeros((d_model,), jnp.float32),
        "ln2_g": jnp.ones((d_model,), jnp.float32),
        "ln2_b": jnp.zeros((d_model,), jnp.float32),
        # SpaFEM
        "theta": s * jax.random.normal(keys[9], (cheb_k, var_dim, hid_dim), jnp.float32),
        # Spectral_Attention
        "spec_wq": s * jax.random.normal(keys[10], (d_spec, n_heads * d_k), jnp.float32),
        "spec_bq": jnp.zeros((n_heads * d_k,), jnp.float32),
        "spec_wk": s * jax.random.normal(keys[11], (d_spec, n_heads * d_k), jnp.float32),
        "spec_bk": jnp.zeros((n_heads * d_k,), jnp.float32),
        # spectral_conv
        "spec_conv_w": s * jax.random.normal(keys[12], (var_dim, d_model), jnp.float32),
        "spec_conv_b": jnp.zeros((d_model,), jnp.float32),
    }
    return p


def build_cheb_polynomials(num_nodes, K):
    """Canonical ASTGCN scaled-Laplacian Chebyshev polynomials for a ring graph."""
    A = np.zeros((num_nodes, num_nodes), np.float64)
    idx = np.arange(num_nodes)
    A[idx, (idx + 1) % num_nodes] = 1.0
    A[(idx + 1) % num_nodes, idx] = 1.0
    D = np.diag(A.sum(axis=1))
    L = D - A
    lam_max = float(np.linalg.eigvalsh(L).max())
    L_tilde = (2.0 / lam_max) * L - np.eye(num_nodes)
    polys = [np.eye(num_nodes), L_tilde]
    for _ in range(2, K):
        polys.append(2.0 * L_tilde @ polys[-1] - polys[-2])
    return jnp.asarray(np.stack(polys[:K], axis=0), dtype=jnp.float32)   # (K, N, N)


if __name__ == "__main__":
    # Small, forward-consistent shapes; d_model=128 and lag*hid_dim=128 keep the
    # large output slabs lane-dense even at this toy size.
    B, num_nodes, lag, var_dim = 2, 8, 8, 4
    hid_dim, d_model, n_heads, d_k, cheb_k = 16, 128, 4, 32, 3

    key = jax.random.PRNGKey(0)
    k_x, k_p = jax.random.split(key)
    x = jax.random.normal(k_x, (B, num_nodes, lag, var_dim), jnp.float32)
    cheb = build_cheb_polynomials(num_nodes, cheb_k)
    params = init_params(k_p, var_dim, hid_dim, num_nodes, lag,
                         d_k, d_model, n_heads, cheb_k)

    fwd = jax.jit(functools.partial(encoder_forward, n_heads=n_heads, d_k=d_k))
    x1, x2, x3 = fwd(params, x, cheb)
    jax.block_until_ready((x1, x2, x3))

    assert x1.shape == (B, num_nodes, lag, d_model)
    assert x2.shape == (B, num_nodes, lag, hid_dim)
    assert x3.shape == (B, num_nodes, lag, d_model)
    assert bool(jnp.all(jnp.isfinite(x1)))
    assert bool(jnp.all(jnp.isfinite(x2)))
    assert bool(jnp.all(jnp.isfinite(x3)))
    print("KERNEL_OK")
</pallas_src>

<mosaic_0001>
module attributes {stable_mosaic.version = 11 : i64} {
  func.func @_temporal_branch_kernel(%arg0: i32, %arg1: memref<64x4xf32, #tpu.memory_space<vmem>>, %arg2: memref<4x128xbf16, #tpu.memory_space<vmem>>, %arg3: memref<1x128xf32, #tpu.memory_space<vmem>>, %arg4: memref<8x128xf32, #tpu.memory_space<vmem>>, %arg5: memref<128x384xbf16, #tpu.memory_space<vmem>>, %arg6: memref<1x384xf32, #tpu.memory_space<vmem>>, %arg7: memref<128x128xbf16, #tpu.memory_space<vmem>>, %arg8: memref<1x128xf32, #tpu.memory_space<vmem>>, %arg9: memref<1x128xf32, #tpu.memory_space<vmem>>, %arg10: memref<1x128xf32, #tpu.memory_space<vmem>>, %arg11: memref<128x512xbf16, #tpu.memory_space<vmem>>, %arg12: memref<1x512xf32, #tpu.memory_space<vmem>>, %arg13: memref<512x128xbf16, #tpu.memory_space<vmem>>, %arg14: memref<1x128xf32, #tpu.memory_space<vmem>>, %arg15: memref<1x128xf32, #tpu.memory_space<vmem>>, %arg16: memref<1x128xf32, #tpu.memory_space<vmem>>, %arg17: memref<64x128xf32, #tpu.memory_space<vmem>>) attributes {dimension_semantics = [#tpu.dimension_semantics<parallel>], iteration_bounds = array<i64: 2>, scalar_prefetch = 0 : i64, scratch_operands = 0 : i64, tpu.core_type = #tpu.core_type<tc>, window_params = [{transform_indices = @transform_0, window_bounds = array<i64: 64, 4>}, {pipeline_mode = #tpu.pipeline_mode<synchronous>, transform_indices = @transform_1, window_bounds = array<i64: 4, 128>}, {pipeline_mode = #tpu.pipeline_mode<synchronous>, transform_indices = @transform_2, window_bounds = array<i64: 1, 128>}, {pipeline_mode = #tpu.pipeline_mode<synchronous>, transform_indices = @transform_3, window_bounds = array<i64: 8, 128>}, {pipeline_mode = #tpu.pipeline_mode<synchronous>, transform_indices = @transform_4, window_bounds = array<i64: 128, 384>}, {pipeline_mode = #tpu.pipeline_mode<synchronous>, transform_indices = @transform_5, window_bounds = array<i64: 1, 384>}, {pipeline_mode = #tpu.pipeline_mode<synchronous>, transform_indices = @transform_6, window_bounds = array<i64: 128, 128>}, {pipeline_mode = #tpu.pipeline_mode<synchronous>, transform_indices = @transform_7, window_bounds = array<i64: 1, 128>}, {pipeline_mode = #tpu.pipeline_mode<synchronous>, transform_indices = @transform_8, window_bounds = array<i64: 1, 128>}, {pipeline_mode = #tpu.pipeline_mode<synchronous>, transform_indices = @transform_9, window_bounds = array<i64: 1, 128>}, {pipeline_mode = #tpu.pipeline_mode<synchronous>, transform_indices = @transform_10, window_bounds = array<i64: 128, 512>}, {pipeline_mode = #tpu.pipeline_mode<synchronous>, transform_indices = @transform_11, window_bounds = array<i64: 1, 512>}, {pipeline_mode = #tpu.pipeline_mode<synchronous>, transform_indices = @transform_12, window_bounds = array<i64: 512, 128>}, {pipeline_mode = #tpu.pipeline_mode<synchronous>, transform_indices = @transform_13, window_bounds = array<i64: 1, 128>}, {pipeline_mode = #tpu.pipeline_mode<synchronous>, transform_indices = @transform_14, window_bounds = array<i64: 1, 128>}, {pipeline_mode = #tpu.pipeline_mode<synchronous>, transform_indices = @transform_15, window_bounds = array<i64: 1, 128>}, {transform_indices = @transform_16, window_bounds = array<i64: 64, 128>}]} {
    %c0 = arith.constant 0 : index
    %c0_0 = arith.constant 0 : index
    %0 = vector.load %arg1[%c0, %c0_0] : memref<64x4xf32, #tpu.memory_space<vmem>>, vector<64x4xf32>
    %1 = arith.truncf %0 : vector<64x4xf32> to vector<64x4xbf16>
    %c0_1 = arith.constant 0 : index
    %c0_2 = arith.constant 0 : index
    %2 = vector.load %arg2[%c0_1, %c0_2] : memref<4x128xbf16, #tpu.memory_space<vmem>>, vector<4x128xbf16>
    %cst = arith.constant dense<0.000000e+00> : vector<64x128xf32>
    %3 = tpu.matmul %1, %2, %cst {dimension_numbers = #tpu.dot_dimension_numbers<[1], [0], [0], [1], [0, 0, 1, 1], [], []>} : vector<64x4xbf16>, vector<4x128xbf16>, vector<64x128xf32> -> vector<64x128xf32>
    %c0_3 = arith.constant 0 : index
    %c0_4 = arith.constant 0 : index
    %4 = vector.load %arg3[%c0_3, %c0_4] : memref<1x128xf32, #tpu.memory_space<vmem>>, vector<1x128xf32>
    %5 = vector.broadcast %4 : vector<1x128xf32> to vector<64x128xf32>
    %6 = arith.addf %3, %5 : vector<64x128xf32>
    %7 = vector.shape_cast %6 : vector<64x128xf32> to vector<8x8x128xf32>
    %c0_5 = arith.constant 0 : index
    %c0_6 = arith.constant 0 : index
    %8 = vector.load %arg4[%c0_5, %c0_6] : memref<8x128xf32, #tpu.memory_space<vmem>>, vector<8x128xf32>
    %9 = vector.shape_cast %8 : vector<8x128xf32> to vector<1x8x128xf32>
    %10 = vector.broadcast %9 : vector<1x8x128xf32> to vector<8x8x128xf32>
    %11 = arith.addf %7, %10 : vector<8x8x128xf32>
    %12 = vector.shape_cast %11 : vector<8x8x128xf32> to vector<64x128xf32>
    %13 = arith.truncf %12 : vector<64x128xf32> to vector<64x128xbf16>
    %c0_7 = arith.constant 0 : index
    %c0_8 = arith.constant 0 : index
    %14 = vector.load %arg5[%c0_7, %c0_8] : memref<128x384xbf16, #tpu.memory_space<vmem>>, vector<128x384xbf16>
    %cst_9 = arith.constant dense<0.000000e+00> : vector<64x384xf32>
    %15 = tpu.matmul %13, %14, %cst_9 {dimension_numbers = #tpu.dot_dimension_numbers<[1], [0], [0], [1], [0, 0, 1, 1], [], []>} : vector<64x128xbf16>, vector<128x384xbf16>, vector<64x384xf32> -> vector<64x384xf32>
    %c0_10 = arith.constant 0 : index
    %c0_11 = arith.constant 0 : index
    %16 = vector.load %arg6[%c0_10, %c0_11] : memref<1x384xf32, #tpu.memory_space<vmem>>, vector<1x384xf32>
    %17 = vector.broadcast %16 : vector<1x384xf32> to vector<64x384xf32>
    %18 = arith.addf %15, %17 : vector<64x384xf32>
    %19 = vector.extract_strided_slice %18 {offsets = [0, 0], sizes = [64, 128], strides = [1, 1]} : vector<64x384xf32> to vector<64x128xf32>
    %20 = vector.extract_strided_slice %18 {offsets = [0, 128], sizes = [64, 128], strides = [1, 1]} : vector<64x384xf32> to vector<64x128xf32>
    %21 = vector.extract_strided_slice %18 {offsets = [0, 256], sizes = [64, 128], strides = [1, 1]} : vector<64x384xf32> to vector<64x128xf32>
    %22 = vector.extract_strided_slice %19 {offsets = [0, 0], sizes = [64, 32], strides = [1, 1]} : vector<64x128xf32> to vector<64x32xf32>
    %23 = arith.truncf %22 : vector<64x32xf32> to vector<64x32xbf16>
    %24 = vector.shape_cast %23 : vector<64x32xbf16> to vector<8x8x32xbf16>
    %25 = vector.extract_strided_slice %20 {offsets = [0, 0], sizes = [64, 32], strides = [1, 1]} : vector<64x128xf32> to vector<64x32xf32>
    %26 = arith.truncf %25 : vector<64x32xf32> to vector<64x32xbf16>
    %27 = vector.shape_cast %26 : vector<64x32xbf16> to vector<8x8x32xbf16>
    %28 = vector.extract_strided_slice %21 {offsets = [0, 0], sizes = [64, 32], strides = [1, 1]} : vector<64x128xf32> to vector<64x32xf32>
    %29 = vector.shape_cast %28 : vector<64x32xf32> to vector<8x8x32xf32>
    "tpu.trace_start"() <{level = 10 : i32, message = "bqd,bkd->bqk"}> : () -> ()
    %cst_12 = arith.constant dense<0.000000e+00> : vector<8x8x8xf32>
    %30 = tpu.matmul %24, %27, %cst_12 {dimension_numbers = #tpu.dot_dimension_numbers<[2], [2], [1], [1], [0, 0, 0, 1, 1, 1], [0], [0]>} : vector<8x8x32xbf16>, vector<8x8x32xbf16>, vector<8x8x8xf32> -> vector<8x8x8xf32>
    "tpu.trace_stop"() : () -> ()
    %cst_13 = arith.constant 0.176776692 : f32
    %31 = vector.broadcast %cst_13 : f32 to vector<8x8x8xf32>
    %32 = arith.mulf %30, %31 : vector<8x8x8xf32>
    %cst_14 = arith.constant dense<0xFF800000> : vector<8x8xf32>
    %33 = vector.multi_reduction <maximumf>, %32, %cst_14 [2] : vector<8x8x8xf32> to vector<8x8xf32>
    %34 = vector.shape_cast %33 : vector<8x8xf32> to vector<8x8x1xf32>
    %35 = vector.broadcast %34 : vector<8x8x1xf32> to vector<8x8x8xf32>
    %36 = arith.subf %32, %35 : vector<8x8x8xf32>
    %37 = math.exp %36 : vector<8x8x8xf32>
    %cst_15 = arith.constant dense<0.000000e+00> : vector<8x8xf32>
    %38 = vector.multi_reduction <add>, %37, %cst_15 [2] : vector<8x8x8xf32> to vector<8x8xf32>
    %39 = vector.shape_cast %38 : vector<8x8xf32> to vector<8x8x1xf32>
    %40 = tpu.reciprocal %39 {approx = true} : vector<8x8x1xf32> -> vector<8x8x1xf32>
    %41 = vector.broadcast %40 : vector<8x8x1xf32> to vector<8x8x8xf32>
    %42 = arith.mulf %37, %41 : vector<8x8x8xf32>
    "tpu.trace_start"() <{level = 10 : i32, message = "bqk,bkd->bqd"}> : () -> ()
    %cst_16 = arith.constant dense<0.000000e+00> : vector<8x8x32xf32>
    %43 = tpu.matmul %42, %29, %cst_16 {dimension_numbers = #tpu.dot_dimension_numbers<[2], [1], [1], [2], [0, 0, 0, 1, 1, 2], [0], [0]>} : vector<8x8x8xf32>, vector<8x8x32xf32>, vector<8x8x32xf32> -> vector<8x8x32xf32>
    "tpu.trace_stop"() : () -> ()
    %44 = vector.shape_cast %43 : vector<8x8x32xf32> to vector<64x32xf32>
    %45 = vector.extract_strided_slice %19 {offsets = [0, 32], sizes = [64, 32], strides = [1, 1]} : vector<64x128xf32> to vector<64x32xf32>
    %46 = arith.truncf %45 : vector<64x32xf32> to vector<64x32xbf16>
    %47 = vector.shape_cast %46 : vector<64x32xbf16> to vector<8x8x32xbf16>
    %48 = vector.extract_strided_slice %20 {offsets = [0, 32], sizes = [64, 32], strides = [1, 1]} : vector<64x128xf32> to vector<64x32xf32>
    %49 = arith.truncf %48 : vector<64x32xf32> to vector<64x32xbf16>
    %50 = vector.shape_cast %49 : vector<64x32xbf16> to vector<8x8x32xbf16>
    %51 = vector.extract_strided_slice %21 {offsets = [0, 32], sizes = [64, 32], strides = [1, 1]} : vector<64x128xf32> to vector<64x32xf32>
    %52 = vector.shape_cast %51 : vector<64x32xf32> to vector<8x8x32xf32>
    "tpu.trace_start"() <{level = 10 : i32, message = "bqd,bkd->bqk"}> : () -> ()
    %cst_17 = arith.constant dense<0.000000e+00> : vector<8x8x8xf32>
    %53 = tpu.matmul %47, %50, %cst_17 {dimension_numbers = #tpu.dot_dimension_numbers<[2], [2], [1], [1], [0, 0, 0, 1, 1, 1], [0], [0]>} : vector<8x8x32xbf16>, vector<8x8x32xbf16>, vector<8x8x8xf32> -> vector<8x8x8xf32>
    "tpu.trace_stop"() : () -> ()
    %cst_18 = arith.constant 0.176776692 : f32
    %54 = vector.broadcast %cst_18 : f32 to vector<8x8x8xf32>
    %55 = arith.mulf %53, %54 : vector<8x8x8xf32>
    %cst_19 = arith.constant dense<0xFF800000> : vector<8x8xf32>
    %56 = vector.multi_reduction <maximumf>, %55, %cst_19 [2] : vector<8x8x8xf32> to vector<8x8xf32>
    %57 = vector.shape_cast %56 : vector<8x8xf32> to vector<8x8x1xf32>
    %58 = vector.broadcast %57 : vector<8x8x1xf32> to vector<8x8x8xf32>
    %59 = arith.subf %55, %58 : vector<8x8x8xf32>
    %60 = math.exp %59 : vector<8x8x8xf32>
    %cst_20 = arith.constant dense<0.000000e+00> : vector<8x8xf32>
    %61 = vector.multi_reduction <add>, %60, %cst_20 [2] : vector<8x8x8xf32> to vector<8x8xf32>
    %62 = vector.shape_cast %61 : vector<8x8xf32> to vector<8x8x1xf32>
    %63 = tpu.reciprocal %62 {approx = true} : vector<8x8x1xf32> -> vector<8x8x1xf32>
    %64 = vector.broadcast %63 : vector<8x8x1xf32> to vector<8x8x8xf32>
    %65 = arith.mulf %60, %64 : vector<8x8x8xf32>
    "tpu.trace_start"() <{level = 10 : i32, message = "bqk,bkd->bqd"}> : () -> ()
    %cst_21 = arith.constant dense<0.000000e+00> : vector<8x8x32xf32>
    %66 = tpu.matmul %65, %52, %cst_21 {dimension_numbers = #tpu.dot_dimension_numbers<[2], [1], [1], [2], [0, 0, 0, 1, 1, 2], [0], [0]>} : vector<8x8x8xf32>, vector<8x8x32xf32>, vector<8x8x32xf32> -> vector<8x8x32xf32>
    "tpu.trace_stop"() : () -> ()
    %67 = vector.shape_cast %66 : vector<8x8x32xf32> to vector<64x32xf32>
    %68 = vector.extract_strided_slice %19 {offsets = [0, 64], sizes = [64, 32], strides = [1, 1]} : vector<64x128xf32> to vector<64x32xf32>
    %69 = arith.truncf %68 : vector<64x32xf32> to vector<64x32xbf16>
    %70 = vector.shape_cast %69 : vector<64x32xbf16> to vector<8x8x32xbf16>
    %71 = vector.extract_strided_slice %20 {offsets = [0, 64], sizes = [64, 32], strides = [1, 1]} : vector<64x128xf32> to vector<64x32xf32>
    %72 = arith.truncf %71 : vector<64x32xf32> to vector<64x32xbf16>
    %73 = vector.shape_cast %72 : vector<64x32xbf16> to vector<8x8x32xbf16>
    %74 = vector.extract_strided_slice %21 {offsets = [0, 64], sizes = [64, 32], strides = [1, 1]} : vector<64x128xf32> to vector<64x32xf32>
    %75 = vector.shape_cast %74 : vector<64x32xf32> to vector<8x8x32xf32>
    "tpu.trace_start"() <{level = 10 : i32, message = "bqd,bkd->bqk"}> : () -> ()
    %cst_22 = arith.constant dense<0.000000e+00> : vector<8x8x8xf32>
    %76 = tpu.matmul %70, %73, %cst_22 {dimension_numbers = #tpu.dot_dimension_numbers<[2], [2], [1], [1], [0, 0, 0, 1, 1, 1], [0], [0]>} : vector<8x8x32xbf16>, vector<8x8x32xbf16>, vector<8x8x8xf32> -> vector<8x8x8xf32>
    "tpu.trace_stop"() : () -> ()
    %cst_23 = arith.constant 0.176776692 : f32
    %77 = vector.broadcast %cst_23 : f32 to vector<8x8x8xf32>
    %78 = arith.mulf %76, %77 : vector<8x8x8xf32>
    %cst_24 = arith.constant dense<0xFF800000> : vector<8x8xf32>
    %79 = vector.multi_reduction <maximumf>, %78, %cst_24 [2] : vector<8x8x8xf32> to vector<8x8xf32>
    %80 = vector.shape_cast %79 : vector<8x8xf32> to vector<8x8x1xf32>
    %81 = vector.broadcast %80 : vector<8x8x1xf32> to vector<8x8x8xf32>
    %82 = arith.subf %78, %81 : vector<8x8x8xf32>
    %83 = math.exp %82 : vector<8x8x8xf32>
    %cst_25 = arith.constant dense<0.000000e+00> : vector<8x8xf32>
    %84 = vector.multi_reduction <add>, %83, %cst_25 [2] : vector<8x8x8xf32> to vector<8x8xf32>
    %85 = vector.shape_cast %84 : vector<8x8xf32> to vector<8x8x1xf32>
    %86 = tpu.reciprocal %85 {approx = true} : vector<8x8x1xf32> -> vector<8x8x1xf32>
    %87 = vector.broadcast %86 : vector<8x8x1xf32> to vector<8x8x8xf32>
    %88 = arith.mulf %83, %87 : vector<8x8x8xf32>
    "tpu.trace_start"() <{level = 10 : i32, message = "bqk,bkd->bqd"}> : () -> ()
    %cst_26 = arith.constant dense<0.000000e+00> : vector<8x8x32xf32>
    %89 = tpu.matmul %88, %75, %cst_26 {dimension_numbers = #tpu.dot_dimension_numbers<[2], [1], [1], [2], [0, 0, 0, 1, 1, 2], [0], [0]>} : vector<8x8x8xf32>, vector<8x8x32xf32>, vector<8x8x32xf32> -> vector<8x8x32xf32>
    "tpu.trace_stop"() : () -> ()
    %90 = vector.shape_cast %89 : vector<8x8x32xf32> to vector<64x32xf32>
    %91 = vector.extract_strided_slice %19 {offsets = [0, 96], sizes = [64, 32], strides = [1, 1]} : vector<64x128xf32> to vector<64x32xf32>
    %92 = arith.truncf %91 : vector<64x32xf32> to vector<64x32xbf16>
    %93 = vector.shape_cast %92 : vector<64x32xbf16> to vector<8x8x32xbf16>
    %94 = vector.extract_strided_slice %20 {offsets = [0, 96], sizes = [64, 32], strides = [1, 1]} : vector<64x128xf32> to vector<64x32xf32>
    %95 = arith.truncf %94 : vector<64x32xf32> to vector<64x32xbf16>
    %96 = vector.shape_cast %95 : vector<64x32xbf16> to vector<8x8x32xbf16>
    %97 = vector.extract_strided_slice %21 {offsets = [0, 96], sizes = [64, 32], strides = [1, 1]} : vector<64x128xf32> to vector<64x32xf32>
    %98 = vector.shape_cast %97 : vector<64x32xf32> to vector<8x8x32xf32>
    "tpu.trace_start"() <{level = 10 : i32, message = "bqd,bkd->bqk"}> : () -> ()
    %cst_27 = arith.constant dense<0.000000e+00> : vector<8x8x8xf32>
    %99 = tpu.matmul %93, %96, %cst_27 {dimension_numbers = #tpu.dot_dimension_numbers<[2], [2], [1], [1], [0, 0, 0, 1, 1, 1], [0], [0]>} : vector<8x8x32xbf16>, vector<8x8x32xbf16>, vector<8x8x8xf32> -> vector<8x8x8xf32>
    "tpu.trace_stop"() : () -> ()
    %cst_28 = arith.constant 0.176776692 : f32
    %100 = vector.broadcast %cst_28 : f32 to vector<8x8x8xf32>
    %101 = arith.mulf %99, %100 : vector<8x8x8xf32>
    %cst_29 = arith.constant dense<0xFF800000> : vector<8x8xf32>
    %102 = vector.multi_reduction <maximumf>, %101, %cst_29 [2] : vector<8x8x8xf32> to vector<8x8xf32>
    %103 = vector.shape_cast %102 : vector<8x8xf32> to vector<8x8x1xf32>
    %104 = vector.broadcast %103 : vector<8x8x1xf32> to vector<8x8x8xf32>
    %105 = arith.subf %101, %104 : vector<8x8x8xf32>
    %106 = math.exp %105 : vector<8x8x8xf32>
    %cst_30 = arith.constant dense<0.000000e+00> : vector<8x8xf32>
    %107 = vector.multi_reduction <add>, %106, %cst_30 [2] : vector<8x8x8xf32> to vector<8x8xf32>
    %108 = vector.shape_cast %107 : vector<8x8xf32> to vector<8x8x1xf32>
    %109 = tpu.reciprocal %108 {approx = true} : vector<8x8x1xf32> -> vector<8x8x1xf32>
    %110 = vector.broadcast %109 : vector<8x8x1xf32> to vector<8x8x8xf32>
    %111 = arith.mulf %106, %110 : vector<8x8x8xf32>
    "tpu.trace_start"() <{level = 10 : i32, message = "bqk,bkd->bqd"}> : () -> ()
    %cst_31 = arith.constant dense<0.000000e+00> : vector<8x8x32xf32>
    %112 = tpu.matmul %111, %98, %cst_31 {dimension_numbers = #tpu.dot_dimension_numbers<[2], [1], [1], [2], [0, 0, 0, 1, 1, 2], [0], [0]>} : vector<8x8x8xf32>, vector<8x8x32xf32>, vector<8x8x32xf32> -> vector<8x8x32xf32>
    "tpu.trace_stop"() : () -> ()
    %113 = vector.shape_cast %112 : vector<8x8x32xf32> to vector<64x32xf32>
    %114 = tpu.concatenate %44, %67, %90, %113 in 1 : vector<64x32xf32>, vector<64x32xf32>, vector<64x32xf32>, vector<64x32xf32> -> vector<64x128xf32>
    %115 = arith.truncf %114 : vector<64x128xf32> to vector<64x128xbf16>
    %c0_32 = arith.constant 0 : index
    %c0_33 = arith.constant 0 : index
    %116 = vector.load %arg7[%c0_32, %c0_33] : memref<128x128xbf16, #tpu.memory_space<vmem>>, vector<128x128xbf16>
    %cst_34 = arith.constant dense<0.000000e+00> : vector<64x128xf32>
    %117 = tpu.matmul %115, %116, %cst_34 {dimension_numbers = #tpu.dot_dimension_numbers<[1], [0], [0], [1], [0, 0, 1, 1], [], []>} : vector<64x128xbf16>, vector<128x128xbf16>, vector<64x128xf32> -> vector<64x128xf32>
    %c0_35 = arith.constant 0 : index
    %c0_36 = arith.constant 0 : index
    %118 = vector.load %arg8[%c0_35, %c0_36] : memref<1x128xf32, #tpu.memory_space<vmem>>, vector<1x128xf32>
    %119 = vector.broadcast %118 : vector<1x128xf32> to vector<64x128xf32>
    %120 = arith.addf %117, %119 : vector<64x128xf32>
    %121 = arith.addf %120, %12 : vector<64x128xf32>
    %cst_37 = arith.constant dense<0.000000e+00> : vector<64xf32>
    %122 = vector.multi_reduction <add>, %121, %cst_37 [1] : vector<64x128xf32> to vector<64xf32>
    %123 = vector.shape_cast %122 : vector<64xf32> to vector<64x1xf32>
    %cst_38 = arith.constant 1.280000e+02 : f32
    %124 = vector.broadcast %cst_38 : f32 to vector<64x1xf32>
    %125 = arith.divf %123, %124 : vector<64x1xf32>
    %126 = vector.broadcast %125 : vector<64x1xf32> to vector<64x128xf32>
    %127 = arith.subf %121, %126 : vector<64x128xf32>
    %128 = vector.broadcast %125 : vector<64x1xf32> to vector<64x128xf32>
    %129 = arith.subf %121, %128 : vector<64x128xf32>
    %130 = arith.mulf %127, %129 : vector<64x128xf32>
    %cst_39 = arith.constant dense<0.000000e+00> : vector<64xf32>
    %131 = vector.multi_reduction <add>, %130, %cst_39 [1] : vector<64x128xf32> to vector<64xf32>
    %132 = vector.shape_cast %131 : vector<64xf32> to vector<64x1xf32>
    %cst_40 = arith.constant 1.280000e+02 : f32
    %133 = vector.broadcast %cst_40 : f32 to vector<64x1xf32>
    %134 = arith.divf %132, %133 : vector<64x1xf32>
    %135 = vector.broadcast %125 : vector<64x1xf32> to vector<64x128xf32>
    %136 = arith.subf %121, %135 : vector<64x128xf32>
    %cst_41 = arith.constant 9.99999974E-6 : f32
    %137 = vector.broadcast %cst_41 : f32 to vector<64x1xf32>
    %138 = arith.addf %134, %137 : vector<64x1xf32>
    %139 = math.rsqrt %138 : vector<64x1xf32>
    %140 = vector.broadcast %139 : vector<64x1xf32> to vector<64x128xf32>
    %141 = arith.mulf %136, %140 : vector<64x128xf32>
    %c0_42 = arith.constant 0 : index
    %c0_43 = arith.constant 0 : index
    %142 = vector.load %arg9[%c0_42, %c0_43] : memref<1x128xf32, #tpu.memory_space<vmem>>, vector<1x128xf32>
    %143 = vector.broadcast %142 : vector<1x128xf32> to vector<64x128xf32>
    %144 = arith.mulf %141, %143 : vector<64x128xf32>
    %c0_44 = arith.constant 0 : index
    %c0_45 = arith.constant 0 : index
    %145 = vector.load %arg10[%c0_44, %c0_45] : memref<1x128xf32, #tpu.memory_space<vmem>>, vector<1x128xf32>
    %146 = vector.broadcast %145 : vector<1x128xf32> to vector<64x128xf32>
    %147 = arith.addf %144, %146 : vector<64x128xf32>
    %148 = arith.truncf %147 : vector<64x128xf32> to vector<64x128xbf16>
    %c0_46 = arith.constant 0 : index
    %c0_47 = arith.constant 0 : index
    %149 = vector.load %arg11[%c0_46, %c0_47] : memref<128x512xbf16, #tpu.memory_space<vmem>>, vector<128x512xbf16>
    %cst_48 = arith.constant dense<0.000000e+00> : vector<64x512xf32>
    %150 = tpu.matmul %148, %149, %cst_48 {dimension_numbers = #tpu.dot_dimension_numbers<[1], [0], [0], [1], [0, 0, 1, 1], [], []>} : vector<64x128xbf16>, vector<128x512xbf16>, vector<64x512xf32> -> vector<64x512xf32>
    %c0_49 = arith.constant 0 : index
    %c0_50 = arith.constant 0 : index
    %151 = vector.load %arg12[%c0_49, %c0_50] : memref<1x512xf32, #tpu.memory_space<vmem>>, vector<1x512xf32>
    %152 = vector.broadcast %151 : vector<1x512xf32> to vector<64x512xf32>
    %153 = arith.addf %150, %152 : vector<64x512xf32>
    %cst_51 = arith.constant 0.000000e+00 : f32
    %154 = vector.broadcast %cst_51 : f32 to vector<64x512xf32>
    %155 = arith.maximumf %153, %154 : vector<64x512xf32>
    %156 = arith.truncf %155 : vector<64x512xf32> to vector<64x512xbf16>
    %c0_52 = arith.constant 0 : index
    %c0_53 = arith.constant 0 : index
    %157 = vector.load %arg13[%c0_52, %c0_53] : memref<512x128xbf16, #tpu.memory_space<vmem>>, vector<512x128xbf16>
    %cst_54 = arith.constant dense<0.000000e+00> : vector<64x128xf32>
    %158 = tpu.matmul %156, %157, %cst_54 {dimension_numbers = #tpu.dot_dimension_numbers<[1], [0], [0], [1], [0, 0, 1, 1], [], []>} : vector<64x512xbf16>, vector<512x128xbf16>, vector<64x128xf32> -> vector<64x128xf32>
    %c0_55 = arith.constant 0 : index
    %c0_56 = arith.constant 0 : index
    %159 = vector.load %arg14[%c0_55, %c0_56] : memref<1x128xf32, #tpu.memory_space<vmem>>, vector<1x128xf32>
    %160 = vector.broadcast %159 : vector<1x128xf32> to vector<64x128xf32>
    %161 = arith.addf %158, %160 : vector<64x128xf32>
    %162 = arith.addf %161, %147 : vector<64x128xf32>
    %cst_57 = arith.constant dense<0.000000e+00> : vector<64xf32>
    %163 = vector.multi_reduction <add>, %162, %cst_57 [1] : vector<64x128xf32> to vector<64xf32>
    %164 = vector.shape_cast %163 : vector<64xf32> to vector<64x1xf32>
    %cst_58 = arith.constant 1.280000e+02 : f32
    %165 = vector.broadcast %cst_58 : f32 to vector<64x1xf32>
    %166 = arith.divf %164, %165 : vector<64x1xf32>
    %167 = vector.broadcast %166 : vector<64x1xf32> to vector<64x128xf32>
    %168 = arith.subf %162, %167 : vector<64x128xf32>
    %169 = vector.broadcast %166 : vector<64x1xf32> to vector<64x128xf32>
    %170 = arith.subf %162, %169 : vector<64x128xf32>
    %171 = arith.mulf %168, %170 : vector<64x128xf32>
    %cst_59 = arith.constant dense<0.000000e+00> : vector<64xf32>
    %172 = vector.multi_reduction <add>, %171, %cst_59 [1] : vector<64x128xf32> to vector<64xf32>
    %173 = vector.shape_cast %172 : vector<64xf32> to vector<64x1xf32>
    %cst_60 = arith.constant 1.280000e+02 : f32
    %174 = vector.broadcast %cst_60 : f32 to vector<64x1xf32>
    %175 = arith.divf %173, %174 : vector<64x1xf32>
    %176 = vector.broadcast %166 : vector<64x1xf32> to vector<64x128xf32>
    %177 = arith.subf %162, %176 : vector<64x128xf32>
    %cst_61 = arith.constant 9.99999974E-6 : f32
    %178 = vector.broadcast %cst_61 : f32 to vector<64x1xf32>
    %179 = arith.addf %175, %178 : vector<64x1xf32>
    %180 = math.rsqrt %179 : vector<64x1xf32>
    %181 = vector.broadcast %180 : vector<64x1xf32> to vector<64x128xf32>
    %182 = arith.mulf %177, %181 : vector<64x128xf32>
    %c0_62 = arith.constant 0 : index
    %c0_63 = arith.constant 0 : index
    %183 = vector.load %arg15[%c0_62, %c0_63] : memref<1x128xf32, #tpu.memory_space<vmem>>, vector<1x128xf32>
    %184 = vector.broadcast %183 : vector<1x128xf32> to vector<64x128xf32>
    %185 = arith.mulf %182, %184 : vector<64x128xf32>
    %c0_64 = arith.constant 0 : index
    %c0_65 = arith.constant 0 : index
    %186 = vector.load %arg16[%c0_64, %c0_65] : memref<1x128xf32, #tpu.memory_space<vmem>>, vector<1x128xf32>
    %187 = vector.broadcast %186 : vector<1x128xf32> to vector<64x128xf32>
    %188 = arith.addf %185, %187 : vector<64x128xf32>
    %c0_66 = arith.constant 0 : index
    %c0_67 = arith.constant 0 : index
    %189 = vector.load %arg17[%c0_66, %c0_67] : memref<64x128xf32, #tpu.memory_space<vmem>>, vector<64x128xf32>
    tpu.vector_store %arg17[%c0_66, %c0_67], %188 {strides = array<i32>} : memref<64x128xf32, #tpu.memory_space<vmem>>, vector<64x128xf32>,
    return
  }
  func.func @transform_0(%arg0: i32) -> (i32, i32) {
    %c0_i32 = arith.constant 0 : i32
    %c0_i32_0 = arith.constant 0 : i32
    return %arg0, %c0_i32 : i32, i32
  }
  func.func @transform_1(%arg0: i32) -> (i32, i32) {
    %c0_i32 = arith.constant 0 : i32
    %c0_i32_0 = arith.constant 0 : i32
    %c0_i32_1 = arith.constant 0 : i32
    return %c0_i32, %c0_i32_0 : i32, i32
  }
  func.func @transform_2(%arg0: i32) -> (i32, i32) {
    %c0_i32 = arith.constant 0 : i32
    %c0_i32_0 = arith.constant 0 : i32
    %c0_i32_1 = arith.constant 0 : i32
    return %c0_i32, %c0_i32_0 : i32, i32
  }
  func.func @transform_3(%arg0: i32) -> (i32, i32) {
    %c0_i32 = arith.constant 0 : i32
    %c0_i32_0 = arith.constant 0 : i32
    %c0_i32_1 = arith.constant 0 : i32
    return %c0_i32, %c0_i32_0 : i32, i32
  }
  func.func @transform_4(%arg0: i32) -> (i32, i32) {
    %c0_i32 = arith.constant 0 : i32
    %c0_i32_0 = arith.constant 0 : i32
    %c0_i32_1 = arith.constant 0 : i32
    return %c0_i32, %c0_i32_0 : i32, i32
  }
  func.func @transform_5(%arg0: i32) -> (i32, i32) {
    %c0_i32 = arith.constant 0 : i32
    %c0_i32_0 = arith.constant 0 : i32
    %c0_i32_1 = arith.constant 0 : i32
    return %c0_i32, %c0_i32_0 : i32, i32
  }
  func.func @transform_6(%arg0: i32) -> (i32, i32) {
    %c0_i32 = arith.constant 0 : i32
    %c0_i32_0 = arith.constant 0 : i32
    %c0_i32_1 = arith.constant 0 : i32
    return %c0_i32, %c0_i32_0 : i32, i32
  }
  func.func @transform_7(%arg0: i32) -> (i32, i32) {
    %c0_i32 = arith.constant 0 : i32
    %c0_i32_0 = arith.constant 0 : i32
    %c0_i32_1 = arith.constant 0 : i32
    return %c0_i32, %c0_i32_0 : i32, i32
  }
  func.func @transform_8(%arg0: i32) -> (i32, i32) {
    %c0_i32 = arith.constant 0 : i32
    %c0_i32_0 = arith.constant 0 : i32
    %c0_i32_1 = arith.constant 0 : i32
    return %c0_i32, %c0_i32_0 : i32, i32
  }
  func.func @transform_9(%arg0: i32) -> (i32, i32) {
    %c0_i32 = arith.constant 0 : i32
    %c0_i32_0 = arith.constant 0 : i32
    %c0_i32_1 = arith.constant 0 : i32
    return %c0_i32, %c0_i32_0 : i32, i32
  }
  func.func @transform_10(%arg0: i32) -> (i32, i32) {
    %c0_i32 = arith.constant 0 : i32
    %c0_i32_0 = arith.constant 0 : i32
    %c0_i32_1 = arith.constant 0 : i32
    return %c0_i32, %c0_i32_0 : i32, i32
  }
  func.func @transform_11(%arg0: i32) -> (i32, i32) {
    %c0_i32 = arith.constant 0 : i32
    %c0_i32_0 = arith.constant 0 : i32
    %c0_i32_1 = arith.constant 0 : i32
    return %c0_i32, %c0_i32_0 : i32, i32
  }
  func.func @transform_12(%arg0: i32) -> (i32, i32) {
    %c0_i32 = arith.constant 0 : i32
    %c0_i32_0 = arith.constant 0 : i32
    %c0_i32_1 = arith.constant 0 : i32
    return %c0_i32, %c0_i32_0 : i32, i32
  }
  func.func @transform_13(%arg0: i32) -> (i32, i32) {
    %c0_i32 = arith.constant 0 : i32
    %c0_i32_0 = arith.constant 0 : i32
    %c0_i32_1 = arith.constant 0 : i32
    return %c0_i32, %c0_i32_0 : i32, i32
  }
  func.func @transform_14(%arg0: i32) -> (i32, i32) {
    %c0_i32 = arith.constant 0 : i32
    %c0_i32_0 = arith.constant 0 : i32
    %c0_i32_1 = arith.constant 0 : i32
    return %c0_i32, %c0_i32_0 : i32, i32
  }
  func.func @transform_15(%arg0: i32) -> (i32, i32) {
    %c0_i32 = arith.constant 0 : i32
    %c0_i32_0 = arith.constant 0 : i32
    %c0_i32_1 = arith.constant 0 : i32
    return %c0_i32, %c0_i32_0 : i32, i32
  }
  func.func @transform_16(%arg0: i32) -> (i32, i32) {
    %c0_i32 = arith.constant 0 : i32
    %c0_i32_0 = arith.constant 0 : i32
    return %arg0, %c0_i32 : i32, i32
  }
}

module attributes {stable_mosaic.version = 11 : i64} {
  func.func @_spatial_kernel(%arg0: i32, %arg1: memref<1x8x32xf32, #tpu.memory_space<vmem>>, %arg2: memref<24x8xbf16, #tpu.memory_space<vmem>>, %arg3: memref<3x32x128xbf16, #tpu.memory_space<vmem>>, %arg4: memref<1x8x128xf32, #tpu.memory_space<vmem>>) attributes {dimension_semantics = [#tpu.dimension_semantics<parallel>], iteration_bounds = array<i64: 2>, scalar_prefetch = 0 : i64, scratch_operands = 0 : i64, tpu.core_type = #tpu.core_type<tc>, window_params = [{transform_indices = @transform_0, window_bounds = array<i64: 1, 8, 32>}, {pipeline_mode = #tpu.pipeline_mode<synchronous>, transform_indices = @transform_1, window_bounds = array<i64: 24, 8>}, {pipeline_mode = #tpu.pipeline_mode<synchronous>, transform_indices = @transform_2, window_bounds = array<i64: 3, 32, 128>}, {transform_indices = @transform_3, window_bounds = array<i64: 1, 8, 128>}]} {
    %c0 = arith.constant 0 : index
    %c0_0 = arith.constant 0 : index
    %c0_1 = arith.constant 0 : index
    %0 = vector.load %arg1[%c0, %c0_0, %c0_1] : memref<1x8x32xf32, #tpu.memory_space<vmem>>, vector<1x8x32xf32>
    %1 = vector.shape_cast %0 : vector<1x8x32xf32> to vector<8x32xf32>
    %2 = arith.truncf %1 : vector<8x32xf32> to vector<8x32xbf16>
    %c0_2 = arith.constant 0 : index
    %c0_3 = arith.constant 0 : index
    %3 = vector.load %arg2[%c0_2, %c0_3] : memref<24x8xbf16, #tpu.memory_space<vmem>>, vector<24x8xbf16>
    %cst = arith.constant dense<0.000000e+00> : vector<24x32xf32>
    %4 = tpu.matmul %3, %2, %cst {dimension_numbers = #tpu.dot_dimension_numbers<[1], [0], [0], [1], [0, 0, 1, 1], [], []>} : vector<24x8xbf16>, vector<8x32xbf16>, vector<24x32xf32> -> vector<24x32xf32>
    %5 = vector.extract_strided_slice %4 {offsets = [0, 0], sizes = [8, 32], strides = [1, 1]} : vector<24x32xf32> to vector<8x32xf32>
    %6 = arith.truncf %5 : vector<8x32xf32> to vector<8x32xbf16>
    %c0_4 = arith.constant 0 : index
    %c0_5 = arith.constant 0 : index
    %c0_6 = arith.constant 0 : index
    %7 = vector.load %arg3[%c0_4, %c0_5, %c0_6] : memref<3x32x128xbf16, #tpu.memory_space<vmem>>, vector<1x32x128xbf16>
    %8 = vector.shape_cast %7 : vector<1x32x128xbf16> to vector<32x128xbf16>
    %cst_7 = arith.constant dense<0.000000e+00> : vector<8x128xf32>
    %9 = tpu.matmul %6, %8, %cst_7 {dimension_numbers = #tpu.dot_dimension_numbers<[1], [0], [0], [1], [0, 0, 1, 1], [], []>} : vector<8x32xbf16>, vector<32x128xbf16>, vector<8x128xf32> -> vector<8x128xf32>
    %10 = vector.extract_strided_slice %4 {offsets = [8, 0], sizes = [8, 32], strides = [1, 1]} : vector<24x32xf32> to vector<8x32xf32>
    %11 = arith.truncf %10 : vector<8x32xf32> to vector<8x32xbf16>
    %c1 = arith.constant 1 : index
    %c0_8 = arith.constant 0 : index
    %c0_9 = arith.constant 0 : index
    %12 = vector.load %arg3[%c1, %c0_8, %c0_9] : memref<3x32x128xbf16, #tpu.memory_space<vmem>>, vector<1x32x128xbf16>
    %13 = vector.shape_cast %12 : vector<1x32x128xbf16> to vector<32x128xbf16>
    %cst_10 = arith.constant dense<0.000000e+00> : vector<8x128xf32>
    %14 = tpu.matmul %11, %13, %cst_10 {dimension_numbers = #tpu.dot_dimension_numbers<[1], [0], [0], [1], [0, 0, 1, 1], [], []>} : vector<8x32xbf16>, vector<32x128xbf16>, vector<8x128xf32> -> vector<8x128xf32>
    %15 = arith.addf %9, %14 : vector<8x128xf32>
    %16 = vector.extract_strided_slice %4 {offsets = [16, 0], sizes = [8, 32], strides = [1, 1]} : vector<24x32xf32> to vector<8x32xf32>
    %17 = arith.truncf %16 : vector<8x32xf32> to vector<8x32xbf16>
    %c2 = arith.constant 2 : index
    %c0_11 = arith.constant 0 : index
    %c0_12 = arith.constant 0 : index
    %18 = vector.load %arg3[%c2, %c0_11, %c0_12] : memref<3x32x128xbf16, #tpu.memory_space<vmem>>, vector<1x32x128xbf16>
    %19 = vector.shape_cast %18 : vector<1x32x128xbf16> to vector<32x128xbf16>
    %cst_13 = arith.constant dense<0.000000e+00> : vector<8x128xf32>
    %20 = tpu.matmul %17, %19, %cst_13 {dimension_numbers = #tpu.dot_dimension_numbers<[1], [0], [0], [1], [0, 0, 1, 1], [], []>} : vector<8x32xbf16>, vector<32x128xbf16>, vector<8x128xf32> -> vector<8x128xf32>
    %21 = arith.addf %15, %20 : vector<8x128xf32>
    %cst_14 = arith.constant 0.000000e+00 : f32
    %22 = vector.broadcast %cst_14 : f32 to vector<8x128xf32>
    %23 = arith.maximumf %21, %22 : vector<8x128xf32>
    %c0_15 = arith.constant 0 : index
    %c0_16 = arith.constant 0 : index
    %c0_17 = arith.constant 0 : index
    %24 = vector.load %arg4[%c0_15, %c0_16, %c0_17] : memref<1x8x128xf32, #tpu.memory_space<vmem>>, vector<1x8x128xf32>
    %25 = vector.shape_cast %24 : vector<1x8x128xf32> to vector<8x128xf32>
    %26 = vector.shape_cast %23 : vector<8x128xf32> to vector<1x8x128xf32>
    tpu.vector_store %arg4[%c0_15, %c0_16, %c0_17], %26 {strides = array<i32>} : memref<1x8x128xf32, #tpu.memory_space<vmem>>, vector<1x8x128xf32>,
    return
  }
  func.func @transform_0(%arg0: i32) -> (i32, i32, i32) {
    %c0_i32 = arith.constant 0 : i32
    %c0_i32_0 = arith.constant 0 : i32
    %c0_i32_1 = arith.constant 0 : i32
    return %arg0, %c0_i32, %c0_i32_0 : i32, i32, i32
  }
  func.func @transform_1(%arg0: i32) -> (i32, i32) {
    %c0_i32 = arith.constant 0 : i32
    %c0_i32_0 = arith.constant 0 : i32
    %c0_i32_1 = arith.constant 0 : i32
    return %c0_i32, %c0_i32_0 : i32, i32
  }
  func.func @transform_2(%arg0: i32) -> (i32, i32, i32) {
    %c0_i32 = arith.constant 0 : i32
    %c0_i32_0 = arith.constant 0 : i32
    %c0_i32_1 = arith.constant 0 : i32
    %c0_i32_2 = arith.constant 0 : i32
    return %c0_i32, %c0_i32_0, %c0_i32_1 : i32, i32, i32
  }
  func.func @transform_3(%arg0: i32) -> (i32, i32, i32) {
    %c0_i32 = arith.constant 0 : i32
    %c0_i32_0 = arith.constant 0 : i32
    %c0_i32_1 = arith.constant 0 : i32
    return %arg0, %c0_i32, %c0_i32_0 : i32, i32, i32
  }
}

module attributes {stable_mosaic.version = 11 : i64} {
  func.func @_spectral_attn_kernel(%arg0: i32, %arg1: memref<8x40xf32, #tpu.memory_space<vmem>>, %arg2: memref<8x40xf32, #tpu.memory_space<vmem>>, %arg3: memref<40x256xbf16, #tpu.memory_space<vmem>>, %arg4: memref<1x256xf32, #tpu.memory_space<vmem>>, %arg5: memref<8x40xf32, #tpu.memory_space<vmem>>) attributes {dimension_semantics = [#tpu.dimension_semantics<parallel>], iteration_bounds = array<i64: 2>, scalar_prefetch = 0 : i64, scratch_operands = 0 : i64, tpu.core_type = #tpu.core_type<tc>, window_params = [{transform_indices = @transform_0, window_bounds = array<i64: 8, 40>}, {transform_indices = @transform_1, window_bounds = array<i64: 8, 40>}, {pipeline_mode = #tpu.pipeline_mode<synchronous>, transform_indices = @transform_2, window_bounds = array<i64: 40, 256>}, {pipeline_mode = #tpu.pipeline_mode<synchronous>, transform_indices = @transform_3, window_bounds = array<i64: 1, 256>}, {transform_indices = @transform_4, window_bounds = array<i64: 8, 40>}]} {
    %c0 = arith.constant 0 : index
    %c0_0 = arith.constant 0 : index
    %0 = vector.load %arg1[%c0, %c0_0] : memref<8x40xf32, #tpu.memory_space<vmem>>, vector<8x40xf32>
    %1 = arith.truncf %0 : vector<8x40xf32> to vector<8x40xbf16>
    %c0_1 = arith.constant 0 : index
    %c0_2 = arith.constant 0 : index
    %2 = vector.load %arg3[%c0_1, %c0_2] : memref<40x256xbf16, #tpu.memory_space<vmem>>, vector<40x256xbf16>
    %cst = arith.constant dense<0.000000e+00> : vector<8x256xf32>
    %3 = tpu.matmul %1, %2, %cst {dimension_numbers = #tpu.dot_dimension_numbers<[1], [0], [0], [1], [0, 0, 1, 1], [], []>} : vector<8x40xbf16>, vector<40x256xbf16>, vector<8x256xf32> -> vector<8x256xf32>
    %c0_3 = arith.constant 0 : index
    %c0_4 = arith.constant 0 : index
    %4 = vector.load %arg4[%c0_3, %c0_4] : memref<1x256xf32, #tpu.memory_space<vmem>>, vector<1x256xf32>
    %5 = vector.broadcast %4 : vector<1x256xf32> to vector<8x256xf32>
    %6 = arith.addf %3, %5 : vector<8x256xf32>
    %7 = vector.extract_strided_slice %6 {offsets = [0, 0], sizes = [8, 128], strides = [1, 1]} : vector<8x256xf32> to vector<8x128xf32>
    %8 = vector.extract_strided_slice %6 {offsets = [0, 128], sizes = [8, 128], strides = [1, 1]} : vector<8x256xf32> to vector<8x128xf32>
    %9 = vector.extract_strided_slice %7 {offsets = [0, 0], sizes = [8, 32], strides = [1, 1]} : vector<8x128xf32> to vector<8x32xf32>
    %10 = vector.extract_strided_slice %8 {offsets = [0, 0], sizes = [8, 32], strides = [1, 1]} : vector<8x128xf32> to vector<8x32xf32>
    %cst_5 = arith.constant dense<0.000000e+00> : vector<8x8xf32>
    %11 = tpu.matmul %9, %10, %cst_5 {dimension_numbers = #tpu.dot_dimension_numbers<[1], [1], [0], [0], [0, 0, 1, 0], [], []>} : vector<8x32xf32>, vector<8x32xf32>, vector<8x8xf32> -> vector<8x8xf32>
    %cst_6 = arith.constant 0.176776692 : f32
    %12 = vector.broadcast %cst_6 : f32 to vector<8x8xf32>
    %13 = arith.mulf %11, %12 : vector<8x8xf32>
    %cst_7 = arith.constant dense<0xFF800000> : vector<8xf32>
    %14 = vector.multi_reduction <maximumf>, %13, %cst_7 [1] : vector<8x8xf32> to vector<8xf32>
    %15 = vector.shape_cast %14 : vector<8xf32> to vector<8x1xf32>
    %16 = vector.broadcast %15 : vector<8x1xf32> to vector<8x8xf32>
    %17 = arith.subf %13, %16 : vector<8x8xf32>
    %18 = math.exp %17 : vector<8x8xf32>
    %cst_8 = arith.constant dense<0.000000e+00> : vector<8xf32>
    %19 = vector.multi_reduction <add>, %18, %cst_8 [1] : vector<8x8xf32> to vector<8xf32>
    %20 = vector.shape_cast %19 : vector<8xf32> to vector<8x1xf32>
    %21 = tpu.reciprocal %20 {approx = true} : vector<8x1xf32> -> vector<8x1xf32>
    %22 = vector.broadcast %21 : vector<8x1xf32> to vector<8x8xf32>
    %23 = arith.mulf %18, %22 : vector<8x8xf32>
    %24 = vector.extract_strided_slice %7 {offsets = [0, 32], sizes = [8, 32], strides = [1, 1]} : vector<8x128xf32> to vector<8x32xf32>
    %25 = vector.extract_strided_slice %8 {offsets = [0, 32], sizes = [8, 32], strides = [1, 1]} : vector<8x128xf32> to vector<8x32xf32>
    %cst_9 = arith.constant dense<0.000000e+00> : vector<8x8xf32>
    %26 = tpu.matmul %24, %25, %cst_9 {dimension_numbers = #tpu.dot_dimension_numbers<[1], [1], [0], [0], [0, 0, 1, 0], [], []>} : vector<8x32xf32>, vector<8x32xf32>, vector<8x8xf32> -> vector<8x8xf32>
    %cst_10 = arith.constant 0.176776692 : f32
    %27 = vector.broadcast %cst_10 : f32 to vector<8x8xf32>
    %28 = arith.mulf %26, %27 : vector<8x8xf32>
    %cst_11 = arith.constant dense<0xFF800000> : vector<8xf32>
    %29 = vector.multi_reduction <maximumf>, %28, %cst_11 [1] : vector<8x8xf32> to vector<8xf32>
    %30 = vector.shape_cast %29 : vector<8xf32> to vector<8x1xf32>
    %31 = vector.broadcast %30 : vector<8x1xf32> to vector<8x8xf32>
    %32 = arith.subf %28, %31 : vector<8x8xf32>
    %33 = math.exp %32 : vector<8x8xf32>
    %cst_12 = arith.constant dense<0.000000e+00> : vector<8xf32>
    %34 = vector.multi_reduction <add>, %33, %cst_12 [1] : vector<8x8xf32> to vector<8xf32>
    %35 = vector.shape_cast %34 : vector<8xf32> to vector<8x1xf32>
    %36 = tpu.reciprocal %35 {approx = true} : vector<8x1xf32> -> vector<8x1xf32>
    %37 = vector.broadcast %36 : vector<8x1xf32> to vector<8x8xf32>
    %38 = arith.mulf %33, %37 : vector<8x8xf32>
    %39 = arith.addf %23, %38 : vector<8x8xf32>
    %40 = vector.extract_strided_slice %7 {offsets = [0, 64], sizes = [8, 32], strides = [1, 1]} : vector<8x128xf32> to vector<8x32xf32>
    %41 = vector.extract_strided_slice %8 {offsets = [0, 64], sizes = [8, 32], strides = [1, 1]} : vector<8x128xf32> to vector<8x32xf32>
    %cst_13 = arith.constant dense<0.000000e+00> : vector<8x8xf32>
    %42 = tpu.matmul %40, %41, %cst_13 {dimension_numbers = #tpu.dot_dimension_numbers<[1], [1], [0], [0], [0, 0, 1, 0], [], []>} : vector<8x32xf32>, vector<8x32xf32>, vector<8x8xf32> -> vector<8x8xf32>
    %cst_14 = arith.constant 0.176776692 : f32
    %43 = vector.broadcast %cst_14 : f32 to vector<8x8xf32>
    %44 = arith.mulf %42, %43 : vector<8x8xf32>
    %cst_15 = arith.constant dense<0xFF800000> : vector<8xf32>
    %45 = vector.multi_reduction <maximumf>, %44, %cst_15 [1] : vector<8x8xf32> to vector<8xf32>
    %46 = vector.shape_cast %45 : vector<8xf32> to vector<8x1xf32>
    %47 = vector.broadcast %46 : vector<8x1xf32> to vector<8x8xf32>
    %48 = arith.subf %44, %47 : vector<8x8xf32>
    %49 = math.exp %48 : vector<8x8xf32>
    %cst_16 = arith.constant dense<0.000000e+00> : vector<8xf32>
    %50 = vector.multi_reduction <add>, %49, %cst_16 [1] : vector<8x8xf32> to vector<8xf32>
    %51 = vector.shape_cast %50 : vector<8xf32> to vector<8x1xf32>
    %52 = tpu.reciprocal %51 {approx = true} : vector<8x1xf32> -> vector<8x1xf32>
    %53 = vector.broadcast %52 : vector<8x1xf32> to vector<8x8xf32>
    %54 = arith.mulf %49, %53 : vector<8x8xf32>
    %55 = arith.addf %39, %54 : vector<8x8xf32>
    %56 = vector.extract_strided_slice %7 {offsets = [0, 96], sizes = [8, 32], strides = [1, 1]} : vector<8x128xf32> to vector<8x32xf32>
    %57 = vector.extract_strided_slice %8 {offsets = [0, 96], sizes = [8, 32], strides = [1, 1]} : vector<8x128xf32> to vector<8x32xf32>
    %cst_17 = arith.constant dense<0.000000e+00> : vector<8x8xf32>
    %58 = tpu.matmul %56, %57, %cst_17 {dimension_numbers = #tpu.dot_dimension_numbers<[1], [1], [0], [0], [0, 0, 1, 0], [], []>} : vector<8x32xf32>, vector<8x32xf32>, vector<8x8xf32> -> vector<8x8xf32>
    %cst_18 = arith.constant 0.176776692 : f32
    %59 = vector.broadcast %cst_18 : f32 to vector<8x8xf32>
    %60 = arith.mulf %58, %59 : vector<8x8xf32>
    %cst_19 = arith.constant dense<0xFF800000> : vector<8xf32>
    %61 = vector.multi_reduction <maximumf>, %60, %cst_19 [1] : vector<8x8xf32> to vector<8xf32>
    %62 = vector.shape_cast %61 : vector<8xf32> to vector<8x1xf32>
    %63 = vector.broadcast %62 : vector<8x1xf32> to vector<8x8xf32>
    %64 = arith.subf %60, %63 : vector<8x8xf32>
    %65 = math.exp %64 : vector<8x8xf32>
    %cst_20 = arith.constant dense<0.000000e+00> : vector<8xf32>
    %66 = vector.multi_reduction <add>, %65, %cst_20 [1] : vector<8x8xf32> to vector<8xf32>
    %67 = vector.shape_cast %66 : vector<8xf32> to vector<8x1xf32>
    %68 = tpu.reciprocal %67 {approx = true} : vector<8x1xf32> -> vector<8x1xf32>
    %69 = vector.broadcast %68 : vector<8x1xf32> to vector<8x8xf32>
    %70 = arith.mulf %65, %69 : vector<8x8xf32>
    %71 = arith.addf %55, %70 : vector<8x8xf32>
    %cst_21 = arith.constant 2.500000e-01 : f32
    %72 = vector.broadcast %cst_21 : f32 to vector<8x8xf32>
    %73 = arith.mulf %71, %72 : vector<8x8xf32>
    %c0_22 = arith.constant 0 : index
    %c0_23 = arith.constant 0 : index
    %74 = vector.load %arg2[%c0_22, %c0_23] : memref<8x40xf32, #tpu.memory_space<vmem>>, vector<8x40xf32>
    %cst_24 = arith.constant dense<0.000000e+00> : vector<8x40xf32>
    %75 = tpu.matmul %73, %74, %cst_24 {dimension_numbers = #tpu.dot_dimension_numbers<[1], [0], [0], [1], [0, 0, 1, 1], [], []>} : vector<8x8xf32>, vector<8x40xf32>, vector<8x40xf32> -> vector<8x40xf32>
    %c0_25 = arith.constant 0 : index
    %c0_26 = arith.constant 0 : index
    %76 = vector.load %arg5[%c0_25, %c0_26] : memref<8x40xf32, #tpu.memory_space<vmem>>, vector<8x40xf32>
    tpu.vector_store %arg5[%c0_25, %c0_26], %75 {strides = array<i32>} : memref<8x40xf32, #tpu.memory_space<vmem>>, vector<8x40xf32>,
    return
  }
  func.func @transform_0(%arg0: i32) -> (i32, i32) {
    %c0_i32 = arith.constant 0 : i32
    %c0_i32_0 = arith.constant 0 : i32
    return %arg0, %c0_i32 : i32, i32
  }
  func.func @transform_1(%arg0: i32) -> (i32, i32) {
    %c0_i32 = arith.constant 0 : i32
    %c0_i32_0 = arith.constant 0 : i32
    return %arg0, %c0_i32 : i32, i32
  }
  func.func @transform_2(%arg0: i32) -> (i32, i32) {
    %c0_i32 = arith.constant 0 : i32
    %c0_i32_0 = arith.constant 0 : i32
    %c0_i32_1 = arith.constant 0 : i32
    return %c0_i32, %c0_i32_0 : i32, i32
  }
  func.func @transform_3(%arg0: i32) -> (i32, i32) {
    %c0_i32 = arith.constant 0 : i32
    %c0_i32_0 = arith.constant 0 : i32
    %c0_i32_1 = arith.constant 0 : i32
    return %c0_i32, %c0_i32_0 : i32, i32
  }
  func.func @transform_4(%arg0: i32) -> (i32, i32) {
    %c0_i32 = arith.constant 0 : i32
    %c0_i32_0 = arith.constant 0 : i32
    return %arg0, %c0_i32 : i32, i32
  }
}

module attributes {stable_mosaic.version = 11 : i64} {
  func.func @_linear_kernel(%arg0: i32, %arg1: memref<64x4xf32, #tpu.memory_space<vmem>>, %arg2: memref<4x128xbf16, #tpu.memory_space<vmem>>, %arg3: memref<1x128xf32, #tpu.memory_space<vmem>>, %arg4: memref<64x128xf32, #tpu.memory_space<vmem>>) attributes {dimension_semantics = [#tpu.dimension_semantics<parallel>], iteration_bounds = array<i64: 2>, scalar_prefetch = 0 : i64, scratch_operands = 0 : i64, tpu.core_type = #tpu.core_type<tc>, window_params = [{transform_indices = @transform_0, window_bounds = array<i64: 64, 4>}, {pipeline_mode = #tpu.pipeline_mode<synchronous>, transform_indices = @transform_1, window_bounds = array<i64: 4, 128>}, {pipeline_mode = #tpu.pipeline_mode<synchronous>, transform_indices = @transform_2, window_bounds = array<i64: 1, 128>}, {transform_indices = @transform_3, window_bounds = array<i64: 64, 128>}]} {
    %c0 = arith.constant 0 : index
    %c0_0 = arith.constant 0 : index
    %0 = vector.load %arg1[%c0, %c0_0] : memref<64x4xf32, #tpu.memory_space<vmem>>, vector<64x4xf32>
    %1 = arith.truncf %0 : vector<64x4xf32> to vector<64x4xbf16>
    %c0_1 = arith.constant 0 : index
    %c0_2 = arith.constant 0 : index
    %2 = vector.load %arg2[%c0_1, %c0_2] : memref<4x128xbf16, #tpu.memory_space<vmem>>, vector<4x128xbf16>
    %cst = arith.constant dense<0.000000e+00> : vector<64x128xf32>
    %3 = tpu.matmul %1, %2, %cst {dimension_numbers = #tpu.dot_dimension_numbers<[1], [0], [0], [1], [0, 0, 1, 1], [], []>} : vector<64x4xbf16>, vector<4x128xbf16>, vector<64x128xf32> -> vector<64x128xf32>
    %c0_3 = arith.constant 0 : index
    %c0_4 = arith.constant 0 : index
    %4 = vector.load %arg3[%c0_3, %c0_4] : memref<1x128xf32, #tpu.memory_space<vmem>>, vector<1x128xf32>
    %5 = vector.broadcast %4 : vector<1x128xf32> to vector<64x128xf32>
    %6 = arith.addf %3, %5 : vector<64x128xf32>
    %c0_5 = arith.constant 0 : index
    %c0_6 = arith.constant 0 : index
    %7 = vector.load %arg4[%c0_5, %c0_6] : memref<64x128xf32, #tpu.memory_space<vmem>>, vector<64x128xf32>
    tpu.vector_store %arg4[%c0_5, %c0_6], %6 {strides = array<i32>} : memref<64x128xf32, #tpu.memory_space<vmem>>, vector<64x128xf32>,
    return
  }
  func.func @transform_0(%arg0: i32) -> (i32, i32) {
    %c0_i32 = arith.constant 0 : i32
    %c0_i32_0 = arith.constant 0 : i32
    return %arg0, %c0_i32 : i32, i32
  }
  func.func @transform_1(%arg0: i32) -> (i32, i32) {
    %c0_i32 = arith.constant 0 : i32
    %c0_i32_0 = arith.constant 0 : i32
    %c0_i32_1 = arith.constant 0 : i32
    return %c0_i32, %c0_i32_0 : i32, i32
  }
  func.func @transform_2(%arg0: i32) -> (i32, i32) {
    %c0_i32 = arith.constant 0 : i32
    %c0_i32_0 = arith.constant 0 : i32
    %c0_i32_1 = arith.constant 0 : i32
    return %c0_i32, %c0_i32_0 : i32, i32
  }
  func.func @transform_3(%arg0: i32) -> (i32, i32) {
    %c0_i32 = arith.constant 0 : i32
    %c0_i32_0 = arith.constant 0 : i32
    return %arg0, %c0_i32 : i32, i32
  }
}

</mosaic_0001>

<bundles_post_ra>
// kernel: encoder_forward.5
= control target key start
LH: loop header
LB: loop body
LE: loop exit
PB: predicated region body
PF: predicated region fallthrough
CT: control target
= control target key end

     0   :  { %s460_s12 = smov 0   ;;  %s508_s0 = inlined_call_operand.vmem [shape: f32[2,8,32], index: 0, kind: input, shape index: {}]   ;;  %s509_s1 = inlined_call_operand.vmem [shape: bf16[24,8], index: 1, kind: input, shape index: {}]   ;;  %s510_s2 = inlined_call_operand.vmem [shape: bf16[3,32,128], index: 2, kind: input, shape index: {}]   ;;  %s511_s3 = inlined_call_operand.vmem [shape: f32[2,8,128], index: 3, kind: output, shape index: {}]  }
   0x1 LB: > { %s367_s13 = sadd.s32 4294967295, %s438_s12   ;;  %p371_p0 = scmp.ge.s32.totalorder %s438_s12, 1  ;;  %s438_s12 = sphi %s460_s12, %s13_s12  }
   0x2   : > { %p136_p1 = scmp.lt.s32.totalorder %s438_s12, 3 }
   0x4   : > { %p137_p2 = pnand %p371_p0, %p136_p1 }
   0x5   : > { %p158_p3 = scmp.lt.s32.totalorder (!%p137_p2), %s367_s13, 1 }
   0x6   : > { %140 = sbr.rel (%p137_p2) target bundleno = 305 (0x131), region = 32 }
   0xb   : > { %v419_v0 = vld [vmem:[%s510_s2 + $0x8] sm:$0xff]  ;;  %s513_s13 = smov (!%p158_p3, %s367_s13), 1  ;;  %vm187_vm0 = vcmask 1043456   ;;  %v417_v4 = vld [vmem:[%s509_s1] sm:$0xff]  ;;  %vm180_vm1 = vcmask 64512   ;;  %v421_v9 = vld [vmem:[%s510_s2 + $0x18] sm:$0xff] }
   0xc   : > { %270 = vmatpush.bf16.msra.mxu2 %v419_v0  ;;  %s372_s16 = sshll.u32 %s513_s13, 3  ;;  %v171_v5 = vld [vmem:[%s509_s1 + $0x8] sm:$0xf]  ;;  %v418_v8 = vld [vmem:[%s510_s2] sm:$0xff]  ;;  %242 = vmatpush.bf16.msra.mxu1 %v421_v9  ;;  %v420_v10 = vld [vmem:[%s510_s2 + $0x10] sm:$0xff]  ;;  %vm232_vm2 = vcmask 261120  }
   0xd   : > { %s161_s19 = scalar_lea.vmem %s508_s0, %s372_s16  ;;  %v177_v6 = vunpack.c.l.b16 %v171_v5  ;;  %v423_v11 = vld [vmem:[%s510_s2 + $0x28] sm:$0xff]  ;;  %v422_v12 = vld [vmem:[%s510_s2 + $0x20] sm:$0xff]  ;;  %s165_s9 = scalar_lea.vmem %s511_s3, %s372_s16 }
   0xe   : > { %v167_v1 = vld [vmem:[%s161_s19] sm:$0xff]  ;;  %304 = vmatpush.bf16.msra.mxu3 %v423_v11 }
   0xf   : > { %v168_v2 = vpack.c.bf16 %v167_v1, %v167_v1  ;;  %v179_v7 = vpack.c.b16 %v177_v6, %v177_v6 }
  0x10   : > { %271 = vmatpush.bf16.msra.mxu2 %v418_v8  ;;  %243 = vmatpush.bf16.msra.mxu1 %v420_v10 }
  0x11   : > { %v189_v3 = vsel %vm187_vm0, %v168_v2, 0 }
  0x12   : > { %198 = vmatpush.bf16.msra.mxu0 %v189_v3  ;;  %305 = vmatpush.bf16.msra.mxu3 %v422_v12 }
  0x15   : > { %378 = vmatmul.msk.bf16.vlgmr.msra.gmra.mxu0 %vm180_vm1, %v417_v4 }
  0x25   : > { %379 = vmatmul.msk.bf16.gmra.mxu0 %vm180_vm1, %v179_v7 }
  0x92   : > { %v200_v13 = vpop.f32.mrf.mxu0 }
  0x93   : > { %v209_v14 = vpack.c.bf16 %v200_v13, %v200_v13 }
  0x95   : > { %401 = vmatmul.msk.bf16.vlgmr.msra.gmra.mxu2 %vm232_vm2, %v209_v14 }
  0x9a   : > { %v202_v15 = vpop.f32.mrf.mxu0 }
  0x9b   : > { %v214_v16 = vpack.c.bf16 %v202_v15, %v202_v15 }
  0x9d   : > { %392 = vmatmul.msk.bf16.vlgmr.msra.gmra.mxu1 %vm232_vm2, %v214_v16 }
  0xa2   : > { %v205_v17 = vpop.f32.mrf.mxu0 }
  0xa3   : > { %v277_v18 = vpack.c.bf16 %v205_v17, %v205_v17 }
  0xa5   : > { %414 = vmatmul.msk.bf16.vlgmr.msra.gmra.mxu3 %vm232_vm2, %v277_v18 }
  0xaa   : > { %v207_v19 = vpop.f32.mrf.mxu0 }
 0x118   : > { %v273_v20 = vpop.f32.mrf.mxu2 }
 0x11a   : > { %v245_v21 = vpop.f32.mrf.mxu1 }
 0x11b   : > { %v274_v24 = vadd.f32 %v273_v20, %v245_v21 }
 0x120   : > { %v275_v22 = vpop.f32.mrf.mxu2 }
 0x122   : > { %v247_v23 = vpop.f32.mrf.mxu1 }
 0x128   : > { %v307_v25 = vpop.f32.mrf.mxu3 }
 0x129   : > { %v311_v26 = vadd.f32 %v307_v25, %v274_v24 }
 0x12b   : > { %v312_v27 = vmax.f32 %v311_v26, 0.0 }
 0x12d   : > { %313 = vst [vmem:[%s165_s9] sm:$0xff] %v312_v27 }
 0x130   : > { %v309_v28 = vpop.f32.mrf.mxu3 }
 0x131 PF: > { %s13_s12 = sadd.s32 1, %s438_s12  }
 0x132   : > { %p10_p4 = scmp.ge.s32.totalorder %s13_s12, 4  }
 0x134   :  { %12 = sbr.rel (!%p10_p4) target bundleno = 1 (0x1), region = 64 }

// kernel: reverse.0
= control target key start
LH: loop header
LB: loop body
LE: loop exit
PB: predicated region body
PF: predicated region fallthrough
CT: control target
= control target key end

     0   :  { %v2_v0 = vlaneseq  ;;  %s241_s0 = inlined_call_operand.vmem [shape: f32[2,8,4,3], index: 0, kind: input, shape index: {}]   ;;  %s242_s1 = inlined_call_operand.vmem [shape: f32[2,8,4,3], index: 1, kind: output, shape index: {}]  }
   0x1   :  { %v51_v2 = vld [vmem:[%s241_s0 + $0x10] sm:$0xff]  ;;  %v47_v3 = vld [vmem:[%s241_s0] sm:$0xff]  ;;  %v53_v5 = vld [vmem:[%s241_s0 + $0x18] sm:$0xff] }
   0x2   :  { %v3_v1 = vsub.s32 2, %v2_v0  ;;  %v55_v4 = vld [vmem:[%s241_s0 + $0x20] sm:$0xff]  ;;  %v49_v6 = vld [vmem:[%s241_s0 + $0x8] sm:$0xff]  ;;  %v61_v8 = vld [vmem:[%s241_s0 + $0x38] sm:$0xff] }
   0x3   :  { %v57_v7 = vld [vmem:[%s241_s0 + $0x28] sm:$0xff]  ;;  %v59_v9 = vld [vmem:[%s241_s0 + $0x30] sm:$0xff] }
   0x4   :  { %4 = vset.pattern.permute.xlu0 %v3_v1  ;;  %181 = vset.pattern.permute.xlu1 %v3_v1 }
   0x5   :  { %182 = vset.pattern.permute.xlu2 %v3_v1  ;;  %79 = vperm.xlu1 %181, %v51_v2  }
   0x6   :  { %67 = vperm.xlu0 %4, %v47_v3   ;;  %91 = vperm.xlu2 %182, %v55_v4  }
   0xd   :  { %85 = vperm.xlu1 %181, %v53_v5  }
   0xe   :  { %73 = vperm.xlu0 %4, %v49_v6   ;;  %97 = vperm.xlu2 %182, %v57_v7  }
  0x15   :  { %109 = vperm.xlu1 %181, %v61_v8  }
  0x16   :  { %103 = vperm.xlu0 %4, %v59_v9  }
  0x60   :  { %v92_v10 = vpop.permute.xlu2 %91 }
  0x61   :  { %163 = vst [vmem:[%s242_s1 + $0x20] sm:$0xff] %v92_v10 }
  0x68   :  { %v98_v11 = vpop.permute.xlu2 %97 }
  0x69   :  { %165 = vst [vmem:[%s242_s1 + $0x28] sm:$0xff] %v98_v11 }
  0x77   :  { %v80_v12 = vpop.permute.xlu1 %79 }
  0x78   :  { %v68_v13 = vpop.permute.xlu0 %67  ;;  %159 = vst [vmem:[%s242_s1 + $0x10] sm:$0xff] %v80_v12 }
  0x79   :  { %155 = vst [vmem:[%s242_s1] sm:$0xff] %v68_v13 }
  0x7f   :  { %v86_v14 = vpop.permute.xlu1 %85 }
  0x80   :  { %v74_v15 = vpop.permute.xlu0 %73  ;;  %161 = vst [vmem:[%s242_s1 + $0x18] sm:$0xff] %v86_v14 }
  0x81   :  { %157 = vst [vmem:[%s242_s1 + $0x8] sm:$0xff] %v74_v15 }
  0x87   :  { %v110_v16 = vpop.permute.xlu1 %109 }
  0x88   :  { %v104_v17 = vpop.permute.xlu0 %103  ;;  %169 = vst [vmem:[%s242_s1 + $0x38] sm:$0xff] %v110_v16 }
  0x89   :  { %167 = vst [vmem:[%s242_s1 + $0x30] sm:$0xff] %v104_v17 }

// kernel: encoder_forward.6
= control target key start
LH: loop header
LB: loop body
LE: loop exit
PB: predicated region body
PF: predicated region fallthrough
CT: control target
= control target key end

     0   :  { %s644_s15 = smov 0   ;;  %s719_s0 = inlined_call_operand.vmem [shape: f32[16,40], index: 0, kind: input, shape index: {}]   ;;  %s720_s1 = inlined_call_operand.vmem [shape: f32[16,40], index: 1, kind: input, shape index: {}]   ;;  %s721_s2 = inlined_call_operand.vmem [shape: bf16[40,256], index: 2, kind: input, shape index: {}]   ;;  %s722_s3 = inlined_call_operand.vmem [shape: f32[1,256], index: 3, kind: input, shape index: {}]   ;;  %s723_s4 = inlined_call_operand.vmem [shape: f32[16,40], index: 4, kind: output, shape index: {}]  }
   0x1 LB: > { %s540_s16 = sadd.s32 4294967295, %s614_s15   ;;  %p544_p0 = scmp.ge.s32.totalorder %s614_s15, 1  ;;  %s614_s15 = sphi %s644_s15, %s14_s15  }
   0x2   : > { %p170_p1 = scmp.lt.s32.totalorder %s614_s15, 3 }
   0x4   : > { %p171_p2 = pnand %p544_p0, %p170_p1 }
   0x5   : > { %p198_p3 = scmp.lt.s32.totalorder (!%p171_p2), %s540_s16, 1  ;;  %s617_s17 = smov (!%p171_p2), 96  }
   0x6   : > { %174 = sbr.rel (%p171_p2) target bundleno = 812 (0x32c), region = 36  ;;  %s618_s18 = smov (!%p171_p2), 32  }
   0xb   : > { %v217_v0 = vld [vmem:[%s721_s2 + $0x20] sm:$0xff]  ;;  %vm253_vm0 = vcmask 1043456   ;;  %v558_v3 = vld [vmem:[%s721_s2 + $0x10] sm:$0xf]  ;;  %v580_v4 = vld [vmem:[%s721_s2 + $0x14] sm:$0xf0] }
   0xc   : > { %v237_v1 = vunpack.c.l.b16 %v217_v0  ;;  %v238_v2 = vunpack.c.h.b16 %v217_v0  ;;  %v579_v7 = vld [vmem:[%s721_s2 + $0x14] sm:$0xf]  ;;  %v560_v8 = vld [vmem:[%s721_s2 + $0x18] sm:$0xf0]  ;;  %s725_s16 = smov (!%p198_p3, %s540_s16), 1  ;;  %v559_v11 = vor.u32 %v580_v4, %v558_v3  ;;  %vm249_vm1 = vcmask 326656  }
   0xd   : > { %v563_v12 = vor.u32 %v579_v7, %v560_v8  ;;  %v550_v13 = vld [vmem:[%s721_s2] sm:$0xf]  ;;  %v578_v14 = vld [vmem:[%s721_s2 + $0x4] sm:$0xf0]  ;;  %v577_v15 = vld [vmem:[%s721_s2 + $0x4] sm:$0xf] }
   0xe   : > { %v243_v5 = vpack.c.b16 %v237_v1, %v237_v1  ;;  %v244_v6 = vpack.c.b16 %v238_v2, %v238_v2  ;;  %v552_v16 = vld [vmem:[%s721_s2 + $0x8] sm:$0xf0]  ;;  %s679_s9 = sshll.u32 %s725_s16, 3  ;;  %v551_v17 = vor.u32 %v578_v14, %v550_v13  ;;  %v218_v21 = vld [vmem:[%s722_s3] sm:$0x3]  ;;  %vm286_vm2 = vcmask 261120  }
   0xf   : > { %s201_s12 = scalar_lea.vmem %s719_s0, %s679_s9  ;;  %v555_v18 = vor.u32 %v577_v15, %v552_v16  ;;  %v220_v22 = vperm.slane %v218_v21, 0  ;;  %v221_v23 = vperm.slane %v218_v21, 1  ;;  %s616_s16 = smov 64   ;;  %vm314_vm3 = vcmask 64512  }
  0x10   : > { %v255_v9 = vsel %vm253_vm0, %v243_v5, 0  ;;  %v258_v10 = vsel %vm253_vm0, %v244_v6, 0  ;;  %v211_v19 = vld [vmem:[%s201_s12] sm:$0xff]  ;;  %s205_s21 = scalar_lea.vmem %s720_s1, %s679_s9  ;;  %s209_s24 = scalar_lea.vmem %s723_s4, %s679_s9 }
  0x11   : > { %265 = vmatpush.bf16.msra.mxu0 %v255_v9  ;;  %278 = vmatpush.bf16.msra.mxu1 %v258_v10  ;;  %v212_v20 = vpack.c.bf16 %v211_v19, %v211_v19  ;;  %v450_v4 = vld [vmem:[%s205_s21] sm:$0xff] }
  0x15   : > { %266 = vmatpush.bf16.msra.mxu0 %v559_v11  ;;  %279 = vmatpush.bf16.msra.mxu1 %v563_v12 }
  0x19   : > { %267 = vmatpush.bf16.msra.mxu0 %v551_v17  ;;  %280 = vmatpush.bf16.msra.mxu1 %v555_v18 }
  0x1c   : > { %564 = vmatmul.msk.bf16.vlgmr.msra.gmra.mxu0 %vm249_vm1, %v212_v20  ;;  %565 = vmatmul.msk.bf16.vlgmr.msra.gmra.mxu1 %vm249_vm1, %v212_v20 }
  0x99   : > { %v269_v24 = vpop.f32.mrf.mxu0  ;;  %v282_v25 = vpop.f32.mrf.mxu1 }
  0x9a   : > { %v270_v26 = vadd.f32 %v269_v24, %v220_v22  ;;  %v283_v27 = vadd.f32 %v282_v25, %v221_v23 }
  0x9c   : > { %369 = vrot.lane.b32.xlu1 %v283_v27, %s616_s16  ;;  %328 = vrot.lane.b32.xlu0 %v283_v27, %s617_s17 }
  0x9d   : > { %566 = vmatpush.xpose.msk.msra.mxu2 %vm286_vm2, %v283_v27  ;;  %367 = vrot.lane.b32.xlu2 %v270_v26, %s616_s16 }
  0xa0   : > { %567 = vmatmul.msk.f32.vlgmr.msra.gmra.mxu2 %vm286_vm2, %v270_v26 }
  0xa1   : > { %v271_v28 = vpop.f32.mrf.mxu0  ;;  %v284_v29 = vpop.f32.mrf.mxu1 }
  0xa4   : > { %410 = vrot.lane.b32.xlu1 %v283_v27, %s618_s18  ;;  %326 = vrot.lane.b32.xlu0 %v270_v26, %s617_s17 }
  0xa5   : > { %408 = vrot.lane.b32.xlu2 %v270_v26, %s618_s18 }
  0xf7   : > { %v368_v32 = vpop.permute.xlu2 %367 }
  0xff   : > { %v409_v35 = vpop.permute.xlu2 %408 }
 0x10e   : > { %v370_v30 = vpop.permute.xlu1 %369  ;;  %v329_v31 = vpop.permute.xlu0 %328 }
 0x10f   : > { %568 = vmatpush.xpose.msk.msra.mxu3 %vm286_vm2, %v329_v31  ;;  %570 = vmatpush.xpose.msk.msrb.mxu2 %vm286_vm2, %v370_v30 }
 0x112   : > { %571 = vmatmul.msk.f32.vlgmr.msrb.gmra.mxu2 %vm286_vm2, %v368_v32 }
 0x113   : > { %469 = vmatpush.msra.mxu2 %v450_v4 }
 0x116   : > { %v411_v33 = vpop.permute.xlu1 %410  ;;  %v327_v34 = vpop.permute.xlu0 %326 }
 0x117   : > { %569 = vmatmul.msk.f32.vlgmr.msra.gmra.mxu3 %vm286_vm2, %v327_v34 }
 0x118   : > { %572 = vmatpush.xpose.msk.msrb.mxu3 %vm286_vm2, %v411_v33 }
 0x11f   : > { %573 = vmatmul.msk.f32.vlgmr.msrb.gmra.mxu3 %vm286_vm2, %v409_v35 }
 0x123   : > { %v310_v36 = vpop.f32.mrf.mxu2 }
 0x124   : > { %v313_v37 = vmul.f32 0.17677669, %v310_v36 }
 0x126   : > { %v315_v38 = vsel %vm314_vm3, %v313_v37, -inf }
 0x127   : > { %316 = vmax.xlane.f32.xlu0 %v315_v38 }
 0x195   : > { %v392_v39 = vpop.f32.mrf.mxu2 }
 0x196   : > { %v395_v40 = vmul.f32 0.17677669, %v392_v39 }
 0x198   : > { %v396_v41 = vsel %vm314_vm3, %v395_v40, -inf }
 0x199   : > { %397 = vmax.xlane.f32.xlu2 %v396_v41 }
 0x19a   : > { %v317_v42 = vpop.xlane.xlu0 %316  ;;  %v351_v43 = vpop.f32.mrf.mxu3 }
 0x19b   : > { %v318_v44 = vsub.f32 %v313_v37, %v317_v42  ;;  %v354_v45 = vmul.f32 0.17677669, %v351_v43 }
 0x19d   : > { %v319_v46 = vmul.f32 1.442695, %v318_v44  ;;  %v355_v47 = vsel %vm314_vm3, %v354_v45, -inf }
 0x19e   : > { %356 = vmax.xlane.f32.xlu1 %v355_v47 }
 0x19f   : > { %592 = vpow2.f32 %v319_v46 }
 0x1a2   : > { %v433_v48 = vpop.f32.mrf.mxu3 }
 0x1a3   : > { %v436_v49 = vmul.f32 0.17677669, %v433_v48 }
 0x1a5   : > { %v593_v50 = vpop.eup %592  ;;  %v437_v51 = vsel %vm314_vm3, %v436_v49, -inf }
 0x1a6   : > { %438 = vmax.xlane.f32.xlu2 %v437_v51  ;;  %v321_v52 = vsel %vm314_vm3, %v593_v50, 0.0 }
 0x1a7   : > { %322 = vadd.xlane.f32.xlu0 %v321_v52 }
 0x20c   : > { %v398_v53 = vpop.xlane.xlu2 %397 }
 0x20d   : > { %v399_v54 = vsub.f32 %v395_v40, %v398_v53 }
 0x20f   : > { %v400_v55 = vmul.f32 1.442695, %v399_v54 }
 0x211   : > { %594 = vpow2.f32 %v400_v55  ;;  %v357_v56 = vpop.xlane.xlu1 %356 }
 0x212   : > { %v358_v57 = vsub.f32 %v354_v45, %v357_v56 }
 0x214   : > { %v359_v58 = vmul.f32 1.442695, %v358_v57 }
 0x216   : > { %596 = vpow2.f32 %v359_v58 }
 0x217   : > { %v595_v59 = vpop.eup %594 }
 0x218   : > { %v402_v60 = vsel %vm314_vm3, %v595_v59, 0.0 }
 0x219   : > { %403 = vadd.xlane.f32.xlu2 %v402_v60  ;;  %v439_v61 = vpop.xlane.xlu2 %438 }
 0x21a   : > { %v440_v62 = vsub.f32 %v436_v49, %v439_v61  ;;  %v323_v5 = vpop.xlane.xlu0 %322 }
 0x21c   : > { %v597_v63 = vpop.eup %596  ;;  %v441_v0 = vmul.f32 1.442695, %v440_v62 }
 0x21d   : > { %v361_v1 = vsel %vm314_vm3, %v597_v63, 0.0 }
 0x21e   : > { %598 = vpow2.f32 %v441_v0  ;;  %362 = vadd.xlane.f32.xlu1 %v361_v1 }
 0x21f   : > { %600 = vrcp.f32 %v323_v5 }
 0x224   : > { %v599_v2 = vpop.eup %598 }
 0x225   : > { %v443_v3 = vsel %vm314_vm3, %v599_v2, 0.0  ;;  %v601_v8 = vpop.eup %600 }
 0x226   : > { %444 = vadd.xlane.f32.xlu0 %v443_v3  ;;  %v325_v12 = vmul.f32 %v601_v8, %v593_v50 }
 0x28c   : > { %v404_v7 = vpop.xlane.xlu2 %403 }
 0x291   : > { %v363_v6 = vpop.xlane.xlu1 %362 }
 0x292   : > { %602 = vrcp.f32 %v363_v6 }
 0x293   : > { %604 = vrcp.f32 %v404_v7 }
 0x298   : > { %v603_v9 = vpop.eup %602 }
 0x299   : > { %v365_v10 = vmul.f32 %v603_v9, %v597_v63  ;;  %v445_v11 = vpop.xlane.xlu0 %444  ;;  %v605_v13 = vpop.eup %604 }
 0x29a   : > { %606 = vrcp.f32 %v445_v11  ;;  %v406_v15 = vmul.f32 %v605_v13, %v595_v59 }
 0x29b   : > { %v366_v14 = vadd.f32 %v365_v10, %v325_v12 }
 0x29d   : > { %v407_v17 = vadd.f32 %v406_v15, %v366_v14 }
 0x2a0   : > { %v607_v16 = vpop.eup %606 }
 0x2a1   : > { %v447_v18 = vmul.f32 %v607_v16, %v599_v2 }
 0x2a3   : > { %v448_v19 = vadd.f32 %v447_v18, %v407_v17 }
 0x2a5   : > { %v449_v20 = vmul.f32 0.25, %v448_v19 }
 0x2a7   : > { %574 = vmatmul.msk.f32.vlgmr.msra.gmra.mxu2 %vm314_vm3, %v449_v20 }
 0x32a   : > { %v471_v21 = vpop.f32.mrf.mxu2 }
 0x32b   : > { %474 = vst.msk [vmem:[%s209_s24] sm:$0xff] %vm249_vm1, %v471_v21 }
 0x32c PF: > { %s14_s15 = sadd.s32 1, %s614_s15  }
 0x32d   : > { %p11_p4 = scmp.ge.s32.totalorder %s14_s15, 4  }
 0x32f   :  { %13 = sbr.rel (!%p11_p4) target bundleno = 1 (0x1), region = 69 }

// kernel: encoder_forward.4
= control target key start
LH: loop header
LB: loop body
LE: loop exit
PB: predicated region body
PF: predicated region fallthrough
CT: control target
= control target key end

     0   :  { %s7006_s0 = inlined_call_operand.vmem [shape: f32[128,4], index: 0, kind: input, shape index: {}]   ;;  %s7007_s1 = inlined_call_operand.vmem [shape: bf16[4,128], index: 1, kind: input, shape index: {}]   ;;  %s7008_s2 = inlined_call_operand.vmem [shape: f32[1,128], index: 2, kind: input, shape index: {}]   ;;  %s7009_s3 = inlined_call_operand.vmem [shape: f32[8,128], index: 3, kind: input, shape index: {}]   ;;  %s7010_s4 = inlined_call_operand.vmem [shape: bf16[128,384], index: 4, kind: input, shape index: {}]   ;;  %s7011_s5 = inlined_call_operand.vmem [shape: f32[1,384], index: 5, kind: input, shape index: {}]   ;;  %s7012_s6 = inlined_call_operand.vmem [shape: bf16[128,128], index: 6, kind: input, shape index: {}]   ;;  %s7013_s7 = inlined_call_operand.vmem [shape: f32[1,128], index: 7, kind: input, shape index: {}]   ;;  %s7014_s8 = inlined_call_operand.vmem [shape: f32[1,128], index: 8, kind: input, shape index: {}]   ;;  %s7015_s9 = inlined_call_operand.vmem [shape: f32[1,128], index: 9, kind: input, shape index: {}]   ;;  %s7016_s10 = inlined_call_operand.vmem [shape: bf16[128,512], index: 10, kind: input, shape index: {}]   ;;  %s7017_s11 = inlined_call_operand.vmem [shape: f32[1,512], index: 11, kind: input, shape index: {}]   ;;  %s7018_s12 = inlined_call_operand.vmem [shape: bf16[512,128], index: 12, kind: input, shape index: {}]   ;;  %s7019_s13 = inlined_call_operand.vmem [shape: f32[1,128], index: 13, kind: input, shape index: {}]   ;;  %s7020_s14 = inlined_call_operand.vmem [shape: f32[1,128], index: 14, kind: input, shape index: {}]   ;;  %s7021_s15 = inlined_call_operand.vmem [shape: f32[1,128], index: 15, kind: input, shape index: {}]   ;;  %s7022_s16 = inlined_call_operand.hbm [shape: f32[128,128], index: 16, kind: output, shape index: {}]  }
   0x1   :  { %7029 = sst [smem:[#allocation11_spill]] %s7006_s0 }
   0x2   :  { %7030 = sst [smem:[#allocation12_spill]] %s7007_s1 }
   0x3   :  { %7031 = sst [smem:[#allocation13_spill]] %s7008_s2 }
   0x4   :  { %21 = vsyncpa [#allocation3], 0 }
   0x5   :  { %23 = vsyncpa [#allocation3 + $0x1], 0  ;;  %s5319_s21 = smov 0   ;;  %s5321_s22 = smov 0  }
   0x6   :  { %s5323_s23 = smov 0   ;;  %s5325_s24 = smov 0  }
   0x7 LB: > { %7032 = sst [smem:[#allocation5_spill]] %s5214_s21  ;;  %s5340_s25 = sadd.s32 4294967295, %s5226_s24   ;;  %s5226_s24 = sphi %s5325_s24, %s7050_s24   ;;  %s5222_s23 = sphi %s5323_s23, %s7052_s23   ;;  %s5218_s22 = sphi %s5321_s22, %s7054_s22   ;;  %s5214_s21 = sphi %s5319_s21, %s7053_s21  }
   0x8   : > { %7033 = sst [smem:[#allocation6_spill]] %s5222_s23  ;;  %s4271_s26 = sadd.s32 4294967294, %s5226_s24  }
   0x9   : > { %s5344_s27 = sadd.s32 1, %s5226_s24   ;;  %s377_s28 = sadd.s32 1, %s5222_s23 }
   0xa   : > { %7034 = sst [smem:[#allocation7_spill]] %s5344_s27  ;;  %s374_s29 = ssub.s32 %s5226_s24, %s5344_s27 }
   0xb   : > { %p387_p0 = scmp.ne.s32.totalorder %s5222_s23, %s5218_s22  ;;  %p375_p1 = scmp.eq.s32.totalorder %s374_s29, 0 }
   0xc   : > { %p388_p2 = scmp.eq.s32.totalorder %s5340_s25, 1  ;;  %p393_p3 = scmp.ne.s32.totalorder %s5218_s22, %s5214_s21 }
   0xd   : > { %p394_p4 = scmp.eq.s32.totalorder %s4271_s26, 1  ;;  %p4274_p7 = scmp.ge.s32.totalorder %s5226_s24, 1 }
   0xe   : > { %s5355_s30 = scalar_select %p375_p1, %s5222_s23, %s377_s28  }
   0xf   : > { %p5357_p5 = por %p388_p2, %p387_p0  ;;  %p5361_p6 = por %p394_p4, %p393_p3 }
  0x10   : > { %7035 = sst [smem:[#allocation8_spill]] %s5355_s30  ;;  %p466_p8 = scmp.lt.s32.totalorder %s5226_s24, 3 }
  0x11   : > { %s7037_s17 = scalar_select %p5361_p6, 1, 0 }
  0x12   : > { %p467_p9 = pnand %p4274_p7, %p466_p8 }
  0x13   : > { %7038 = sst [smem:[#allocation9_spill]] %s7037_s17 }
  0x14   : > { %470 = sbr.rel (%p467_p9) target bundleno = 3470 (0xd8e), region = 84 }
  0x19   : > { %s7039_s1 = sld [smem:[#allocation12_spill]]  ;;  %vm554_vm0 = vcmask 1041408   ;;  %s4276_s20 = sshll.u32 %s5340_s25, 3  ;;  %vm541_vm1 = vcmask 31744   ;;  %v4368_v8 = vld [vmem:[%s7010_s4 + $0xa8] sm:$0xf] }
  0x1a   : > { %p517_p10 = scmp.lt.s32.totalorder %s4276_s20, 15  ;;  %s7040_s30 = sld [smem:[#allocation11_spill]]  ;;  %v4757_v9 = vld [vmem:[%s7010_s4 + $0xb0] sm:$0xf0]  ;;  %v4376_v10 = vld [vmem:[%s7010_s4 + $0xb0] sm:$0xf] }
  0x1b   : > { %v4369_v11 = vor.u32 %v4757_v9, %v4368_v8  ;;  %v4758_v12 = vld [vmem:[%s7010_s4 + $0xb8] sm:$0xf0]  ;;  %v4356_v13 = vld [vmem:[%s7010_s4 + $0x90] sm:$0xf]  ;;  %v4364_v16 = vld [vmem:[%s7010_s4 + $0x98] sm:$0xf] }
  0x1c   : > { %s7056_s20 = smov (!%p517_p10, %s4276_s20), 15  ;;  %v4754_v14 = vld [vmem:[%s7010_s4 + $0x98] sm:$0xf0]  ;;  %v4377_v15 = vor.u32 %v4758_v12, %v4376_v10  ;;  %v4755_v17 = vld [vmem:[%s7010_s4 + $0xa0] sm:$0xf0]  ;;  %s7041_s2 = sld [smem:[#allocation13_spill]] }
  0x1d   : > { %s4277_s26 = sshll.u32 %s7056_s20, 3  ;;  %768 = vmatpush.bf16.msra.mxu1 %v4369_v11  ;;  %v4357_v18 = vor.u32 %v4754_v14, %v4356_v13  ;;  %4832 = vmatpush.bf16.msra.mxu2 %v4369_v11  ;;  %v4365_v19 = vor.u32 %v4755_v17, %v4364_v16  ;;  %v4344_v20 = vld [vmem:[%s7010_s4 + $0x78] sm:$0xf]  ;;  %v4751_v21 = vld [vmem:[%s7010_s4 + $0x80] sm:$0xf0]  ;;  %s5228_s17 = smov 96  }
  0x1e   : > { %826 = vmatpush.bf16.msra.mxu3 %v4377_v15  ;;  %v4352_v22 = vld [vmem:[%s7010_s4 + $0x80] sm:$0xf]  ;;  %v4752_v23 = vld [vmem:[%s7010_s4 + $0x88] sm:$0xf0]  ;;  %v4345_v24 = vor.u32 %v4751_v21, %v4344_v20  ;;  %v4340_v30 = vld [vmem:[%s7010_s4 + $0x68] sm:$0xf] }
  0x1f   : > { %v536_v0 = vld [vmem:[%s7039_s1] sm:$0x3]  ;;  %v4353_v26 = vor.u32 %v4752_v23, %v4352_v22  ;;  %v4748_v28 = vld [vmem:[%s7010_s4 + $0x68] sm:$0xf0]  ;;  %v4749_v31 = vld [vmem:[%s7010_s4 + $0x70] sm:$0xf0] }
  0x20   : > { %v556_v1 = vsel %vm554_vm0, %v536_v0, 0  ;;  %s5374_s23 = scalar_lea.vmem %s7040_s30, %s4277_s26  ;;  %v4332_v27 = vld [vmem:[%s7010_s4 + $0x60] sm:$0xf]  ;;  %v4341_v34 = vor.u32 %v4749_v31, %v4340_v30  ;;  %v4320_v38 = vld [vmem:[%s7010_s4 + $0x48] sm:$0xf]  ;;  %vm871_vm2 = vcmask 261120  }
  0x21   : > { %565 = vmatpush.bf16.msra.mxu0 %v556_v1  ;;  %v524_v2 = vld [vmem:[%s5374_s23] sm:$0xff]  ;;  %v525_v3 = vld [vmem:[%s5374_s23 + $0x8] sm:$0xff]  ;;  %v526_v5 = vld [vmem:[%s5374_s23 + $0x10] sm:$0xff]  ;;  %769 = vmatpush.bf16.msra.mxu1 %v4357_v18  ;;  %v4333_v32 = vor.u32 %v4748_v28, %v4332_v27  ;;  %vm1032_vm3 = vcmask 64512   ;;  %s5229_s28 = smov 64   ;;  %s5230_s29 = smov 32  }
  0x22   : > { %v532_v4 = vpack.c.bf16 %v525_v3, %v524_v2  ;;  %v527_v6 = vld [vmem:[%s5374_s23 + $0x18] sm:$0xff]  ;;  %4833 = vmatpush.bf16.msra.mxu2 %v4357_v18  ;;  %v528_v25 = vld [vmem:[%s5374_s23 + $0x20] sm:$0xff]  ;;  %827 = vmatpush.bf16.msra.mxu3 %v4365_v19  ;;  %v529_v29 = vld [vmem:[%s5374_s23 + $0x28] sm:$0xff]  ;;  %vm2929_vm4 = vcmask 523264   ;;  %vm2938_vm5 = vcmask 785408   ;;  %s513_s26 = sand.u32 1, %s5218_s22  }
  0x23   : > { %v533_v7 = vpack.c.bf16 %v527_v6, %v526_v5  ;;  %v534_v33 = vpack.c.bf16 %v529_v29, %v528_v25  ;;  %v530_v35 = vld [vmem:[%s5374_s23 + $0x30] sm:$0xff]  ;;  %v531_v36 = vld [vmem:[%s5374_s23 + $0x38] sm:$0xff]  ;;  %v4743_v48 = vld [vmem:[%s7010_s4 + $0x40] sm:$0xf0]  ;;  %s4275_s23 = sshll.u32 %s513_s26, 6  ;;  %s4194_s1 = scalar_lea.sflag [#allocation3], %s513_s26 }
  0x24   : > { %4278 = vmatmul.msk.bf16.vlgmr.msra.gmra.mxu0 %vm541_vm1, %v532_v4  ;;  %v535_v37 = vpack.c.bf16 %v531_v36, %v530_v35  ;;  %v4745_v39 = vld [vmem:[%s7010_s4 + $0x50] sm:$0xf0]  ;;  %v4328_v40 = vld [vmem:[%s7010_s4 + $0x50] sm:$0xf]  ;;  %v4746_v42 = vld [vmem:[%s7010_s4 + $0x58] sm:$0xf0] }
  0x25   : > { %770 = vmatpush.bf16.msra.mxu1 %v4345_v24  ;;  %v4321_v41 = vor.u32 %v4745_v39, %v4320_v38  ;;  %v4329_v43 = vor.u32 %v4746_v42, %v4328_v40  ;;  %v4308_v44 = vld [vmem:[%s7010_s4 + $0x30] sm:$0xf]  ;;  %v4742_v45 = vld [vmem:[%s7010_s4 + $0x38] sm:$0xf0]  ;;  %v4316_v47 = vld [vmem:[%s7010_s4 + $0x38] sm:$0xf] }
  0x26   : > { %4834 = vmatpush.bf16.msra.mxu2 %v4345_v24  ;;  %828 = vmatpush.bf16.msra.mxu3 %v4353_v26  ;;  %v4309_v46 = vor.u32 %v4742_v45, %v4308_v44  ;;  %v4317_v49 = vor.u32 %v4743_v48, %v4316_v47  ;;  %v4296_v50 = vld [vmem:[%s7010_s4 + $0x18] sm:$0xf]  ;;  %v4739_v51 = vld [vmem:[%s7010_s4 + $0x20] sm:$0xf0]  ;;  %v4304_v52 = vld [vmem:[%s7010_s4 + $0x20] sm:$0xf] }
  0x27   : > { %v4297_v53 = vor.u32 %v4739_v51, %v4296_v50  ;;  %v4740_v54 = vld [vmem:[%s7010_s4 + $0x28] sm:$0xf0]  ;;  %v4284_v56 = vld [vmem:[%s7010_s4] sm:$0xf]  ;;  %v4292_v58 = vld [vmem:[%s7010_s4 + $0x8] sm:$0xf] }
  0x28   : > { %v4305_v55 = vor.u32 %v4740_v54, %v4304_v52  ;;  %v4736_v57 = vld [vmem:[%s7010_s4 + $0x8] sm:$0xf0]  ;;  %v4737_v60 = vld [vmem:[%s7010_s4 + $0x10] sm:$0xf0]  ;;  %v5487_v63 = vld [vmem:[%s7041_s2] ss:$0 sm:$0xff] }
  0x29   : > { %771 = vmatpush.bf16.msra.mxu1 %v4333_v32  ;;  %v4285_v59 = vor.u32 %v4736_v57, %v4284_v56  ;;  %v4293_v61 = vor.u32 %v4737_v60, %v4292_v58  ;;  %v5493_v1 = vld [vmem:[%s7009_s3] sm:$0xff]  ;;  %v4370_v8 = vld [vmem:[%s7010_s4 + $0xb4] sm:$0xf0]  ;;  %v4753_v11 = vld [vmem:[%s7010_s4 + $0x94] sm:$0xf]  ;;  %s6935_s21 = scalar_lea.vmem [#allocation2], %s4275_s23 }
  0x2a   : > { %4835 = vmatpush.bf16.msra.mxu2 %v4333_v32  ;;  %829 = vmatpush.bf16.msra.mxu3 %v4341_v34  ;;  %v4358_v12 = vld [vmem:[%s7010_s4 + $0x9c] sm:$0xf0]  ;;  %v4750_v14 = vld [vmem:[%s7010_s4 + $0x7c] sm:$0xf]  ;;  %v4346_v15 = vld [vmem:[%s7010_s4 + $0x84] sm:$0xf0] }
  0x2b   : > { %v4361_v13 = vor.u32 %v4753_v11, %v4358_v12  ;;  %v4349_v16 = vor.u32 %v4750_v14, %v4346_v15  ;;  %v4747_v20 = vld [vmem:[%s7010_s4 + $0x64] sm:$0xf]  ;;  %v4334_v21 = vld [vmem:[%s7010_s4 + $0x6c] sm:$0xf0]  ;;  %v4744_v26 = vld [vmem:[%s7010_s4 + $0x4c] sm:$0xf] }
  0x2c   : > { %v4337_v22 = vor.u32 %v4747_v20, %v4334_v21  ;;  %v4322_v27 = vld [vmem:[%s7010_s4 + $0x54] sm:$0xf0]  ;;  %v4741_v29 = vld [vmem:[%s7010_s4 + $0x34] sm:$0xf]  ;;  %v4310_v30 = vld [vmem:[%s7010_s4 + $0x3c] sm:$0xf0] }
  0x2d   : > { %772 = vmatpush.bf16.msra.mxu1 %v4321_v41  ;;  %v4325_v28 = vor.u32 %v4744_v26, %v4322_v27  ;;  %v4313_v32 = vor.u32 %v4741_v29, %v4310_v30  ;;  %v4298_v34 = vld [vmem:[%s7010_s4 + $0x24] sm:$0xf0]  ;;  %v4735_v36 = vld [vmem:[%s7010_s4 + $0x4] sm:$0xf]  ;;  %s4206_s20 = sshll.u32 %s6935_s21, 4  ;;  %s4207_s20 = int_to_ptr.vmem [resolvable:$true] %s4206_s20 }
  0x2e   : > { %4836 = vmatpush.bf16.msra.mxu2 %v4321_v41  ;;  %830 = vmatpush.bf16.msra.mxu3 %v4329_v43 }
  0x31   : > { %773 = vmatpush.bf16.msra.mxu1 %v4309_v46 }
  0x32   : > { %4837 = vmatpush.bf16.msra.mxu2 %v4309_v46  ;;  %831 = vmatpush.bf16.msra.mxu3 %v4317_v49 }
  0x34   : > { %4279 = vmatmul.msk.bf16.gmra.mxu0 %vm541_vm1, %v533_v7  ;;  %v4756_v7 = vld [vmem:[%s7010_s4 + $0xac] sm:$0xf] }
  0x35   : > { %774 = vmatpush.bf16.msra.mxu1 %v4297_v53  ;;  %v4373_v9 = vor.u32 %v4756_v7, %v4370_v8 }
  0x36   : > { %4838 = vmatpush.bf16.msra.mxu2 %v4297_v53  ;;  %832 = vmatpush.bf16.msra.mxu3 %v4305_v55  ;;  %v632_v53 = vld [vmem:[%s7011_s5] sm:$0x7] }
  0x37   : > { %v5585_v54 = vperm.slane %v632_v53, 0 }
  0x39   : > { %775 = vmatpush.bf16.msra.mxu1 %v4285_v59 }
  0x3a   : > { %4839 = vmatpush.bf16.msra.mxu2 %v4285_v59  ;;  %833 = vmatpush.bf16.msra.mxu3 %v4293_v61 }
  0x3e   : > { %797 = vmatpush.bf16.msrb.mxu2 %v4373_v9 }
  0x42   : > { %798 = vmatpush.bf16.msrb.mxu2 %v4361_v13 }
  0x44   : > { %4280 = vmatmul.msk.bf16.gmra.mxu0 %vm541_vm1, %v534_v33  ;;  %v4738_v33 = vld [vmem:[%s7010_s4 + $0x1c] sm:$0xf] }
  0x45   : > { %v4301_v35 = vor.u32 %v4738_v33, %v4298_v34 }
  0x46   : > { %799 = vmatpush.bf16.msrb.mxu2 %v4349_v16 }
  0x4a   : > { %800 = vmatpush.bf16.msrb.mxu2 %v4337_v22 }
  0x4e   : > { %801 = vmatpush.bf16.msrb.mxu2 %v4325_v28 }
  0x52   : > { %802 = vmatpush.bf16.msrb.mxu2 %v4313_v32 }
  0x54   : > { %4281 = vmatmul.msk.bf16.gmra.mxu0 %vm541_vm1, %v535_v37  ;;  %v4286_v37 = vld [vmem:[%s7010_s4 + $0xc] sm:$0xf0] }
  0x55   : > { %v4289_v40 = vor.u32 %v4735_v36, %v4286_v37 }
  0x56   : > { %803 = vmatpush.bf16.msrb.mxu2 %v4301_v35  ;;  %v5634_v35 = vperm.slane %v632_v53, 2 }
  0x5a   : > { %804 = vmatpush.bf16.msrb.mxu2 %v4289_v40 }
  0xa1   : > { %v567_v62 = vpop.f32.mrf.mxu0 }
  0xa2   : > { %v568_v0 = vadd.f32 %v5487_v63, %v567_v62 }
  0xa4   : > { %v5497_v4 = vadd.f32 %v5493_v1, %v568_v0 }
  0xa9   : > { %v569_v2 = vpop.f32.mrf.mxu0 }
  0xaa   : > { %v570_v3 = vadd.f32 %v5487_v63, %v569_v2 }
  0xac   : > { %v5500_v5 = vadd.f32 %v5493_v1, %v570_v3 }
  0xae   : > { %v596_v6 = vpack.c.bf16 %v5500_v5, %v5497_v4 }
  0xb0   : > { %776 = vmatmul.bf16.vlgmr.msra.gmra.mxu1 %v596_v6  ;;  %834 = vmatmul.bf16.vlgmr.msra.gmra.mxu3 %v596_v6 }
  0xb1   : > { %v572_v10 = vpop.f32.mrf.mxu0 }
  0xb2   : > { %v573_v17 = vadd.f32 %v5487_v63, %v572_v10 }
  0xb4   : > { %v5531_v23 = vadd.f32 %v5493_v1, %v573_v17 }
  0xb9   : > { %v574_v18 = vpop.f32.mrf.mxu0 }
  0xba   : > { %v575_v19 = vadd.f32 %v5487_v63, %v574_v18 }
  0xbc   : > { %v5534_v24 = vadd.f32 %v5493_v1, %v575_v19 }
  0xbe   : > { %v597_v25 = vpack.c.bf16 %v5534_v24, %v5531_v23 }
  0xc0   : > { %781 = vmatmul.bf16.gmra.mxu1 %v597_v25  ;;  %839 = vmatmul.bf16.gmra.mxu3 %v597_v25 }
  0xc1   : > { %v577_v31 = vpop.f32.mrf.mxu0 }
  0xc2   : > { %v578_v38 = vadd.f32 %v5487_v63, %v577_v31 }
  0xc4   : > { %v5565_v42 = vadd.f32 %v5493_v1, %v578_v38 }
  0xc9   : > { %v579_v39 = vpop.f32.mrf.mxu0 }
  0xca   : > { %v580_v41 = vadd.f32 %v5487_v63, %v579_v39 }
  0xcc   : > { %v5568_v43 = vadd.f32 %v5493_v1, %v580_v41 }
  0xce   : > { %v598_v44 = vpack.c.bf16 %v5568_v43, %v5565_v42 }
  0xd0   : > { %786 = vmatmul.bf16.vlgmr.msra.gmra.mxu2 %v598_v44  ;;  %844 = vmatmul.bf16.gmra.mxu3 %v598_v44 }
  0xd1   : > { %v582_v45 = vpop.f32.mrf.mxu0 }
  0xd2   : > { %v583_v46 = vadd.f32 %v5487_v63, %v582_v45 }
  0xd4   : > { %v5575_v49 = vadd.f32 %v5493_v1, %v583_v46 }
  0xd9   : > { %v584_v47 = vpop.f32.mrf.mxu0 }
  0xda   : > { %v585_v48 = vadd.f32 %v5487_v63, %v584_v47 }
  0xdc   : > { %v5578_v50 = vadd.f32 %v5493_v1, %v585_v48  ;;  %v5599_v1 = vperm.slane %v632_v53, 1 }
  0xde   : > { %7042 = vst [vmem:[#allocation10_spill] sm:$0xff] %v5578_v50  ;;  %v599_v51 = vpack.c.bf16 %v5578_v50, %v5575_v49 }
  0xe0   : > { %791 = vmatmul.bf16.gmra.mxu2 %v599_v51  ;;  %849 = vmatmul.bf16.gmra.mxu3 %v599_v51 }
  0xf0   : > { %805 = vmatmul.bf16.vlgmr.msrb.gmra.mxu2 %v596_v6 }
 0x100   : > { %810 = vmatmul.bf16.gmra.mxu2 %v597_v25 }
 0x110   : > { %815 = vmatmul.bf16.gmra.mxu2 %v598_v44 }
 0x120   : > { %820 = vmatmul.bf16.gmra.mxu2 %v599_v51 }
 0x12d   : > { %v777_v52 = vpop.f32.mrf.mxu1 }
 0x12e   : > { %v778_v8 = vadd.f32 %v777_v52, %v5585_v54 }
 0x130   : > { %v5608_v12 = vpack.c.bf16 %v778_v8, %v778_v8 }
 0x133   : > { %v835_v9 = vpop.f32.mrf.mxu3 }
 0x134   : > { %v5640_v39 = vadd.f32 %v835_v9, %v5634_v35 }
 0x135   : > { %v779_v55 = vpop.f32.mrf.mxu1 }
 0x136   : > { %v780_v56 = vadd.f32 %v779_v55, %v5585_v54 }
 0x138   : > { %v856_v57 = vpack.c.bf16 %v780_v56, %v780_v56 }
 0x13a   : > { %v1335_v58 = vunpack.c.l.b16 %v856_v57 }
 0x13b   : > { %v837_v19 = vpop.f32.mrf.mxu3 }
 0x13c   : > { %v5588_v59 = vpack.c.b16 %v1335_v58, %v1335_v58  ;;  %v5658_v55 = vadd.f32 %v837_v19, %v5634_v35 }
 0x13d   : > { %v782_v21 = vpop.f32.mrf.mxu1 }
 0x13e   : > { %1337 = vrot.lane.b32.xlu1 %v5588_v59, %s5228_s17  ;;  %v783_v26 = vadd.f32 %v782_v21, %v5585_v54 }
 0x140   : > { %v5625_v30 = vpack.c.bf16 %v783_v26, %v783_v26 }
 0x143   : > { %v840_v32 = vpop.f32.mrf.mxu3 }
 0x144   : > { %v5655_v53 = vadd.f32 %v840_v32, %v5634_v35 }
 0x145   : > { %v784_v38 = vpop.f32.mrf.mxu1 }
 0x146   : > { %v785_v44 = vadd.f32 %v784_v38, %v5585_v54 }
 0x148   : > { %v5648_v48 = vpack.c.bf16 %v785_v44, %v785_v44 }
 0x14b   : > { %v842_v41 = vpop.f32.mrf.mxu3 }
 0x153   : > { %v787_v60 = vpop.f32.mrf.mxu2 }
 0x154   : > { %v788_v45 = vadd.f32 %v787_v60, %v5585_v54 }
 0x156   : > { %v5650_v51 = vpack.c.bf16 %v788_v45, %v788_v45 }
 0x15b   : > { %v5592_v61 = vpop.f32.mrf.mxu2 }
 0x163   : > { %v5594_v62 = vpop.f32.mrf.mxu2 }
 0x164   : > { %v793_v8 = vadd.f32 %v5594_v62, %v5585_v54 }
 0x16b   : > { %v794_v63 = vpop.f32.mrf.mxu2 }
 0x16c   : > { %v5597_v0 = vadd.f32 %v794_v63, %v5585_v54 }
 0x173   : > { %v806_v2 = vpop.f32.mrf.mxu2 }
 0x174   : > { %v807_v3 = vadd.f32 %v806_v2, %v5599_v1 }
 0x176   : > { %v5602_v6 = vpack.c.bf16 %v807_v3, %v807_v3 }
 0x178   : > { %v876_v7 = vsel %vm871_vm2, %v5602_v6, 0 }
 0x179   : > { %885 = vmatpush.bf16.xpose.msrb.mxu0 %v876_v7  ;;  %v790_v7 = vadd.f32 %v5592_v61, %v5585_v54  ;;  %v5701_v61 = vpack.c.bf16 %v5597_v0, %v5597_v0 }
 0x17b   : > { %v808_v10 = vpop.f32.mrf.mxu2 }
 0x17c   : > { %v809_v11 = vadd.f32 %v808_v10, %v5599_v1 }
 0x17e   : > { %v864_v13 = vpack.c.bf16 %v809_v11, %v809_v11 }
 0x180   : > { %v895_v14 = vsel %vm871_vm2, %v864_v13, 0  ;;  %v1340_v15 = vunpack.c.l.b16 %v864_v13  ;;  %4378 = vmatmul.msk.bf16.vlgmr.msrb.gmra.mxu0 %vm871_vm2, %v5608_v12  ;;  %v860_v13 = vpack.c.bf16 %v790_v7, %v790_v7 }
 0x181   : > { %904 = vmatpush.bf16.xpose.msra.mxu0 %v895_v14  ;;  %v5682_v14 = vpack.c.bf16 %v793_v8, %v793_v8 }
 0x182   : > { %v5613_v16 = vpack.c.b16 %v1340_v15, %v1340_v15 }
 0x183   : > { %v811_v17 = vpop.f32.mrf.mxu2 }
 0x184   : > { %v812_v18 = vadd.f32 %v811_v17, %v5599_v1  ;;  %1342 = vrot.lane.b32.xlu2 %v5613_v16, %s5228_s17  ;;  %v5687_v17 = vadd.f32 %v842_v41, %v5634_v35 }
 0x186   : > { %v865_v20 = vpack.c.bf16 %v812_v18, %v812_v18 }
 0x188   : > { %v1369_v22 = vunpack.c.l.b16 %v865_v20  ;;  %v914_v25 = vsel %vm871_vm2, %v865_v20, 0 }
 0x189   : > { %923 = vmatpush.bf16.xpose.msrb.mxu3 %v914_v25 }
 0x18a   : > { %v5620_v27 = vpack.c.b16 %v1369_v22, %v1369_v22 }
 0x18b   : > { %v813_v28 = vpop.f32.mrf.mxu2 }
 0x18c   : > { %v814_v29 = vadd.f32 %v813_v28, %v5599_v1  ;;  %1371 = vrot.lane.b32.xlu2 %v5620_v27, %s5228_s17 }
 0x18e   : > { %v5627_v31 = vpack.c.bf16 %v814_v29, %v814_v29 }
 0x190   : > { %4379 = vmatmul.msk.bf16.vlgmr.msra.gmra.mxu0 %vm871_vm2, %v856_v57  ;;  %4380 = vmatmul.msk.bf16.vlgmr.msrb.gmra.mxu3 %vm871_vm2, %v5625_v30  ;;  %v933_v33 = vsel %vm871_vm2, %v5627_v31, 0  ;;  %v845_v57 = vpop.f32.mrf.mxu3 }
 0x191   : > { %942 = vmatpush.bf16.xpose.msrb.mxu0 %v933_v33  ;;  %v5672_v2 = vadd.f32 %v845_v57, %v5634_v35  ;;  %v1311_v57 = vunpack.c.l.b16 %v5602_v6 }
 0x193   : > { %v816_v34 = vpop.f32.mrf.mxu2  ;;  %v5730_v8 = vpack.c.b16 %v1311_v57, %v1311_v57 }
 0x194   : > { %v817_v36 = vadd.f32 %v816_v34, %v5599_v1 }
 0x196   : > { %v5637_v37 = vpack.c.bf16 %v817_v36, %v817_v36 }
 0x198   : > { %v952_v40 = vsel %vm871_vm2, %v5637_v37, 0  ;;  %v847_v11 = vpop.f32.mrf.mxu3  ;;  %v1427_v6 = vunpack.c.l.b16 %v5637_v37 }
 0x199   : > { %961 = vmatpush.bf16.xpose.msra.mxu3 %v952_v40  ;;  %v5690_v18 = vadd.f32 %v847_v11, %v5634_v35 }
 0x19b   : > { %v818_v46 = vpop.f32.mrf.mxu2 }
 0x19c   : > { %v819_v47 = vadd.f32 %v818_v46, %v5599_v1 }
 0x19e   : > { %v5652_v52 = vpack.c.bf16 %v819_v47, %v819_v47 }
 0x1a0   : > { %v971_v56 = vsel %vm871_vm2, %v5652_v52, 0  ;;  %4381 = vmatmul.msk.bf16.vlgmr.msrb.gmra.mxu0 %vm871_vm2, %v5648_v48  ;;  %4382 = vmatmul.msk.bf16.vlgmr.msra.gmra.mxu3 %vm871_vm2, %v5650_v51  ;;  %v5707_v22 = vpop.f32.mrf.mxu3 }
 0x1a1   : > { %1139 = vmatpush.msrb.mxu3 %v5640_v39  ;;  %980 = vmatpush.bf16.xpose.msra.mxu0 %v971_v56 }
 0x1a3   : > { %1185 = vmatpush.msra.mxu3 %v5655_v53  ;;  %v821_v58 = vpop.f32.mrf.mxu2 }
 0x1a4   : > { %v822_v60 = vadd.f32 %v821_v58, %v5599_v1 }
 0x1a6   : > { %v5669_v63 = vpack.c.bf16 %v822_v60, %v822_v60 }
 0x1a8   : > { %v990_v3 = vsel %vm871_vm2, %v5669_v63, 0  ;;  %v5709_v26 = vpop.f32.mrf.mxu3 }
 0x1a9   : > { %1162 = vmatpush.msrb.mxu0 %v5658_v55  ;;  %999 = vmatpush.bf16.xpose.msrb.mxu1 %v990_v3 }
 0x1ab   : > { %v823_v9 = vpop.f32.mrf.mxu2 }
 0x1ac   : > { %v824_v10 = vadd.f32 %v823_v9, %v5599_v1 }
 0x1ae   : > { %v5684_v15 = vpack.c.bf16 %v824_v10, %v824_v10  ;;  %v1364_v10 = vunpack.c.l.b16 %v5625_v30  ;;  %v1306_v30 = vunpack.c.l.b16 %v5608_v12 }
 0x1b0   : > { %v1009_v54 = vsel %vm871_vm2, %v5684_v15, 0  ;;  %4384 = vmatmul.msk.bf16.vlgmr.msrb.gmra.mxu1 %vm871_vm2, %v5682_v14  ;;  %4383 = vmatmul.msk.bf16.vlgmr.msra.gmra.mxu0 %vm871_vm2, %v860_v13  ;;  %v5756_v37 = vpack.c.b16 %v1306_v30, %v1306_v30 }
 0x1b1   : > { %1231 = vmatpush.msra.mxu1 %v5672_v2  ;;  %1208 = vmatpush.msra.mxu0 %v5687_v17 }
 0x1b2   : > { %1018 = vmatpush.bf16.xpose.msra.mxu2 %v1009_v54 }
 0x1b9   : > { %4385 = vmatmul.msk.bf16.vlgmr.msra.gmra.mxu2 %vm871_vm2, %v5701_v61 }
 0x1ba   : > { %1254 = vmatpush.msrb.mxu2 %v5690_v18 }
 0x1de   : > { %v1343_v62 = vpop.permute.xlu2 %1342 }
 0x1df   : > { %v1348_v1 = vsel %vm871_vm2, %v1343_v62, 0  ;;  %v5737_v62 = vpack.c.b16 %v1364_v10, %v1364_v10 }
 0x1e0   : > { %1357 = vmatpush.bf16.xpose.msra.mxu2 %v1348_v1  ;;  %v1451_v1 = vunpack.c.l.b16 %v860_v13 }
 0x1fd   : > { %v887_v19 = vpop.f32.mrf.mxu0 }
 0x1fe   : > { %v1024_v20 = vmul.f32 0.17677669, %v887_v19 }
 0x200   : > { %v1033_v21 = vsel %vm1032_vm3, %v1024_v20, -inf }
 0x201   : > { %1034 = vmax.xlane.f32.xlu0 %v1033_v21  ;;  %v5742_v21 = vpack.c.b16 %v1427_v6, %v1427_v6 }
 0x205   : > { %v889_v25 = vpop.f32.mrf.mxu0 }
 0x206   : > { %v5744_v25 = vpack.c.b16 %v1451_v1, %v1451_v1 }
 0x20d   : > { %v906_v0 = vpop.f32.mrf.mxu0 }
 0x20e   : > { %v5711_v28 = vmul.f32 0.17677669, %v906_v0  ;;  %v1456_v0 = vunpack.c.l.b16 %v5652_v52  ;;  %v1485_v52 = vunpack.c.l.b16 %v5669_v63 }
 0x210   : > { %v1036_v29 = vsel %vm1032_vm3, %v5711_v28, -inf  ;;  %v5761_v13 = vpack.c.b16 %v1485_v52, %v1485_v52 }
 0x211   : > { %1037 = vmax.xlane.f32.xlu2 %v1036_v29  ;;  %v5752_v29 = vpack.c.b16 %v1456_v0, %v1456_v0 }
 0x213   : > { %v925_v32 = vpop.f32.mrf.mxu3 }
 0x214   : > { %v5715_v33 = vmul.f32 0.17677669, %v925_v32 }
 0x215   : > { %v908_v34 = vpop.f32.mrf.mxu0 }
 0x216   : > { %v1039_v36 = vsel %vm1032_vm3, %v5715_v33, -inf }
 0x217   : > { %1040 = vmax.xlane.f32.xlu1 %v1039_v36 }
 0x21b   : > { %v927_v38 = vpop.f32.mrf.mxu3 }
 0x21d   : > { %v944_v40 = vpop.f32.mrf.mxu0 }
 0x21e   : > { %v5719_v41 = vmul.f32 0.17677669, %v944_v40 }
 0x220   : > { %v1042_v44 = vsel %vm1032_vm3, %v5719_v41, -inf }
 0x221   : > { %1043 = vmax.xlane.f32.xlu0 %v1042_v44  ;;  %v5769_v44 = vpop.permute.xlu2 %1371 }
 0x223   : > { %v963_v45 = vpop.f32.mrf.mxu3 }
 0x224   : > { %v5723_v46 = vmul.f32 0.17677669, %v963_v45 }
 0x225   : > { %v946_v47 = vpop.f32.mrf.mxu0 }
 0x226   : > { %v1045_v56 = vsel %vm1032_vm3, %v5723_v46, -inf }
 0x227   : > { %1046 = vmax.xlane.f32.xlu2 %v1045_v56 }
 0x22b   : > { %v965_v58 = vpop.f32.mrf.mxu3 }
 0x22d   : > { %v982_v60 = vpop.f32.mrf.mxu0  ;;  %v1001_v3 = vpop.f32.mrf.mxu1 }
 0x22e   : > { %v5728_v7 = vmul.f32 0.17677669, %v982_v60  ;;  %v5765_v12 = vmul.f32 0.17677669, %v1001_v3 }
 0x230   : > { %1313 = vrot.lane.b32.xlu1 %v5730_v8, %s5228_s17  ;;  %v1048_v9 = vsel %vm1032_vm3, %v5728_v7, -inf  ;;  %v1051_v40 = vsel %vm1032_vm3, %v5765_v12, -inf }
 0x231   : > { %1049 = vmax.xlane.f32.xlu0 %v1048_v9  ;;  %v5784_v9 = vpop.permute.xlu1 %1337 }
 0x235   : > { %v984_v11 = vpop.f32.mrf.mxu0  ;;  %v1003_v54 = vpop.f32.mrf.mxu1 }
 0x236   : > { %v1398_v11 = vunpack.c.l.b16 %v5627_v31 }
 0x238   : > { %1366 = vrot.lane.b32.xlu1 %v5737_v62, %s5228_s17  ;;  %v5788_v1 = vpack.c.b16 %v1398_v11, %v1398_v11  ;;  %v1480_v11 = vunpack.c.l.b16 %v5682_v14 }
 0x23c   : > { %v1020_v19 = vpop.f32.mrf.mxu2 }
 0x23d   : > { %v5771_v45 = vmul.f32 0.17677669, %v1020_v19 }
 0x23f   : > { %1429 = vrot.lane.b32.xlu2 %v5742_v21, %s5228_s17  ;;  %v1054_v56 = vsel %vm1032_vm3, %v5771_v45, -inf }
 0x240   : > { %1453 = vrot.lane.b32.xlu1 %v5744_v25, %s5228_s17 }
 0x244   : > { %v1022_v32 = vpop.f32.mrf.mxu2 }
 0x245   : > { %1458 = vrot.lane.b32.xlu0 %v5752_v29, %s5228_s17 }
 0x248   : > { %1308 = vrot.lane.b32.xlu1 %v5756_v37, %s5228_s17 }
 0x250   : > { %1487 = vrot.lane.b32.xlu1 %v5761_v13, %s5228_s17 }
 0x274   : > { %v1035_v34 = vpop.xlane.xlu0 %1034 }
 0x275   : > { %v1057_v36 = vsub.f32 %v1024_v20, %v1035_v34 }
 0x277   : > { %v1065_v38 = vmul.f32 1.442695, %v1057_v36 }
 0x279   : > { %5002 = vpow2.f32 %v1065_v38 }
 0x27a   : > { %1052 = vmax.xlane.f32.xlu1 %v1051_v40 }
 0x27f   : > { %v5773_v63 = vpop.eup %5002 }
 0x280   : > { %v1081_v47 = vsel %vm1032_vm3, %v5773_v63, 0.0 }
 0x281   : > { %1082 = vadd.xlane.f32.xlu2 %v1081_v47 }
 0x282   : > { %1055 = vmax.xlane.f32.xlu1 %v1054_v56 }
 0x284   : > { %v1038_v20 = vpop.xlane.xlu2 %1037 }
 0x285   : > { %v1058_v57 = vsub.f32 %v5711_v28, %v1038_v20  ;;  %v1509_v20 = vunpack.c.l.b16 %v5701_v61 }
 0x287   : > { %v1067_v58 = vmul.f32 1.442695, %v1058_v57 }
 0x289   : > { %5004 = vpow2.f32 %v1067_v58  ;;  %v5809_v58 = vpack.c.b16 %v1509_v20, %v1509_v20 }
 0x28a   : > { %v1041_v28 = vpop.xlane.xlu1 %1040 }
 0x28b   : > { %v1059_v57 = vsub.f32 %v5715_v33, %v1041_v28  ;;  %v1393_v28 = vunpack.c.l.b16 %v5648_v48 }
 0x28f   : > { %v5780_v60 = vpop.eup %5004 }
 0x290   : > { %v1084_v3 = vsel %vm1032_vm3, %v5780_v60, 0.0 }
 0x291   : > { %1085 = vadd.xlane.f32.xlu0 %v1084_v3  ;;  %v1069_v3 = vmul.f32 1.442695, %v1059_v57 }
 0x294   : > { %v1044_v10 = vpop.xlane.xlu0 %1043 }
 0x295   : > { %v1060_v54 = vsub.f32 %v5719_v41, %v1044_v10 }
 0x297   : > { %v1071_v6 = vmul.f32 1.442695, %v1060_v54 }
 0x299   : > { %5006 = vpow2.f32 %v1071_v6  ;;  %v5826_v6 = vpack.c.b16 %v1480_v11, %v1480_v11 }
 0x29a   : > { %v1047_v19 = vpop.xlane.xlu2 %1046 }
 0x29b   : > { %v1061_v0 = vsub.f32 %v5723_v46, %v1047_v19  ;;  %1400 = vrot.lane.b32.xlu1 %v5788_v1, %s5228_s17  ;;  %v5831_v19 = vpack.c.b16 %v1393_v28, %v1393_v28 }
 0x29d   : > { %v1073_v30 = vmul.f32 1.442695, %v1061_v0 }
 0x29f   : > { %v5793_v32 = vpop.eup %5006  ;;  %5008 = vpow2.f32 %v1073_v30  ;;  %v1514_v30 = vunpack.c.l.b16 %v5684_v15 }
 0x2a0   : > { %v1090_v31 = vsel %vm1032_vm3, %v5793_v32, 0.0 }
 0x2a1   : > { %1091 = vadd.xlane.f32.xlu2 %v1090_v31  ;;  %v5838_v31 = vpack.c.b16 %v1514_v30, %v1514_v30 }
 0x2a2   : > { %v1314_v41 = vpop.permute.xlu1 %1313  ;;  %v1430_v14 = vpop.permute.xlu2 %1429 }
 0x2a3   : > { %v1319_v52 = vsel %vm871_vm2, %v1314_v41, 0 }
 0x2a4   : > { %1328 = vmatpush.bf16.xpose.msrb.mxu1 %v1319_v52  ;;  %v1050_v34 = vpop.xlane.xlu0 %1049 }
 0x2a5   : > { %v5798_v36 = vpop.eup %5008  ;;  %v1062_v46 = vsub.f32 %v5728_v7, %v1050_v34 }
 0x2a6   : > { %v1093_v38 = vsel %vm1032_vm3, %v5798_v36, 0.0 }
 0x2a7   : > { %v1075_v40 = vmul.f32 1.442695, %v1062_v46  ;;  %1094 = vadd.xlane.f32.xlu0 %v1093_v38 }
 0x2a9   : > { %5010 = vpow2.f32 %v1075_v40 }
 0x2aa   : > { %5012 = vpow2.f32 %v1069_v3  ;;  %v5819_v61 = vpop.permute.xlu1 %1366  ;;  %v5851_v3 = vadd.f32 %v5707_v22, %v5634_v35  ;;  %v1422_v22 = vunpack.c.l.b16 %v5650_v51 }
 0x2af   : > { %v5803_v47 = vpop.eup %5010 }
 0x2b0   : > { %v1096_v56 = vsel %vm1032_vm3, %v5803_v47, 0.0  ;;  %v5813_v7 = vpop.eup %5012 }
 0x2b1   : > { %1097 = vadd.xlane.f32.xlu0 %v1096_v56  ;;  %v1087_v10 = vsel %vm1032_vm3, %v5813_v7, 0.0 }
 0x2b2   : > { %v5821_v33 = vpop.permute.xlu1 %1453 }
 0x2b9   : > { %1511 = vrot.lane.b32.xlu2 %v5809_v58, %s5228_s17 }
 0x2ba   : > { %v5824_v54 = vpop.permute.xlu1 %1308 }
 0x2c1   : > { %1874 = vrot.lane.b32.xlu2 %v5613_v16, %s5229_s28 }
 0x2c2   : > { %v5833_v0 = vpop.permute.xlu1 %1487 }
 0x2c5   : > { %1088 = vadd.xlane.f32.xlu1 %v1087_v10 }
 0x2de   : > { %1482 = vrot.lane.b32.xlu1 %v5826_v6, %s5228_s17 }
 0x2e6   : > { %1395 = vrot.lane.b32.xlu1 %v5831_v19, %s5228_s17 }
 0x2ed   : > { %v1053_v41 = vpop.xlane.xlu1 %1052 }
 0x2ee   : > { %v1063_v52 = vsub.f32 %v5765_v12, %v1053_v41  ;;  %1516 = vrot.lane.b32.xlu1 %v5838_v31, %s5228_s17  ;;  %v1459_v12 = vpop.permute.xlu0 %1458 }
 0x2f0   : > { %v1077_v34 = vmul.f32 1.442695, %v1063_v52  ;;  %v5867_v52 = vpack.c.b16 %v1422_v22, %v1422_v22 }
 0x2f2   : > { %5014 = vpow2.f32 %v1077_v34 }
 0x2f4   : > { %v1083_v48 = vpop.xlane.xlu2 %1082 }
 0x2f5   : > { %5016 = vrcp.f32 %v1083_v48  ;;  %v1056_v46 = vpop.xlane.xlu1 %1055 }
 0x2f6   : > { %v1064_v38 = vsub.f32 %v5771_v45, %v1056_v46 }
 0x2f8   : > { %v5844_v40 = vpop.eup %5014  ;;  %v1079_v56 = vmul.f32 1.442695, %v1064_v38 }
 0x2f9   : > { %v1099_v15 = vsel %vm1032_vm3, %v5844_v40, 0.0 }
 0x2fa   : > { %5018 = vpow2.f32 %v1079_v56  ;;  %1100 = vadd.xlane.f32.xlu0 %v1099_v15  ;;  %v1435_v56 = vsel %vm871_vm2, %v1430_v14, 0  ;;  %v4890_v15 = vpack.i.bf16 %v5640_v39, %v5655_v53 }
 0x2fb   : > { %v5017_v20 = vpop.eup %5016 }
 0x2fc   : > { %v1113_v57 = vmul.f32 %v5017_v20, %v5773_v63  ;;  %v5862_v63 = vadd.f32 %v5709_v26, %v5634_v35  ;;  %v5874_v26 = vpack.i.bf16 %v5690_v18, %v5658_v55 }
 0x2fe   : > { %4386 = vmatmul.msk.f32.vlgmr.msrb.gmra.mxu3 %vm1032_vm3, %v1113_v57 }
 0x2ff   : > { %1277 = vmatpush.msrb.mxu3 %v5851_v3 }
 0x300   : > { %v5855_v45 = vpop.eup %5018 }
 0x301   : > { %v1102_v10 = vsel %vm1032_vm3, %v5855_v45, 0.0 }
 0x302   : > { %1103 = vadd.xlane.f32.xlu0 %v1102_v10 }
 0x304   : > { %v1086_v11 = vpop.xlane.xlu0 %1085 }
 0x305   : > { %5020 = vrcp.f32 %v1086_v11 }
 0x30b   : > { %v5021_v28 = vpop.eup %5020 }
 0x30c   : > { %v1114_v30 = vmul.f32 %v5021_v28, %v5780_v60 }
 0x30d   : > { %v1401_v60 = vpop.permute.xlu1 %1400 }
 0x30e   : > { %4387 = vmatmul.msk.f32.vlgmr.msrb.gmra.mxu0 %vm1032_vm3, %v1114_v30  ;;  %v1406_v46 = vsel %vm871_vm2, %v1401_v60, 0 }
 0x30f   : > { %1300 = vmatpush.msrb.mxu0 %v5862_v63 }
 0x314   : > { %v1092_v41 = vpop.xlane.xlu2 %1091 }
 0x315   : > { %5022 = vrcp.f32 %v1092_v41 }
 0x316   : > { %1424 = vrot.lane.b32.xlu0 %v5867_v52, %s5228_s17 }
 0x31a   : > { %v1095_v34 = vpop.xlane.xlu0 %1094 }
 0x31b   : > { %v5023_v48 = vpop.eup %5022  ;;  %5024 = vrcp.f32 %v1095_v34 }
 0x31c   : > { %v1116_v35 = vmul.f32 %v5023_v48, %v5793_v32 }
 0x31e   : > { %4886 = vrot.lane.b32.xlu0 %v5874_v26, %s5228_s17  ;;  %4389 = vmatmul.msk.f32.vlgmr.msra.gmra.mxu0 %vm1032_vm3, %v1116_v35 }
 0x31f   : > { %1415 = vmatpush.bf16.xpose.msra.mxu0 %v1406_v46 }
 0x321   : > { %v5025_v51 = vpop.eup %5024 }
 0x322   : > { %v1117_v38 = vmul.f32 %v5025_v51, %v5798_v36  ;;  %v1464_v36 = vsel %vm871_vm2, %v1459_v12, 0 }
 0x324   : > { %4390 = vmatmul.msk.f32.vlgmr.msra.gmra.mxu1 %vm1032_vm3, %v1117_v38  ;;  %v1098_v32 = vpop.xlane.xlu0 %1097 }
 0x325   : > { %1444 = vmatpush.bf16.xpose.msra.mxu1 %v1435_v56  ;;  %5026 = vrcp.f32 %v1098_v32 }
 0x326   : > { %4891 = vrot.lane.b32.xlu0 %v4890_v15, %s5228_s17 }
 0x32b   : > { %v5027_v20 = vpop.eup %5026 }
 0x32c   : > { %v1118_v57 = vmul.f32 %v5027_v20, %v5803_v47  ;;  %4394 = vmatmul.msk.bf16.vlgmr.msrb.gmra.mxu1 %vm871_vm2, %v5824_v54  ;;  %v1377_v47 = vsel %vm871_vm2, %v5769_v44, 0 }
 0x32e   : > { %1872 = vrot.lane.b32.xlu0 %v5588_v59, %s5229_s28  ;;  %4391 = vmatmul.msk.f32.vlgmr.msrb.gmra.mxu2 %vm1032_vm3, %v1118_v57 }
 0x32f   : > { %1473 = vmatpush.bf16.xpose.msrb.mxu2 %v1464_v36 }
 0x336   : > { %4395 = vmatmul.msk.bf16.vlgmr.msra.gmra.mxu2 %vm871_vm2, %v5784_v9 }
 0x338   : > { %v1089_v14 = vpop.xlane.xlu1 %1088 }
 0x339   : > { %5028 = vrcp.f32 %v1089_v14 }
 0x33f   : > { %v5029_v10 = vpop.eup %5028 }
 0x340   : > { %v1115_v11 = vmul.f32 %v5029_v10, %v5813_v7  ;;  %v1493_v7 = vsel %vm871_vm2, %v5833_v0, 0 }
 0x342   : > { %4388 = vmatmul.msk.f32.vlgmr.msra.gmra.mxu3 %vm1032_vm3, %v1115_v11 }
 0x343   : > { %1386 = vmatpush.bf16.xpose.msra.mxu3 %v1377_v47 }
 0x346   : > { %4399 = vmatmul.msk.bf16.vlgmr.msrb.gmra.mxu2 %vm871_vm2, %v5821_v33 }
 0x350   : > { %v1483_v54 = vpop.permute.xlu1 %1482 }
 0x358   : > { %v1396_v28 = vpop.permute.xlu1 %1395 }
 0x360   : > { %v1517_v41 = vpop.permute.xlu1 %1516 }
 0x361   : > { %v1522_v33 = vsel %vm871_vm2, %v1517_v41, 0 }
 0x36d   : > { %v1101_v12 = vpop.xlane.xlu0 %1100 }
 0x36e   : > { %5030 = vrcp.f32 %v1101_v12 }
 0x374   : > { %v5031_v30 = vpop.eup %5030 }
 0x375   : > { %v1119_v9 = vmul.f32 %v5031_v30, %v5844_v40  ;;  %v1104_v22 = vpop.xlane.xlu0 %1103 }
 0x376   : > { %5032 = vrcp.f32 %v1104_v22 }
 0x377   : > { %4392 = vmatmul.msk.f32.vlgmr.msrb.gmra.mxu3 %vm1032_vm3, %v1119_v9 }
 0x378   : > { %1502 = vmatpush.bf16.xpose.msrb.mxu3 %v1493_v7 }
 0x37c   : > { %v5033_v44 = vpop.eup %5032 }
 0x37d   : > { %v1120_v34 = vmul.f32 %v5033_v44, %v5855_v45  ;;  %v1512_v45 = vpop.permute.xlu2 %1511 }
 0x37f   : > { %4393 = vmatmul.msk.f32.vlgmr.msrb.gmra.mxu0 %vm1032_vm3, %v1120_v34  ;;  %4396 = vmatmul.msk.bf16.vlgmr.msra.gmra.mxu3 %vm871_vm2, %v5819_v61 }
 0x380   : > { %1531 = vmatpush.bf16.xpose.msrb.mxu0 %v1522_v33 }
 0x387   : > { %4397 = vmatmul.msk.bf16.vlgmr.msra.gmra.mxu0 %vm871_vm2, %v1396_v28 }
 0x388   : > { %v1425_v40 = vpop.permute.xlu0 %1424 }
 0x389   : > { %4398 = vmatmul.msk.bf16.vlgmr.msra.gmra.mxu1 %vm871_vm2, %v1425_v40 }
 0x38b   : > { %v5922_v12 = vpop.f32.mrf.mxu0 }
 0x38f   : > { %4400 = vmatmul.msk.bf16.vlgmr.msrb.gmra.mxu3 %vm871_vm2, %v1483_v54  ;;  %v5920_v54 = vpop.f32.mrf.mxu3 }
 0x390   : > { %v4887_v0 = vpop.permute.xlu0 %4886 }
 0x391   : > { %v4889_v48 = vunpack.i.h.bf16 %v4887_v0  ;;  %v4888_v60 = vunpack.i.l.bf16 %v4887_v0 }
 0x393   : > { %1682 = vmatpush.msra.mxu2 %v4888_v60 }
 0x395   : > { %1790 = vmatpush.msrb.mxu2 %v4889_v48 }
 0x397   : > { %4401 = vmatmul.msk.bf16.vlgmr.msrb.gmra.mxu0 %vm871_vm2, %v1512_v45 }
 0x398   : > { %v4892_v35 = vpop.permute.xlu0 %4891 }
 0x399   : > { %v4894_v46 = vunpack.i.h.bf16 %v4892_v35  ;;  %v4893_v51 = vunpack.i.l.bf16 %v4892_v35 }
 0x39b   : > { %1655 = vmatpush.msrb.mxu1 %v4894_v46  ;;  %1709 = vmatpush.msra.mxu3 %v4893_v51  ;;  %v5926_v30 = vpop.f32.mrf.mxu0 }
 0x3a1   : > { %v5914_v61 = vpop.f32.mrf.mxu1 }
 0x3a9   : > { %v1330_v38 = vpop.f32.mrf.mxu1 }
 0x3aa   : > { %v1537_v56 = vmul.f32 0.17677669, %v1330_v38 }
 0x3ac   : > { %v1545_v32 = vsel %vm1032_vm3, %v1537_v56, -inf }
 0x3ad   : > { %1546 = vmax.xlane.f32.xlu2 %v1545_v32 }
 0x3b1   : > { %v5917_v15 = vpop.f32.mrf.mxu2  ;;  %v1332_v20 = vpop.f32.mrf.mxu1 }
 0x3b9   : > { %v1359_v57 = vpop.f32.mrf.mxu2 }
 0x3ba   : > { %v1538_v36 = vmul.f32 0.17677669, %v1359_v57 }
 0x3bc   : > { %v1548_v14 = vsel %vm1032_vm3, %v1538_v36, -inf }
 0x3bd   : > { %1549 = vmax.xlane.f32.xlu1 %v1548_v14 }
 0x3c1   : > { %v1361_v10 = vpop.f32.mrf.mxu2 }
 0x3c2   : > { %v4900_v10 = vpack.i.bf16 %v5862_v63, %v5687_v17 }
 0x3c5   : > { %v5924_v28 = vpop.f32.mrf.mxu3 }
 0x3c9   : > { %v1475_v11 = vpop.f32.mrf.mxu2 }
 0x3ca   : > { %v1542_v46 = vmul.f32 0.17677669, %v1475_v11  ;;  %v4895_v11 = vpack.i.bf16 %v5672_v2, %v5851_v3 }
 0x3cc   : > { %v1560_v38 = vsel %vm1032_vm3, %v1542_v46, -inf }
 0x3d1   : > { %v1477_v47 = vpop.f32.mrf.mxu2 }
 0x3fa   : > { %v5928_v9 = vpop.f32.mrf.mxu3 }
 0x3fc   : > { %v5930_v22 = vpop.f32.mrf.mxu0 }
 0x402   : > { %v1388_v7 = vpop.f32.mrf.mxu3 }
 0x403   : > { %v5932_v44 = vmul.f32 0.17677669, %v1388_v7 }
 0x404   : > { %v1417_v41 = vpop.f32.mrf.mxu0 }
 0x405   : > { %v1540_v34 = vmul.f32 0.17677669, %v1417_v41  ;;  %v1551_v33 = vsel %vm1032_vm3, %v5932_v44, -inf  ;;  %v5952_v41 = vpop.permute.xlu2 %1874 }
 0x406   : > { %1552 = vmax.xlane.f32.xlu0 %v1551_v33  ;;  %v1446_v40 = vpop.f32.mrf.mxu1 }
 0x407   : > { %v1541_v0 = vmul.f32 0.17677669, %v1446_v40  ;;  %v1554_v48 = vsel %vm1032_vm3, %v1540_v34, -inf }
 0x408   : > { %1555 = vmax.xlane.f32.xlu1 %v1554_v48 }
 0x409   : > { %v1557_v60 = vsel %vm1032_vm3, %v1541_v0, -inf }
 0x40a   : > { %v1390_v45 = vpop.f32.mrf.mxu3  ;;  %1558 = vmax.xlane.f32.xlu2 %v1557_v60 }
 0x40c   : > { %v1419_v35 = vpop.f32.mrf.mxu0 }
 0x40e   : > { %v1448_v51 = vpop.f32.mrf.mxu1 }
 0x412   : > { %v1504_v32 = vpop.f32.mrf.mxu3  ;;  %1561 = vmax.xlane.f32.xlu2 %v1560_v38 }
 0x413   : > { %v1543_v20 = vmul.f32 0.17677669, %v1504_v32 }
 0x414   : > { %v1533_v57 = vpop.f32.mrf.mxu0 }
 0x415   : > { %v1563_v14 = vsel %vm1032_vm3, %v1543_v20, -inf  ;;  %v5954_v33 = vmul.f32 0.17677669, %v1533_v57 }
 0x416   : > { %1564 = vmax.xlane.f32.xlu1 %v1563_v14 }
 0x417   : > { %v1566_v40 = vsel %vm1032_vm3, %v5954_v33, -inf }
 0x41a   : > { %4901 = vrot.lane.b32.xlu0 %v4900_v10, %s5228_s17  ;;  %v1506_v47 = vpop.f32.mrf.mxu3 }
 0x41b   : > { %v5974_v47 = vpop.permute.xlu0 %1872 }
 0x41c   : > { %v1535_v7 = vpop.f32.mrf.mxu0 }
 0x420   : > { %v1547_v48 = vpop.xlane.xlu2 %1546 }
 0x421   : > { %v1569_v60 = vsub.f32 %v1537_v56, %v1547_v48 }
 0x423   : > { %v1577_v45 = vmul.f32 1.442695, %v1569_v60 }
 0x425   : > { %5034 = vpow2.f32 %v1577_v45 }
 0x42a   : > { %1897 = vrot.lane.b32.xlu2 %v5620_v27, %s5229_s28 }
 0x42b   : > { %v5964_v35 = vpop.eup %5034 }
 0x42c   : > { %v1593_v51 = vsel %vm1032_vm3, %v5964_v35, 0.0 }
 0x42f   : > { %4896 = vrot.lane.b32.xlu1 %v4895_v11, %s5228_s17 }
 0x430   : > { %v1550_v38 = vpop.xlane.xlu1 %1549 }
 0x431   : > { %v1570_v32 = vsub.f32 %v1538_v36, %v1550_v38 }
 0x432   : > { %1966 = vrot.lane.b32.xlu2 %v5752_v29, %s5229_s28 }
 0x433   : > { %v1579_v56 = vmul.f32 1.442695, %v1570_v32 }
 0x435   : > { %5036 = vpow2.f32 %v1579_v56 }
 0x43a   : > { %1851 = vrot.lane.b32.xlu2 %v5730_v8, %s5229_s28 }
 0x43b   : > { %v5970_v57 = vpop.eup %5036 }
 0x43c   : > { %v1596_v14 = vsel %vm1032_vm3, %v5970_v57, 0.0 }
 0x442   : > { %1895 = vrot.lane.b32.xlu2 %v5737_v62, %s5229_s28 }
 0x444   : > { %1567 = vmax.xlane.f32.xlu0 %v1566_v40 }
 0x44a   : > { %1964 = vrot.lane.b32.xlu2 %v5744_v25, %s5229_s28 }
 0x452   : > { %1849 = vrot.lane.b32.xlu2 %v5756_v37, %s5229_s28 }
 0x458   : > { %1943 = vrot.lane.b32.xlu0 %v5742_v21, %s5229_s28 }
 0x459   : > { %1594 = vadd.xlane.f32.xlu1 %v1593_v51 }
 0x479   : > { %v1553_v45 = vpop.xlane.xlu0 %1552 }
 0x47b   : > { %1597 = vadd.xlane.f32.xlu2 %v1596_v14  ;;  %v1556_v10 = vpop.xlane.xlu1 %1555 }
 0x47c   : > { %v1572_v7 = vsub.f32 %v1540_v34, %v1556_v10 }
 0x47d   : > { %v1559_v11 = vpop.xlane.xlu2 %1558 }
 0x47e   : > { %v1583_v40 = vmul.f32 1.442695, %v1572_v7  ;;  %v1573_v48 = vsub.f32 %v1541_v0, %v1559_v11 }
 0x480   : > { %5038 = vpow2.f32 %v1583_v40  ;;  %v1585_v60 = vmul.f32 1.442695, %v1573_v48 }
 0x482   : > { %5040 = vpow2.f32 %v1585_v60 }
 0x485   : > { %v1562_v36 = vpop.xlane.xlu2 %1561 }
 0x486   : > { %v5976_v51 = vpop.eup %5038  ;;  %v1574_v38 = vsub.f32 %v1542_v46, %v1562_v36 }
 0x487   : > { %v1602_v32 = vsel %vm1032_vm3, %v5976_v51, 0.0 }
 0x488   : > { %v5980_v56 = vpop.eup %5040  ;;  %v1587_v14 = vmul.f32 1.442695, %v1574_v38  ;;  %1603 = vadd.xlane.f32.xlu0 %v1602_v32  ;;  %v1571_v32 = vsub.f32 %v5932_v44, %v1553_v45 }
 0x489   : > { %v1565_v50 = vpop.xlane.xlu1 %1564  ;;  %v1605_v34 = vsel %vm1032_vm3, %v5980_v56, 0.0 }
 0x48a   : > { %5042 = vpow2.f32 %v1587_v14  ;;  %v1575_v0 = vsub.f32 %v1543_v20, %v1565_v50  ;;  %1606 = vadd.xlane.f32.xlu1 %v1605_v34  ;;  %v1581_v14 = vmul.f32 1.442695, %v1571_v32 }
 0x48c   : > { %v1589_v10 = vmul.f32 1.442695, %v1575_v0  ;;  %v4902_v7 = vpop.permute.xlu0 %4901 }
 0x48d   : > { %v4904_v11 = vunpack.i.h.bf16 %v4902_v7  ;;  %v4903_v40 = vunpack.i.l.bf16 %v4902_v7  ;;  %v6001_v34 = vpop.permute.xlu2 %1897 }
 0x48e   : > { %5044 = vpow2.f32 %v1589_v10 }
 0x48f   : > { %1736 = vmatpush.msra.mxu0 %v4903_v40  ;;  %5046 = vpow2.f32 %v1581_v14  ;;  %v4910_v14 = vpack.i.bf16 %v5655_v53, %v5640_v39 }
 0x490   : > { %v5984_v46 = vpop.eup %5042 }
 0x491   : > { %1844 = vmatpush.msrb.mxu0 %v4904_v11  ;;  %v1608_v48 = vsel %vm1032_vm3, %v5984_v46, 0.0 }
 0x492   : > { %1609 = vadd.xlane.f32.xlu1 %v1608_v48 }
 0x493   : > { %1989 = vrot.lane.b32.xlu2 %v5761_v13, %s5229_s28 }
 0x494   : > { %v5990_v60 = vpop.eup %5044 }
 0x495   : > { %v1611_v50 = vsel %vm1032_vm3, %v5990_v60, 0.0  ;;  %v6003_v10 = vpop.eup %5046  ;;  %v1967_v48 = vpop.permute.xlu2 %1966 }
 0x496   : > { %v1599_v40 = vsel %vm1032_vm3, %v6003_v10, 0.0 }
 0x49a   : > { %1612 = vadd.xlane.f32.xlu1 %v1611_v50 }
 0x49c   : > { %1941 = vrot.lane.b32.xlu0 %v5867_v52, %s5229_s28 }
 0x49d   : > { %v1852_v45 = vpop.permute.xlu2 %1851 }
 0x4a1   : > { %v4897_v20 = vpop.permute.xlu1 %4896 }
 0x4a2   : > { %v4899_v36 = vunpack.i.h.bf16 %v4897_v20  ;;  %v4898_v38 = vunpack.i.l.bf16 %v4897_v20 }
 0x4a4   : > { %1763 = vmatpush.msra.mxu1 %v4899_v36  ;;  %1817 = vmatpush.msrb.mxu3 %v4898_v38  ;;  %v1857_v38 = vsel %vm871_vm2, %v1852_v45, 0 }
 0x4a5   : > { %2010 = vrot.lane.b32.xlu0 %v5809_v58, %s5229_s28  ;;  %v6012_v20 = vpop.permute.xlu2 %1895 }
 0x4ad   : > { %4906 = vrot.lane.b32.xlu0 %v5874_v26, %s5229_s28  ;;  %v1965_v32 = vpop.permute.xlu2 %1964 }
 0x4b7   : > { %v1568_v0 = vpop.xlane.xlu0 %1567 }
 0x4b8   : > { %v1576_v7 = vsub.f32 %v5954_v33, %v1568_v0 }
 0x4ba   : > { %v1591_v11 = vmul.f32 1.442695, %v1576_v7 }
 0x4bc   : > { %5048 = vpow2.f32 %v1591_v11  ;;  %1600 = vadd.xlane.f32.xlu2 %v1599_v40 }
 0x4c2   : > { %v6008_v44 = vpop.eup %5048 }
 0x4c3   : > { %v1614_v26 = vsel %vm1032_vm3, %v6008_v44, 0.0 }
 0x4c4   : > { %1615 = vadd.xlane.f32.xlu1 %v1614_v26  ;;  %v1880_v26 = vsel %vm871_vm2, %v5952_v41, 0 }
 0x4ca   : > { %v1944_v7 = vpop.permute.xlu0 %1943 }
 0x4cc   : > { %v1595_v50 = vpop.xlane.xlu1 %1594 }
 0x4cd   : > { %5050 = vrcp.f32 %v1595_v50 }
 0x4d3   : > { %v5051_v36 = vpop.eup %5050 }
 0x4d4   : > { %v1625_v33 = vmul.f32 %v5051_v36, %v5964_v35  ;;  %1920 = vrot.lane.b32.xlu2 %v5788_v1, %s5229_s28  ;;  %v1850_v35 = vpop.permute.xlu2 %1849 }
 0x4d6   : > { %4402 = vmatmul.msk.f32.vlgmr.msrb.gmra.mxu1 %vm1032_vm3, %v1625_v33 }
 0x4d7   : > { %1866 = vmatpush.bf16.xpose.msrb.mxu1 %v1857_v38 }
 0x4dc   : > { %1918 = vrot.lane.b32.xlu2 %v5831_v19, %s5229_s28 }
 0x4dd   : > { %1987 = vrot.lane.b32.xlu1 %v5826_v6, %s5229_s28 }
 0x4e4   : > { %2012 = vrot.lane.b32.xlu2 %v5838_v31, %s5229_s28 }
 0x4e5   : > { %2362 = vrot.lane.b32.xlu1 %v5613_v16, %s5230_s29 }
 0x4ec   : > { %4911 = vrot.lane.b32.xlu2 %v4910_v14, %s5229_s28 }
 0x4ee   : > { %v1598_v0 = vpop.xlane.xlu2 %1597 }
 0x4ef   : > { %5052 = vrcp.f32 %v1598_v0 }
 0x4f5   : > { %v5053_v11 = vpop.eup %5052 }
 0x4f6   : > { %v1626_v40 = vmul.f32 %v5053_v11, %v5970_v57  ;;  %v1949_v57 = vsel %vm871_vm2, %v1944_v7, 0 }
 0x4f8   : > { %4403 = vmatmul.msk.f32.vlgmr.msra.gmra.mxu2 %vm1032_vm3, %v1626_v40  ;;  %v1972_v40 = vsel %vm871_vm2, %v1967_v48, 0 }
 0x4f9   : > { %1889 = vmatpush.bf16.xpose.msra.mxu2 %v1880_v26 }
 0x4fb   : > { %v1604_v45 = vpop.xlane.xlu0 %1603 }
 0x4fc   : > { %5054 = vrcp.f32 %v1604_v45  ;;  %v1990_v45 = vpop.permute.xlu2 %1989 }
 0x4fd   : > { %v1607_v16 = vpop.xlane.xlu1 %1606 }
 0x4fe   : > { %5056 = vrcp.f32 %v1607_v16 }
 0x502   : > { %v5055_v50 = vpop.eup %5054 }
 0x503   : > { %v1628_v36 = vmul.f32 %v5055_v50, %v5976_v51 }
 0x504   : > { %v5057_v33 = vpop.eup %5056 }
 0x505   : > { %v1629_v38 = vmul.f32 %v5057_v33, %v5980_v56  ;;  %v1610_v14 = vpop.xlane.xlu1 %1609  ;;  %4405 = vmatmul.msk.f32.vlgmr.msra.gmra.mxu0 %vm1032_vm3, %v1628_v36  ;;  %v1903_v33 = vsel %vm871_vm2, %v6001_v34, 0 }
 0x506   : > { %5058 = vrcp.f32 %v1610_v14 }
 0x507   : > { %4406 = vmatmul.msk.f32.vlgmr.msra.gmra.mxu1 %vm1032_vm3, %v1629_v38 }
 0x508   : > { %1958 = vmatpush.bf16.xpose.msra.mxu1 %v1949_v57 }
 0x50c   : > { %v5059_v41 = vpop.eup %5058 }
 0x50d   : > { %v1630_v0 = vmul.f32 %v5059_v41, %v5984_v46  ;;  %v1613_v46 = vpop.xlane.xlu1 %1612 }
 0x50e   : > { %v1942_v11 = vpop.permute.xlu0 %1941 }
 0x50f   : > { %4407 = vmatmul.msk.f32.vlgmr.msrb.gmra.mxu2 %vm1032_vm3, %v1630_v0  ;;  %4410 = vmatmul.msk.bf16.vlgmr.msrb.gmra.mxu1 %vm871_vm2, %v1850_v35 }
 0x510   : > { %1981 = vmatpush.bf16.xpose.msrb.mxu2 %v1972_v40 }
 0x517   : > { %v2011_v51 = vpop.permute.xlu0 %2010  ;;  %4411 = vmatmul.msk.bf16.vlgmr.msra.gmra.mxu2 %vm871_vm2, %v5974_v47 }
 0x51f   : > { %v4907_v56 = vpop.permute.xlu0 %4906  ;;  %4414 = vmatmul.msk.bf16.vlgmr.msra.gmra.mxu1 %vm871_vm2, %v1942_v11 }
 0x520   : > { %v4908_v7 = vunpack.i.l.bf16 %v4907_v56  ;;  %v4909_v26 = vunpack.i.h.bf16 %v4907_v56 }
 0x522   : > { %2176 = vmatpush.msra.mxu2 %v4908_v7 }
 0x527   : > { %4415 = vmatmul.msk.bf16.vlgmr.msrb.gmra.mxu2 %vm871_vm2, %v1965_v32 }
 0x528   : > { %2280 = vmatpush.msrb.mxu2 %v4909_v26 }
 0x52f   : > { %v1601_v48 = vpop.xlane.xlu2 %1600 }
 0x530   : > { %5060 = vrcp.f32 %v1601_v48 }
 0x531   : > { %5062 = vrcp.f32 %v1613_v46 }
 0x536   : > { %v5061_v16 = vpop.eup %5060 }
 0x537   : > { %v1627_v35 = vmul.f32 %v5061_v16, %v6003_v10  ;;  %v1921_v50 = vpop.permute.xlu2 %1920  ;;  %v1616_v36 = vpop.xlane.xlu1 %1615  ;;  %v1995_v10 = vsel %vm871_vm2, %v1990_v45, 0 }
 0x538   : > { %v1926_v47 = vsel %vm871_vm2, %v1921_v50, 0  ;;  %5064 = vrcp.f32 %v1616_v36  ;;  %v5063_v32 = vpop.eup %5062 }
 0x539   : > { %4404 = vmatmul.msk.f32.vlgmr.msra.gmra.mxu3 %vm1032_vm3, %v1627_v35  ;;  %1935 = vmatpush.bf16.xpose.msra.mxu0 %v1926_v47  ;;  %v1631_v14 = vmul.f32 %v5063_v32, %v5990_v60 }
 0x53a   : > { %1912 = vmatpush.bf16.xpose.msra.mxu3 %v1903_v33 }
 0x53e   : > { %v5065_v38 = vpop.eup %5064 }
 0x53f   : > { %v1632_v57 = vmul.f32 %v5065_v38, %v6008_v44  ;;  %v1919_v41 = vpop.permute.xlu2 %1918 }
 0x541   : > { %4408 = vmatmul.msk.f32.vlgmr.msrb.gmra.mxu3 %vm1032_vm3, %v1631_v14  ;;  %4409 = vmatmul.msk.f32.vlgmr.msrb.gmra.mxu0 %vm1032_vm3, %v1632_v57 }
 0x542   : > { %2004 = vmatpush.bf16.xpose.msrb.mxu3 %v1995_v10 }
 0x547   : > { %v2013_v0 = vpop.permute.xlu2 %2012 }
 0x548   : > { %v2018_v34 = vsel %vm871_vm2, %v2013_v0, 0 }
 0x549   : > { %4412 = vmatmul.msk.bf16.vlgmr.msra.gmra.mxu3 %vm871_vm2, %v6012_v20  ;;  %4413 = vmatmul.msk.bf16.vlgmr.msra.gmra.mxu0 %vm871_vm2, %v1919_v41 }
 0x54a   : > { %2027 = vmatpush.bf16.xpose.msrb.mxu0 %v2018_v34 }
 0x54f   : > { %v4912_v60 = vpop.permute.xlu2 %4911  ;;  %v1988_v40 = vpop.permute.xlu1 %1987 }
 0x550   : > { %v4914_v11 = vunpack.i.h.bf16 %v4912_v60  ;;  %v4913_v44 = vunpack.i.l.bf16 %v4912_v60 }
 0x552   : > { %2150 = vmatpush.msrb.mxu1 %v4913_v44  ;;  %2202 = vmatpush.msra.mxu3 %v4914_v11 }
 0x553   : > { %v6063_v56 = vpop.f32.mrf.mxu1 }
 0x559   : > { %4416 = vmatmul.msk.bf16.vlgmr.msrb.gmra.mxu3 %vm871_vm2, %v1988_v40  ;;  %4417 = vmatmul.msk.bf16.vlgmr.msrb.gmra.mxu0 %vm871_vm2, %v2011_v51 }
 0x57b   : > { %v6065_v7 = vpop.f32.mrf.mxu2 }
 0x582   : > { %v6083_v34 = vpop.f32.mrf.mxu0 }
 0x584   : > { %v6069_v26 = vpop.f32.mrf.mxu1 }
 0x58c   : > { %v1868_v45 = vpop.f32.mrf.mxu1 }
 0x58d   : > { %v2033_v46 = vmul.f32 0.17677669, %v1868_v45 }
 0x58f   : > { %v2041_v48 = vsel %vm1032_vm3, %v2033_v46, -inf }
 0x590   : > { %2042 = vmax.xlane.f32.xlu1 %v2041_v48 }
 0x592   : > { %v6072_v16 = vpop.f32.mrf.mxu2 }
 0x594   : > { %v1870_v35 = vpop.f32.mrf.mxu1 }
 0x59a   : > { %v1891_v50 = vpop.f32.mrf.mxu2 }
 0x59b   : > { %v2034_v36 = vmul.f32 0.17677669, %v1891_v50 }
 0x59c   : > { %v1960_v51 = vpop.f32.mrf.mxu1 }
 0x59d   : > { %v6074_v47 = vmul.f32 0.17677669, %v1960_v51  ;;  %v2044_v33 = vsel %vm1032_vm3, %v2034_v36, -inf }
 0x59e   : > { %2045 = vmax.xlane.f32.xlu2 %v2044_v33 }
 0x59f   : > { %v2053_v32 = vsel %vm1032_vm3, %v6074_v47, -inf }
 0x5a0   : > { %2054 = vmax.xlane.f32.xlu0 %v2053_v32 }
 0x5a2   : > { %v1893_v38 = vpop.f32.mrf.mxu2 }
 0x5a4   : > { %v1962_v14 = vpop.f32.mrf.mxu1 }
 0x5aa   : > { %v1983_v57 = vpop.f32.mrf.mxu2 }
 0x5ab   : > { %v6079_v41 = vmul.f32 0.17677669, %v1983_v57 }
 0x5ad   : > { %v2056_v10 = vsel %vm1032_vm3, %v6079_v41, -inf }
 0x5ae   : > { %2057 = vmax.xlane.f32.xlu0 %v2056_v10 }
 0x5b2   : > { %v1985_v0 = vpop.f32.mrf.mxu2 }
 0x5bc   : > { %v6085_v60 = vpop.f32.mrf.mxu3 }
 0x5be   : > { %v6089_v44 = vpop.f32.mrf.mxu0 }
 0x5c2   : > { %2337 = vrot.lane.b32.xlu0 %v5756_v37, %s5230_s29 }
 0x5c4   : > { %v6093_v40 = vpop.f32.mrf.mxu3 }
 0x5c6   : > { %v1937_v45 = vpop.f32.mrf.mxu0 }
 0x5c7   : > { %v2036_v33 = vmul.f32 0.17677669, %v1937_v45  ;;  %v4915_v45 = vpack.i.bf16 %v5851_v3, %v5672_v2 }
 0x5c9   : > { %v2050_v14 = vsel %vm1032_vm3, %v2036_v33, -inf }
 0x5cc   : > { %v1914_v48 = vpop.f32.mrf.mxu3 }
 0x5cd   : > { %v2035_v35 = vmul.f32 0.17677669, %v1914_v48 }
 0x5ce   : > { %v1939_v50 = vpop.f32.mrf.mxu0 }
 0x5cf   : > { %v2047_v51 = vsel %vm1032_vm3, %v2035_v35, -inf }
 0x5d0   : > { %2048 = vmax.xlane.f32.xlu2 %v2047_v51 }
 0x5d4   : > { %v1916_v32 = vpop.f32.mrf.mxu3 }
 0x5d6   : > { %v2029_v38 = vpop.f32.mrf.mxu0 }
 0x5d7   : > { %v6098_v20 = vmul.f32 0.17677669, %v2029_v38 }
 0x5d8   : > { %2051 = vmax.xlane.f32.xlu2 %v2050_v14 }
 0x5d9   : > { %v2062_v48 = vsel %vm1032_vm3, %v6098_v20, -inf }
 0x5dc   : > { %v2006_v57 = vpop.f32.mrf.mxu3 }
 0x5dd   : > { %v2039_v10 = vmul.f32 0.17677669, %v2006_v57 }
 0x5de   : > { %v2031_v0 = vpop.f32.mrf.mxu0 }
 0x5df   : > { %v2059_v37 = vsel %vm1032_vm3, %v2039_v10, -inf }
 0x5e0   : > { %2060 = vmax.xlane.f32.xlu1 %v2059_v37 }
 0x5e4   : > { %v2008_v11 = vpop.f32.mrf.mxu3 }
 0x5e5   : > { %v6113_v11 = vpop.permute.xlu1 %2362 }
 0x5ec   : > { %2063 = vmax.xlane.f32.xlu0 %v2062_v48 }
 0x5f0   : > { %4916 = vrot.lane.b32.xlu2 %v4915_v45, %s5229_s28 }
 0x5f8   : > { %2339 = vrot.lane.b32.xlu2 %v5730_v8, %s5230_s29 }
 0x5f9   : > { %2360 = vrot.lane.b32.xlu1 %v5588_v59, %s5230_s29 }
 0x600   : > { %2385 = vrot.lane.b32.xlu2 %v5620_v27, %s5230_s29  ;;  %2454 = vrot.lane.b32.xlu0 %v5752_v29, %s5230_s29 }
 0x603   : > { %v2043_v50 = vpop.xlane.xlu1 %2042 }
 0x604   : > { %v2065_v8 = vsub.f32 %v2033_v46, %v2043_v50 }
 0x606   : > { %v2073_v59 = vmul.f32 1.442695, %v2065_v8 }
 0x608   : > { %2207 = vrot.lane.b32.xlu2 %v5687_v17, %s5229_s28  ;;  %2452 = vrot.lane.b32.xlu0 %v5744_v25, %s5230_s29  ;;  %5066 = vpow2.f32 %v2073_v59 }
 0x60e   : > { %v6121_v38 = vpop.eup %5066 }
 0x60f   : > { %v2089_v29 = vsel %vm1032_vm3, %v6121_v38, 0.0 }
 0x610   : > { %2383 = vrot.lane.b32.xlu2 %v5737_v62, %s5230_s29 }
 0x611   : > { %v2046_v51 = vpop.xlane.xlu2 %2045 }
 0x612   : > { %v2066_v27 = vsub.f32 %v2034_v36, %v2046_v51 }
 0x613   : > { %v2055_v14 = vpop.xlane.xlu0 %2054 }
 0x614   : > { %v2075_v32 = vmul.f32 1.442695, %v2066_v27  ;;  %v2069_v25 = vsub.f32 %v6074_v47, %v2055_v14 }
 0x616   : > { %5068 = vpow2.f32 %v2075_v32  ;;  %v2081_v46 = vmul.f32 1.442695, %v2069_v25 }
 0x618   : > { %5070 = vpow2.f32 %v2081_v46 }
 0x61c   : > { %v6125_v57 = vpop.eup %5068 }
 0x61d   : > { %v2092_v62 = vsel %vm1032_vm3, %v6125_v57, 0.0 }
 0x61e   : > { %v6130_v36 = vpop.eup %5070 }
 0x61f   : > { %v2101_v0 = vsel %vm1032_vm3, %v6130_v36, 0.0 }
 0x621   : > { %v2058_v37 = vpop.xlane.xlu0 %2057 }
 0x622   : > { %v2070_v50 = vsub.f32 %v6079_v41, %v2058_v37 }
 0x623   : > { %2090 = vadd.xlane.f32.xlu1 %v2089_v29 }
 0x624   : > { %v2083_v47 = vmul.f32 1.442695, %v2070_v50 }
 0x62b   : > { %2093 = vadd.xlane.f32.xlu1 %v2092_v62 }
 0x639   : > { %2102 = vadd.xlane.f32.xlu2 %v2101_v0 }
 0x643   : > { %v2049_v48 = vpop.xlane.xlu2 %2048 }
 0x644   : > { %v2067_v45 = vsub.f32 %v2035_v35, %v2049_v48 }
 0x646   : > { %v2077_v8 = vmul.f32 1.442695, %v2067_v45 }
 0x648   : > { %5072 = vpow2.f32 %v2077_v8 }
 0x649   : > { %5074 = vpow2.f32 %v2083_v47 }
 0x64b   : > { %v2052_v59 = vpop.xlane.xlu2 %2051 }
 0x64c   : > { %v2068_v51 = vsub.f32 %v2036_v33, %v2052_v59  ;;  %v2338_v59 = vpop.permute.xlu0 %2337 }
 0x64e   : > { %v6135_v27 = vpop.eup %5072  ;;  %v2079_v32 = vmul.f32 1.442695, %v2068_v51 }
 0x64f   : > { %v2095_v29 = vsel %vm1032_vm3, %v6135_v27, 0.0  ;;  %v6139_v62 = vpop.eup %5074 }
 0x650   : > { %5076 = vpow2.f32 %v2079_v32  ;;  %2096 = vadd.xlane.f32.xlu2 %v2095_v29  ;;  %v2104_v33 = vsel %vm1032_vm3, %v6139_v62, 0.0 }
 0x653   : > { %v2061_v14 = vpop.xlane.xlu1 %2060  ;;  %v4917_v25 = vpop.permute.xlu2 %4916 }
 0x654   : > { %v2071_v35 = vsub.f32 %v2039_v10, %v2061_v14  ;;  %v4919_v41 = vunpack.i.h.bf16 %v4917_v25  ;;  %v4918_v46 = vunpack.i.l.bf16 %v4917_v25 }
 0x656   : > { %v6141_v0 = vpop.eup %5076  ;;  %v2085_v37 = vmul.f32 1.442695, %v2071_v35  ;;  %2254 = vmatpush.msra.mxu1 %v4918_v46  ;;  %2306 = vmatpush.msrb.mxu3 %v4919_v41  ;;  %v2368_v41 = vsel %vm871_vm2, %v6113_v11, 0 }
 0x657   : > { %v2098_v48 = vsel %vm1032_vm3, %v6141_v0, 0.0 }
 0x658   : > { %5078 = vpow2.f32 %v2085_v37  ;;  %2105 = vadd.xlane.f32.xlu2 %v2104_v33  ;;  %2099 = vadd.xlane.f32.xlu1 %v2098_v48 }
 0x65b   : > { %v2340_v45 = vpop.permute.xlu2 %2339 }
 0x65e   : > { %v6147_v50 = vpop.eup %5078 }
 0x65f   : > { %v2107_v10 = vsel %vm1032_vm3, %v6147_v50, 0.0  ;;  %v2064_v51 = vpop.xlane.xlu0 %2063 }
 0x660   : > { %2108 = vadd.xlane.f32.xlu0 %v2107_v10  ;;  %v2072_v32 = vsub.f32 %v6098_v20, %v2064_v51  ;;  %v2345_v20 = vsel %vm871_vm2, %v2340_v45, 0 }
 0x662   : > { %v2087_v29 = vmul.f32 1.442695, %v2072_v32 }
 0x663   : > { %v2386_v8 = vpop.permute.xlu2 %2385 }
 0x664   : > { %5080 = vpow2.f32 %v2087_v29  ;;  %v2391_v51 = vsel %vm871_vm2, %v2386_v8, 0 }
 0x66b   : > { %v2208_v47 = vpop.permute.xlu2 %2207 }
 0x66c   : > { %2228 = vmatpush.msra.mxu0 %v2208_v47 }
 0x670   : > { %2311 = vrot.lane.b32.xlu2 %v5862_v63, %s5229_s28 }
 0x671   : > { %2408 = vrot.lane.b32.xlu1 %v5788_v1, %s5230_s29  ;;  %v2361_v1 = vpop.permute.xlu1 %2360 }
 0x672   : > { %v2455_v33 = vpop.permute.xlu0 %2454 }
 0x674   : > { %2477 = vrot.lane.b32.xlu0 %v5761_v13, %s5230_s29 }
 0x678   : > { %2406 = vrot.lane.b32.xlu2 %v5831_v19, %s5230_s29  ;;  %v6168_v19 = vpop.eup %5080 }
 0x679   : > { %2475 = vrot.lane.b32.xlu1 %v5826_v6, %s5230_s29 }
 0x67a   : > { %v2453_v11 = vpop.permute.xlu0 %2452 }
 0x680   : > { %2431 = vrot.lane.b32.xlu2 %v5742_v21, %s5230_s29  ;;  %v2110_v21 = vsel %vm1032_vm3, %v6168_v19, 0.0 }
 0x688   : > { %2429 = vrot.lane.b32.xlu2 %v5867_v52, %s5230_s29 }
 0x690   : > { %2498 = vrot.lane.b32.xlu2 %v5809_v58, %s5230_s29  ;;  %v2384_v58 = vpop.permute.xlu2 %2383 }
 0x696   : > { %v2091_v13 = vpop.xlane.xlu1 %2090 }
 0x697   : > { %5082 = vrcp.f32 %v2091_v13 }
 0x69d   : > { %v5083_v6 = vpop.eup %5082 }
 0x69e   : > { %v2121_v14 = vmul.f32 %v5083_v6, %v6121_v38  ;;  %v2094_v52 = vpop.xlane.xlu1 %2093  ;;  %2111 = vadd.xlane.f32.xlu0 %v2110_v21 }
 0x69f   : > { %5084 = vrcp.f32 %v2094_v52 }
 0x6a0   : > { %4418 = vmatmul.msk.f32.vlgmr.msrb.gmra.mxu1 %vm1032_vm3, %v2121_v14 }
 0x6a1   : > { %2354 = vmatpush.bf16.xpose.msrb.mxu1 %v2345_v20 }
 0x6a5   : > { %v5085_v25 = vpop.eup %5084 }
 0x6a6   : > { %v2122_v35 = vmul.f32 %v5085_v25, %v6125_v57 }
 0x6a8   : > { %4419 = vmatmul.msk.f32.vlgmr.msra.gmra.mxu2 %vm1032_vm3, %v2122_v35 }
 0x6a9   : > { %2377 = vmatpush.bf16.xpose.msra.mxu2 %v2368_v41 }
 0x6ac   : > { %v2103_v46 = vpop.xlane.xlu2 %2102 }
 0x6ad   : > { %5086 = vrcp.f32 %v2103_v46 }
 0x6b2   : > { %2500 = vrot.lane.b32.xlu0 %v5838_v31, %s5230_s29 }
 0x6b3   : > { %v5087_v38 = vpop.eup %5086 }
 0x6b4   : > { %v2125_v37 = vmul.f32 %v5087_v38, %v6130_v36 }
 0x6b6   : > { %4422 = vmatmul.msk.f32.vlgmr.msra.gmra.mxu1 %vm1032_vm3, %v2125_v37 }
 0x6be   : > { %4426 = vmatmul.msk.bf16.vlgmr.msrb.gmra.mxu1 %vm871_vm2, %v2338_v59 }
 0x6c3   : > { %v2097_v57 = vpop.xlane.xlu2 %2096 }
 0x6c4   : > { %5088 = vrcp.f32 %v2097_v57 }
 0x6ca   : > { %v5089_v48 = vpop.eup %5088 }
 0x6cb   : > { %v2123_v45 = vmul.f32 %v5089_v48, %v6135_v27  ;;  %v2100_v10 = vpop.xlane.xlu1 %2099  ;;  %v2106_v47 = vpop.xlane.xlu2 %2105  ;;  %v2460_v27 = vsel %vm871_vm2, %v2455_v33, 0 }
 0x6cc   : > { %5090 = vrcp.f32 %v2100_v10 }
 0x6cd   : > { %5092 = vrcp.f32 %v2106_v47  ;;  %4420 = vmatmul.msk.f32.vlgmr.msra.gmra.mxu3 %vm1032_vm3, %v2123_v45 }
 0x6ce   : > { %2400 = vmatpush.bf16.xpose.msra.mxu3 %v2391_v51 }
 0x6d2   : > { %v5091_v31 = vpop.eup %5090 }
 0x6d3   : > { %v5093_v36 = vpop.eup %5092  ;;  %v2124_v59 = vmul.f32 %v5091_v31, %v6141_v0  ;;  %v2312_v32 = vpop.permute.xlu2 %2311 }
 0x6d4   : > { %v2109_v29 = vpop.xlane.xlu0 %2108  ;;  %v2126_v13 = vmul.f32 %v5093_v36, %v6139_v62  ;;  %2332 = vmatpush.msrb.mxu0 %v2312_v32 }
 0x6d5   : > { %5094 = vrcp.f32 %v2109_v29  ;;  %4421 = vmatmul.msk.f32.vlgmr.msra.gmra.mxu0 %vm1032_vm3, %v2124_v59 }
 0x6d6   : > { %4423 = vmatmul.msk.f32.vlgmr.msrb.gmra.mxu2 %vm1032_vm3, %v2126_v13 }
 0x6d7   : > { %2469 = vmatpush.bf16.xpose.msrb.mxu2 %v2460_v27 }
 0x6db   : > { %v5095_v8 = vpop.eup %5094  ;;  %v2407_v21 = vpop.permute.xlu2 %2406 }
 0x6dc   : > { %v2127_v6 = vmul.f32 %v5095_v8, %v6147_v50 }
 0x6de   : > { %4424 = vmatmul.msk.f32.vlgmr.msrb.gmra.mxu3 %vm1032_vm3, %v2127_v6  ;;  %4427 = vmatmul.msk.bf16.vlgmr.msra.gmra.mxu2 %vm871_vm2, %v2361_v1 }
 0x6e3   : > { %v2409_v0 = vpop.permute.xlu1 %2408  ;;  %v2432_v14 = vpop.permute.xlu2 %2431 }
 0x6e4   : > { %v2414_v62 = vsel %vm871_vm2, %v2409_v0, 0  ;;  %v2437_v52 = vsel %vm871_vm2, %v2432_v14, 0 }
 0x6e5   : > { %2423 = vmatpush.bf16.xpose.msra.mxu0 %v2414_v62  ;;  %2446 = vmatpush.bf16.xpose.msra.mxu1 %v2437_v52 }
 0x6e6   : > { %4428 = vmatmul.msk.bf16.vlgmr.msra.gmra.mxu3 %vm871_vm2, %v2384_v58  ;;  %v2478_v20 = vpop.permute.xlu0 %2477 }
 0x6e7   : > { %v2483_v25 = vsel %vm871_vm2, %v2478_v20, 0 }
 0x6e8   : > { %2492 = vmatpush.bf16.xpose.msrb.mxu3 %v2483_v25 }
 0x6eb   : > { %v2430_v50 = vpop.permute.xlu2 %2429  ;;  %v2476_v1 = vpop.permute.xlu1 %2475 }
 0x6ec   : > { %4430 = vmatmul.msk.bf16.vlgmr.msra.gmra.mxu1 %vm871_vm2, %v2430_v50 }
 0x6ee   : > { %4431 = vmatmul.msk.bf16.vlgmr.msrb.gmra.mxu2 %vm871_vm2, %v2453_v11 }
 0x6f3   : > { %v2499_v48 = vpop.permute.xlu2 %2498 }
 0x6f6   : > { %4432 = vmatmul.msk.bf16.vlgmr.msrb.gmra.mxu3 %vm871_vm2, %v2476_v1 }
 0x711   : > { %v2112_v35 = vpop.xlane.xlu0 %2111 }
 0x712   : > { %5096 = vrcp.f32 %v2112_v35 }
 0x718   : > { %v5097_v41 = vpop.eup %5096 }
 0x719   : > { %v2128_v46 = vmul.f32 %v5097_v41, %v6168_v19 }
 0x71b   : > { %4425 = vmatmul.msk.f32.vlgmr.msrb.gmra.mxu0 %vm1032_vm3, %v2128_v46  ;;  %v4920_v46 = vpack.i.bf16 %v5640_v39, %v5658_v55 }
 0x71d   : > { %v6206_v37 = vpop.f32.mrf.mxu1 }
 0x723   : > { %4429 = vmatmul.msk.bf16.vlgmr.msra.gmra.mxu0 %vm871_vm2, %v2407_v21 }
 0x724   : > { %v2501_v58 = vpop.permute.xlu0 %2500 }
 0x725   : > { %v2506_v38 = vsel %vm871_vm2, %v2501_v58, 0 }
 0x726   : > { %2515 = vmatpush.bf16.xpose.msrb.mxu0 %v2506_v38 }
 0x72b   : > { %v6208_v33 = vpop.f32.mrf.mxu2 }
 0x72c   : > { %v4940_v57 = vpack.i.bf16 %v6208_v33, %v6206_v37 }
 0x733   : > { %v6212_v11 = vpop.f32.mrf.mxu1  ;;  %4433 = vmatmul.msk.bf16.vlgmr.msrb.gmra.mxu0 %vm871_vm2, %v2499_v48 }
 0x73b   : > { %v2356_v19 = vpop.f32.mrf.mxu1 }
 0x73c   : > { %v2521_v45 = vmul.f32 0.17677669, %v2356_v19 }
 0x73e   : > { %v2529_v10 = vsel %vm1032_vm3, %v2521_v45, -inf }
 0x73f   : > { %2530 = vmax.xlane.f32.xlu0 %v2529_v10 }
 0x743   : > { %v2358_v47 = vpop.f32.mrf.mxu1 }
 0x750   : > { %v6216_v51 = vpop.f32.mrf.mxu3 }
 0x752   : > { %v6232_v58 = vpop.f32.mrf.mxu0 }
 0x759   : > { %v6218_v31 = vpop.f32.mrf.mxu2 }
 0x761   : > { %v6220_v36 = vpop.f32.mrf.mxu3  ;;  %v2379_v59 = vpop.f32.mrf.mxu2 }
 0x762   : > { %v2522_v32 = vmul.f32 0.17677669, %v2379_v59 }
 0x764   : > { %v2532_v29 = vsel %vm1032_vm3, %v2522_v32, -inf }
 0x765   : > { %2533 = vmax.xlane.f32.xlu1 %v2532_v29 }
 0x769   : > { %v2402_v13 = vpop.f32.mrf.mxu3  ;;  %v2381_v27 = vpop.f32.mrf.mxu2 }
 0x76a   : > { %v2448_v8 = vpop.f32.mrf.mxu1  ;;  %v2523_v14 = vmul.f32 0.17677669, %v2402_v13 }
 0x76b   : > { %v2525_v6 = vmul.f32 0.17677669, %v2448_v8 }
 0x76c   : > { %v2535_v50 = vsel %vm1032_vm3, %v2523_v14, -inf }
 0x76d   : > { %v2541_v21 = vsel %vm1032_vm3, %v2525_v6, -inf }
 0x76e   : > { %2542 = vmax.xlane.f32.xlu2 %v2541_v21 }
 0x771   : > { %v2404_v0 = vpop.f32.mrf.mxu3  ;;  %v2471_v62 = vpop.f32.mrf.mxu2 }
 0x772   : > { %v6224_v52 = vmul.f32 0.17677669, %v2471_v62  ;;  %v2450_v20 = vpop.f32.mrf.mxu1 }
 0x774   : > { %v2544_v25 = vsel %vm1032_vm3, %v6224_v52, -inf }
 0x775   : > { %2545 = vmax.xlane.f32.xlu0 %v2544_v25 }
 0x776   : > { %2536 = vmax.xlane.f32.xlu2 %v2535_v50  ;;  %v4925_v50 = vpack.i.bf16 %v5687_v17, %v5655_v53 }
 0x779   : > { %v2494_v1 = vpop.f32.mrf.mxu3  ;;  %v2473_v35 = vpop.f32.mrf.mxu2 }
 0x77a   : > { %v2527_v59 = vmul.f32 0.17677669, %v2494_v1 }
 0x77c   : > { %v2547_v13 = vsel %vm1032_vm3, %v2527_v59, -inf }
 0x781   : > { %v2496_v41 = vpop.f32.mrf.mxu3 }
 0x789   : > { %4921 = vrot.lane.b32.xlu0 %v4920_v46, %s5230_s29 }
 0x798   : > { %v6234_v38 = vpop.f32.mrf.mxu0 }
 0x799   : > { %v4985_v48 = vpack.i.bf16 %v6234_v38, %v6220_v36 }
 0x7a0   : > { %v2425_v19 = vpop.f32.mrf.mxu0 }
 0x7a1   : > { %v2524_v10 = vmul.f32 0.17677669, %v2425_v19 }
 0x7a3   : > { %v2538_v47 = vsel %vm1032_vm3, %v2524_v10, -inf }
 0x7a4   : > { %2539 = vmax.xlane.f32.xlu1 %v2538_v47 }
 0x7a8   : > { %v2427_v29 = vpop.f32.mrf.mxu0 }
 0x7ac   : > { %2548 = vmax.xlane.f32.xlu1 %v2547_v13 }
 0x7b0   : > { %v2517_v39 = vpop.f32.mrf.mxu0 }
 0x7b1   : > { %v2528_v55 = vmul.f32 0.17677669, %v2517_v39 }
 0x7b2   : > { %v2531_v27 = vpop.xlane.xlu0 %2530 }
 0x7b3   : > { %v2553_v8 = vsub.f32 %v2521_v45, %v2531_v27  ;;  %v2550_v21 = vsel %vm1032_vm3, %v2528_v55, -inf }
 0x7b4   : > { %2551 = vmax.xlane.f32.xlu2 %v2550_v21  ;;  %v4930_v21 = vpack.i.bf16 %v5672_v2, %v5690_v18 }
 0x7b5   : > { %v2561_v0 = vmul.f32 1.442695, %v2553_v8 }
 0x7b7   : > { %5098 = vpow2.f32 %v2561_v0 }
 0x7b8   : > { %v2519_v62 = vpop.f32.mrf.mxu0 }
 0x7bd   : > { %v6241_v20 = vpop.eup %5098 }
 0x7be   : > { %v2577_v25 = vsel %vm1032_vm3, %v6241_v20, 0.0 }
 0x7bf   : > { %2578 = vadd.xlane.f32.xlu1 %v2577_v25  ;;  %v7043_v25 = vpack.i.bf16 %v6065_v7, %v6063_v56 }
 0x7cc   : > { %4926 = vrot.lane.b32.xlu2 %v4925_v50, %s5230_s29 }
 0x7d8   : > { %v2534_v1 = vpop.xlane.xlu1 %2533 }
 0x7d9   : > { %v2554_v35 = vsub.f32 %v2522_v32, %v2534_v1 }
 0x7db   : > { %v2563_v45 = vmul.f32 1.442695, %v2554_v35 }
 0x7dd   : > { %5100 = vpow2.f32 %v2563_v45 }
 0x7e1   : > { %v2543_v41 = vpop.xlane.xlu2 %2542 }
 0x7e2   : > { %v2557_v46 = vsub.f32 %v2525_v6, %v2543_v41 }
 0x7e3   : > { %v6248_v19 = vpop.eup %5100 }
 0x7e4   : > { %v2569_v47 = vmul.f32 1.442695, %v2557_v46  ;;  %v2580_v29 = vsel %vm1032_vm3, %v6248_v19, 0.0 }
 0x7e5   : > { %2581 = vadd.xlane.f32.xlu0 %v2580_v29 }
 0x7e6   : > { %5102 = vpow2.f32 %v2569_v47 }
 0x7e8   : > { %v2546_v32 = vpop.xlane.xlu0 %2545 }
 0x7e9   : > { %v2537_v13 = vpop.xlane.xlu2 %2536  ;;  %v2558_v35 = vsub.f32 %v6224_v52, %v2546_v32 }
 0x7ea   : > { %v2555_v39 = vsub.f32 %v2523_v14, %v2537_v13 }
 0x7eb   : > { %v2571_v18 = vmul.f32 1.442695, %v2558_v35 }
 0x7ec   : > { %v6252_v27 = vpop.eup %5102  ;;  %v2565_v53 = vmul.f32 1.442695, %v2555_v39 }
 0x7ed   : > { %v2589_v17 = vsel %vm1032_vm3, %v6252_v27, 0.0 }
 0x7ee   : > { %5104 = vpow2.f32 %v2565_v53  ;;  %2590 = vadd.xlane.f32.xlu1 %v2589_v17 }
 0x7f4   : > { %v6256_v6 = vpop.eup %5104 }
 0x7f5   : > { %v2583_v8 = vsel %vm1032_vm3, %v6256_v6, 0.0 }
 0x7f6   : > { %2584 = vadd.xlane.f32.xlu2 %v2583_v8  ;;  %v4965_v8 = vpack.i.bf16 %v6072_v16, %v6069_v26 }
 0x7f9   : > { %4931 = vrot.lane.b32.xlu0 %v4930_v21, %s5230_s29  ;;  %v7044_v21 = vpack.i.bf16 %v6083_v34, %v6085_v60 }
 0x7fb   : > { %v4922_v14 = vpop.permute.xlu0 %4921 }
 0x7fc   : > { %v4924_v0 = vunpack.i.h.bf16 %v4922_v14  ;;  %v4923_v62 = vunpack.i.l.bf16 %v4922_v14 }
 0x7fe   : > { %2638 = vmatpush.msrb.mxu1 %v4924_v0  ;;  %2664 = vmatpush.msra.mxu2 %v4923_v62 }
 0x80e   : > { %2773 = vrot.lane.b32.xlu2 %v5851_v3, %s5230_s29 }
 0x816   : > { %4936 = vrot.lane.b32.xlu2 %v7043_v25, %s5230_s29 }
 0x817   : > { %v2540_v50 = vpop.xlane.xlu1 %2539 }
 0x818   : > { %v2556_v1 = vsub.f32 %v2524_v10, %v2540_v50 }
 0x81a   : > { %v2567_v2 = vmul.f32 1.442695, %v2556_v1 }
 0x81c   : > { %5106 = vpow2.f32 %v2567_v2 }
 0x81d   : > { %5108 = vpow2.f32 %v2571_v18 }
 0x81e   : > { %4941 = vrot.lane.b32.xlu2 %v4940_v57, %s5229_s28 }
 0x81f   : > { %v2549_v45 = vpop.xlane.xlu1 %2548 }
 0x820   : > { %v2559_v3 = vsub.f32 %v2527_v59, %v2549_v45 }
 0x822   : > { %v5107_v41 = vpop.eup %5106  ;;  %v2573_v56 = vmul.f32 1.442695, %v2559_v3 }
 0x823   : > { %v2586_v46 = vsel %vm1032_vm3, %v5107_v41, 0.0  ;;  %v5109_v10 = vpop.eup %5108 }
 0x824   : > { %2587 = vadd.xlane.f32.xlu1 %v2586_v46  ;;  %5110 = vpow2.f32 %v2573_v56  ;;  %v2592_v29 = vsel %vm1032_vm3, %v5109_v10, 0.0 }
 0x827   : > { %v2552_v7 = vpop.xlane.xlu2 %2551 }
 0x828   : > { %v2560_v47 = vsub.f32 %v2528_v55, %v2552_v7 }
 0x82a   : > { %v2575_v52 = vmul.f32 1.442695, %v2560_v47  ;;  %v5111_v37 = vpop.eup %5110 }
 0x82b   : > { %v2595_v59 = vsel %vm1032_vm3, %v5111_v37, 0.0 }
 0x82c   : > { %5112 = vpow2.f32 %v2575_v52  ;;  %2593 = vadd.xlane.f32.xlu1 %v2592_v29 }
 0x82f   : > { %v4927_v13 = vpop.permute.xlu2 %4926 }
 0x830   : > { %v4929_v33 = vunpack.i.h.bf16 %v4927_v13  ;;  %v4928_v57 = vunpack.i.l.bf16 %v4927_v13 }
 0x832   : > { %v5113_v39 = vpop.eup %5112  ;;  %v2579_v53 = vpop.xlane.xlu1 %2578  ;;  %2690 = vmatpush.msra.mxu3 %v4928_v57  ;;  %2716 = vmatpush.msra.mxu0 %v4929_v33  ;;  %v4980_v57 = vpack.i.bf16 %v6089_v44, %v6093_v40  ;;  %v4763_v44 = vld [vmem:[%s7012_s6 + $0x20] sm:$0xff]  ;;  %v4762_v40 = vld [vmem:[%s7012_s6 + $0x18] sm:$0xff] }
 0x833   : > { %5114 = vrcp.f32 %v2579_v53  ;;  %v2598_v17 = vsel %vm1032_vm3, %v5113_v39, 0.0 }
 0x834   : > { %2596 = vadd.xlane.f32.xlu1 %v2595_v59  ;;  %2599 = vadd.xlane.f32.xlu0 %v2598_v17  ;;  %v4760_v17 = vld [vmem:[%s7012_s6 + $0x8] sm:$0xff] }
 0x839   : > { %v5115_v55 = vpop.eup %5114 }
 0x83a   : > { %v2609_v32 = vmul.f32 %v5115_v55, %v6241_v20  ;;  %v4759_v55 = vld [vmem:[%s7012_s6] sm:$0xff] }
 0x83c   : > { %4434 = vmatmul.msk.f32.vlgmr.msrb.gmra.mxu1 %vm1032_vm3, %v2609_v32 }
 0x848   : > { %4966 = vrot.lane.b32.xlu0 %v4965_v8, %s5230_s29 }
 0x84d   : > { %2799 = vrot.lane.b32.xlu1 %v5862_v63, %s5230_s29 }
 0x855   : > { %4951 = vrot.lane.b32.xlu1 %v7044_v21, %s5230_s29 }
 0x858   : > { %v2582_v14 = vpop.xlane.xlu0 %2581 }
 0x859   : > { %5116 = vrcp.f32 %v2582_v14 }
 0x85f   : > { %v5117_v0 = vpop.eup %5116 }
 0x860   : > { %v2610_v20 = vmul.f32 %v5117_v0, %v6248_v19 }
 0x861   : > { %v2591_v62 = vpop.xlane.xlu1 %2590 }
 0x862   : > { %4435 = vmatmul.msk.f32.vlgmr.msra.gmra.mxu2 %vm1032_vm3, %v2610_v20  ;;  %5118 = vrcp.f32 %v2591_v62 }
 0x868   : > { %v5119_v16 = vpop.eup %5118 }
 0x869   : > { %v2585_v26 = vpop.xlane.xlu2 %2584  ;;  %v2613_v1 = vmul.f32 %v5119_v16, %v6252_v27 }
 0x86a   : > { %5120 = vrcp.f32 %v2585_v26 }
 0x86b   : > { %v4932_v25 = vpop.permute.xlu0 %4931 }
 0x86c   : > { %v4934_v50 = vunpack.i.h.bf16 %v4932_v25  ;;  %v4933_v63 = vunpack.i.l.bf16 %v4932_v25 }
 0x86e   : > { %2742 = vmatpush.msra.mxu1 %v4934_v50  ;;  %2768 = vmatpush.msrb.mxu2 %v4933_v63 }
 0x86f   : > { %4438 = vmatmul.msk.f32.vlgmr.msra.gmra.mxu1 %vm1032_vm3, %v2613_v1 }
 0x870   : > { %v5121_v34 = vpop.eup %5120 }
 0x871   : > { %v2611_v60 = vmul.f32 %v5121_v34, %v6256_v6  ;;  %v2774_v19 = vpop.permute.xlu2 %2773 }
 0x872   : > { %2794 = vmatpush.msrb.mxu3 %v2774_v19 }
 0x873   : > { %4436 = vmatmul.msk.f32.vlgmr.msra.gmra.mxu3 %vm1032_vm3, %v2611_v60 }
 0x879   : > { %v4937_v14 = vpop.permute.xlu2 %4936 }
 0x87a   : > { %v4939_v26 = vunpack.i.h.bf16 %v4937_v14  ;;  %v4938_v16 = vunpack.i.l.bf16 %v4937_v14 }
 0x87c   : > { %v2922_v34 = vsel %vm871_vm2, %v5922_v12, %v4939_v26  ;;  %v2921_v36 = vsel %vm871_vm2, %v5920_v54, %v4938_v16 }
 0x881   : > { %v4942_v0 = vpop.permute.xlu2 %4941 }
 0x882   : > { %v4944_v50 = vunpack.i.h.bf16 %v4942_v0  ;;  %v4943_v63 = vunpack.i.l.bf16 %v4942_v0 }
 0x884   : > { %v2930_v60 = vsel %vm2929_vm4, %v2921_v36, %v4943_v63  ;;  %v2931_v19 = vsel %vm2929_vm4, %v2922_v34, %v4944_v50 }
 0x897   : > { %v2588_v35 = vpop.xlane.xlu1 %2587 }
 0x898   : > { %5122 = vrcp.f32 %v2588_v35 }
 0x89e   : > { %v5123_v2 = vpop.eup %5122 }
 0x89f   : > { %v2612_v18 = vmul.f32 %v5123_v2, %v5107_v41  ;;  %v2594_v45 = vpop.xlane.xlu1 %2593 }
 0x8a0   : > { %5124 = vrcp.f32 %v2594_v45 }
 0x8a1   : > { %4437 = vmatmul.msk.f32.vlgmr.msra.gmra.mxu0 %vm1032_vm3, %v2612_v18 }
 0x8a6   : > { %v5125_v27 = vpop.eup %5124 }
 0x8a7   : > { %v2614_v3 = vmul.f32 %v5125_v27, %v5109_v10  ;;  %v2597_v46 = vpop.xlane.xlu1 %2596  ;;  %v2600_v7 = vpop.xlane.xlu0 %2599  ;;  %v4955_v10 = vpack.i.bf16 %v6232_v58, %v6216_v51  ;;  %v4765_v51 = vld [vmem:[%s7012_s6 + $0x30] sm:$0xff] }
 0x8a8   : > { %5126 = vrcp.f32 %v2597_v46 }
 0x8a9   : > { %4439 = vmatmul.msk.f32.vlgmr.msrb.gmra.mxu2 %vm1032_vm3, %v2614_v3  ;;  %5128 = vrcp.f32 %v2600_v7 }
 0x8ae   : > { %v5127_v56 = vpop.eup %5126 }
 0x8af   : > { %v2615_v6 = vmul.f32 %v5127_v56, %v5111_v37  ;;  %v5129_v47 = vpop.eup %5128  ;;  %v4970_v37 = vpack.i.bf16 %v6218_v31, %v6212_v11  ;;  %v4764_v11 = vld [vmem:[%s7012_s6 + $0x28] sm:$0xff]  ;;  %v4761_v31 = vld [vmem:[%s7012_s6 + $0x10] sm:$0xff] }
 0x8b0   : > { %v2616_v52 = vmul.f32 %v5129_v47, %v5113_v39  ;;  %v4766_v39 = vld [vmem:[%s7012_s6 + $0x38] sm:$0xff] }
 0x8b1   : > { %4440 = vmatmul.msk.f32.vlgmr.msrb.gmra.mxu3 %vm1032_vm3, %v2615_v6  ;;  %3019 = vmatpush.bf16.msrb.mxu1 %v4766_v39 }
 0x8b5   : > { %3020 = vmatpush.bf16.msrb.mxu1 %v4765_v51 }
 0x8b9   : > { %v2640_v41 = vpop.f32.mrf.mxu1  ;;  %3021 = vmatpush.bf16.msrb.mxu1 %v4764_v11 }
 0x8bd   : > { %3022 = vmatpush.bf16.msrb.mxu1 %v4763_v44 }
 0x8bf   : > { %v2800_v29 = vpop.permute.xlu1 %2799 }
 0x8c0   : > { %2820 = vmatpush.msrb.mxu0 %v2800_v29 }
 0x8c1   : > { %4441 = vmatmul.msk.f32.vlgmr.msrb.gmra.mxu0 %vm1032_vm3, %v2616_v52  ;;  %3023 = vmatpush.bf16.msrb.mxu1 %v4762_v40 }
 0x8c5   : > { %3024 = vmatpush.bf16.msrb.mxu1 %v4761_v31 }
 0x8c7   : > { %v4952_v45 = vpop.permute.xlu1 %4951 }
 0x8c8   : > { %v4954_v3 = vunpack.i.h.bf16 %v4952_v45  ;;  %v4953_v46 = vunpack.i.l.bf16 %v4952_v45 }
 0x8c9   : > { %3025 = vmatpush.bf16.msrb.mxu1 %v4760_v17 }
 0x8ca   : > { %v2924_v54 = vsel %vm871_vm2, %v5926_v30, %v4954_v3  ;;  %v2923_v7 = vsel %vm871_vm2, %v5924_v28, %v4953_v46 }
 0x8cd   : > { %3026 = vmatpush.bf16.msrb.mxu1 %v4759_v55 }
 0x8e5   : > { %v2666_v13 = vpop.f32.mrf.mxu2 }
 0x8e6   : > { %v4945_v33 = vpack.i.bf16 %v2666_v13, %v2640_v41 }
 0x8e8   : > { %4946 = vrot.lane.b32.xlu2 %v4945_v33, %s5228_s17 }
 0x8ec   : > { %v2744_v32 = vpop.f32.mrf.mxu1 }
 0x8f0   : > { %4956 = vrot.lane.b32.xlu2 %v4955_v10, %s5229_s28 }
 0x8f6   : > { %v2692_v58 = vpop.f32.mrf.mxu3 }
 0x8f8   : > { %4971 = vrot.lane.b32.xlu2 %v4970_v37, %s5229_s28  ;;  %v4967_v37 = vpop.permute.xlu0 %4966 }
 0x8f9   : > { %v4969_v39 = vunpack.i.h.bf16 %v4967_v37  ;;  %v4968_v51 = vunpack.i.l.bf16 %v4967_v37 }
 0x8fb   : > { %v2926_v28 = vsel %vm871_vm2, %v5917_v15, %v4969_v39  ;;  %v2925_v40 = vsel %vm871_vm2, %v5914_v61, %v4968_v51 }
 0x900   : > { %4981 = vrot.lane.b32.xlu2 %v4980_v57, %s5230_s29  ;;  %s4831_s29 = sshll.u32 %s5340_s25, 6 }
 0x901   : > { %s4205_s30 = scalar_lea.hbm %s7022_s16, %s4831_s29  ;;  %s5184_s29 = scalar_lea.hbm %s7022_s16, 128 }
 0x902   : > { %s4208_s25 = sshll.u32 %s4205_s30, 4  ;;  %s4209_s25 = int_to_ptr.hbm [resolvable:$true] %s4208_s25 }
 0x91e   : > { %v2718_v53 = vpop.f32.mrf.mxu0 }
 0x91f   : > { %v4960_v59 = vpack.i.bf16 %v2718_v53, %v2692_v58 }
 0x921   : > { %4961 = vrot.lane.b32.xlu1 %v4960_v59, %s5228_s17 }
 0x92c   : > { %v2770_v8 = vpop.f32.mrf.mxu2 }
 0x92d   : > { %v4975_v21 = vpack.i.bf16 %v2770_v8, %v2744_v32 }
 0x92f   : > { %4976 = vrot.lane.b32.xlu1 %v4975_v21, %s5228_s17 }
 0x934   : > { %v2796_v20 = vpop.f32.mrf.mxu3 }
 0x937   : > { %4986 = vrot.lane.b32.xlu1 %v4985_v48, %s5229_s28 }
 0x93e   : > { %v2822_v62 = vpop.f32.mrf.mxu0 }
 0x93f   : > { %v4990_v25 = vpack.i.bf16 %v2822_v62, %v2796_v20 }
 0x941   : > { %4991 = vrot.lane.b32.xlu2 %v4990_v25, %s5228_s17  ;;  %s5178_s17 = sshra.s32 %s4209_s25, 4  ;;  %s5179_s17 = int_to_ptr.hbm [resolvable:$true] %s5178_s17 }
 0x942   : > { %v4947_v1 = vpop.permute.xlu2 %4946  ;;  %s5180_s28 = scalar_lea.hbm %s5179_s17, 64  ;;  %p5185_p0 = scmp.lt.s32.totalorder %s5179_s17, %s7022_s16 }
 0x943   : > { %v4949_v38 = vunpack.i.h.bf16 %v4947_v1  ;;  %v4948_v48 = vunpack.i.l.bf16 %v4947_v1  ;;  %p5181_p11 = scmp.ne.s32.totalorder %s5179_s17, %s5180_s28  ;;  %p5186_p1 = scmp.lt.s32.totalorder %s5184_s29, %s5180_s28 }
 0x945   : > { %v2939_v35 = vsel %vm2938_vm5, %v2930_v60, %v4948_v48  ;;  %v2940_v2 = vsel %vm2938_vm5, %v2931_v19, %v4949_v38  ;;  %v4996_v38 = vld [vmem:[%s7013_s7] ss:$0 sm:$0xff]  ;;  %p5182_p12 = pnand %p5181_p11, %p5357_p5  ;;  %p5187_p2 = por %p5186_p1, %p5185_p0 }
 0x946   : > { %v2947_v18 = vpack.c.bf16 %v2940_v2, %v2939_v35 }
 0x947   : > { %p5183_p13 = pneg %p5182_p12 }
 0x948   : > { %3027 = vmatmul.bf16.vlgmr.msrb.gmra.mxu1 %v2947_v18 }
 0x949   : > { %p5188_p3 = pnand %p5187_p2, %p5183_p13 }
 0x94a   : > { %v4957_v27 = vpop.permute.xlu2 %4956 }
 0x94b   : > { %v4959_v12 = vunpack.i.h.bf16 %v4957_v27  ;;  %v4958_v56 = vunpack.i.l.bf16 %v4957_v27 }
 0x94d   : > { %v2933_v29 = vsel %vm2929_vm4, %v2924_v54, %v4959_v12  ;;  %v2932_v41 = vsel %vm2929_vm4, %v2923_v7, %v4958_v56  ;;  %v5231_v12 = vmov 128.0  }
 0x94e   : > { %5130 = vrcp.f32 %v5231_v12  ;;  %v4556_v12 = vld [vmem:[%s7016_s10 + $0xa0] sm:$0xf] }
 0x952   : > { %v4972_v57 = vpop.permute.xlu2 %4971 }
 0x953   : > { %v4974_v30 = vunpack.i.h.bf16 %v4972_v57  ;;  %v4973_v11 = vunpack.i.l.bf16 %v4972_v57 }
 0x955   : > { %v2935_v53 = vsel %vm2929_vm4, %v2926_v28, %v4974_v30  ;;  %v2934_v59 = vsel %vm2929_vm4, %v2925_v40, %v4973_v11  ;;  %v7045_v28 = vld [vmem:[#allocation10_spill] sm:$0xff] }
 0x95a   : > { %v4982_v32 = vpop.permute.xlu2 %4981 }
 0x95b   : > { %v4984_v14 = vunpack.i.h.bf16 %v4982_v32  ;;  %v4983_v0 = vunpack.i.l.bf16 %v4982_v32 }
 0x95d   : > { %v2928_v61 = vsel %vm871_vm2, %v5930_v22, %v4984_v14  ;;  %v2927_v26 = vsel %vm871_vm2, %v5928_v9, %v4983_v0  ;;  %v4797_v14 = vld [vmem:[%s7016_s10 + $0xec] sm:$0xf0]  ;;  %v4795_v0 = vld [vmem:[%s7016_s10 + $0xe4] sm:$0xf] }
 0x993   : > { %v4962_v6 = vpop.permute.xlu1 %4961 }
 0x994   : > { %v4964_v47 = vunpack.i.h.bf16 %v4962_v6  ;;  %v4963_v52 = vunpack.i.l.bf16 %v4962_v6  ;;  %v5131_v6 = vpop.eup %5130 }
 0x995   : > { %vm3077_vm6 = vweird.f32 %v5131_v6 }
 0x996   : > { %v2941_v13 = vsel %vm2938_vm5, %v2932_v41, %v4963_v52  ;;  %v2942_v33 = vsel %vm2938_vm5, %v2933_v29, %v4964_v47 }
 0x997   : > { %v2948_v10 = vpack.c.bf16 %v2942_v33, %v2941_v13 }
 0x999   : > { %3032 = vmatmul.bf16.gmra.mxu1 %v2948_v10 }
 0x99b   : > { %v4992_v62 = vpop.permute.xlu2 %4991 }
 0x99c   : > { %v4994_v50 = vunpack.i.h.bf16 %v4992_v62  ;;  %v4993_v63 = vunpack.i.l.bf16 %v4992_v62  ;;  %v4590_v62 = vld [vmem:[%s7016_s10 + $0xf0] sm:$0xf0] }
 0x9a1   : > { %v4977_v44 = vpop.permute.xlu1 %4976 }
 0x9a2   : > { %v4979_v31 = vunpack.i.h.bf16 %v4977_v44  ;;  %v4978_v58 = vunpack.i.l.bf16 %v4977_v44 }
 0x9a4   : > { %v2943_v17 = vsel %vm2938_vm5, %v2934_v59, %v4978_v58  ;;  %v2944_v55 = vsel %vm2938_vm5, %v2935_v53, %v4979_v31 }
 0x9a5   : > { %v2949_v8 = vpack.c.bf16 %v2944_v55, %v2943_v17 }
 0x9a9   : > { %3037 = vmatmul.bf16.gmra.mxu1 %v2949_v8  ;;  %v4987_v21 = vpop.permute.xlu1 %4986 }
 0x9aa   : > { %v4989_v15 = vunpack.i.h.bf16 %v4987_v21  ;;  %v4988_v20 = vunpack.i.l.bf16 %v4987_v21  ;;  %v4588_v21 = vld [vmem:[%s7016_s10 + $0xe0] sm:$0xf] }
 0x9ac   : > { %v2937_v16 = vsel %vm2929_vm4, %v2928_v61, %v4989_v15  ;;  %v2936_v25 = vsel %vm2929_vm4, %v2927_v26, %v4988_v20  ;;  %v4589_v20 = vor.u32 %v4797_v14, %v4588_v21  ;;  %v4596_v61 = vld [vmem:[%s7016_s10 + $0xe8] sm:$0xf]  ;;  %v4798_v26 = vld [vmem:[%s7016_s10 + $0xf4] sm:$0xf0]  ;;  %v4781_v21 = vld [vmem:[%s7016_s10 + $0x6c] sm:$0xf0] }
 0x9ad   : > { %v2945_v1 = vsel %vm2938_vm5, %v2936_v25, %v4993_v63  ;;  %v2946_v34 = vsel %vm2938_vm5, %v2937_v16, %v4994_v50  ;;  %v4593_v25 = vor.u32 %v4795_v0, %v4590_v62  ;;  %v4597_v50 = vor.u32 %v4798_v26, %v4596_v61  ;;  %v4796_v63 = vld [vmem:[%s7016_s10 + $0xec] sm:$0xf]  ;;  %v4779_v14 = vld [vmem:[%s7016_s10 + $0x64] sm:$0xf]  ;;  %v4532_v62 = vld [vmem:[%s7016_s10 + $0x68] sm:$0xf] }
 0x9ae   : > { %v2950_v36 = vpack.c.bf16 %v2946_v34, %v2945_v1  ;;  %v4598_v1 = vld [vmem:[%s7016_s10 + $0xf8] sm:$0xf0]  ;;  %3453 = vmatpush.bf16.msra.mxu2 %v4589_v20  ;;  %v4526_v20 = vld [vmem:[%s7016_s10 + $0x70] sm:$0xf0]  ;;  %v4782_v61 = vld [vmem:[%s7016_s10 + $0x74] sm:$0xf0] }
 0x9af   : > { %v4601_v34 = vor.u32 %v4796_v63, %v4598_v1  ;;  %3482 = vmatpush.bf16.msra.mxu3 %v4593_v25  ;;  %3511 = vmatpush.bf16.msra.mxu0 %v4597_v50  ;;  %v4533_v25 = vor.u32 %v4782_v61, %v4532_v62  ;;  %v4780_v50 = vld [vmem:[%s7016_s10 + $0x6c] sm:$0xf]  ;;  %v4534_v63 = vld [vmem:[%s7016_s10 + $0x78] sm:$0xf0] }
 0x9b0   : > { %v4537_v1 = vor.u32 %v4780_v50, %v4534_v63 }
 0x9b1   : > { %3540 = vmatpush.bf16.msra.mxu1 %v4601_v34 }
 0x9b9   : > { %3042 = vmatmul.bf16.gmra.mxu1 %v2950_v36 }
 0x9c5   : > { %v3028_v22 = vpop.f32.mrf.mxu1 }
 0x9c6   : > { %v3029_v48 = vadd.f32 %v4996_v38, %v3028_v22  ;;  %v4793_v22 = vld [vmem:[%s7016_s10 + $0xcc] sm:$0xf0] }
 0x9c8   : > { %v3048_v9 = vadd.f32 %v3029_v48, %v5497_v4  ;;  %v4791_v48 = vld [vmem:[%s7016_s10 + $0xc4] sm:$0xf] }
 0x9ca   : > { %3056 = vadd.xlane.f32.xlu0 %v3048_v9 }
 0x9cd   : > { %v3030_v60 = vpop.f32.mrf.mxu1 }
 0x9ce   : > { %v3031_v19 = vadd.f32 %v4996_v38, %v3030_v60  ;;  %v4574_v60 = vld [vmem:[%s7016_s10 + $0xd0] sm:$0xf0] }
 0x9d0   : > { %v3049_v35 = vadd.f32 %v3031_v19, %v5500_v5  ;;  %v3073_v5 = vmul.f32 128.0, %v5131_v6  ;;  %v4580_v19 = vld [vmem:[%s7016_s10 + $0xc8] sm:$0xf] }
 0x9d2   : > { %3058 = vadd.xlane.f32.xlu1 %v3049_v35  ;;  %v3074_v52 = vsub.f32 1.0, %v3073_v5  ;;  %v4558_v5 = vld [vmem:[%s7016_s10 + $0xb0] sm:$0xf0] }
 0x9d4   : > { %v3075_v29 = vmul.f32 %v5131_v6, %v3074_v52 }
 0x9d6   : > { %v3076_v13 = vadd.f32 %v5131_v6, %v3075_v29 }
 0xa16   : > { %v3033_v2 = vpop.f32.mrf.mxu1 }
 0xa17   : > { %v3034_v18 = vadd.f32 %v4996_v38, %v3033_v2 }
 0xa19   : > { %v3050_v45 = vadd.f32 %v3034_v18, %v5531_v23  ;;  %v4577_v18 = vor.u32 %v4791_v48, %v4574_v60  ;;  %v4775_v48 = vld [vmem:[%s7016_s10 + $0x44] sm:$0xf]  ;;  %v4516_v60 = vld [vmem:[%s7016_s10 + $0x48] sm:$0xf] }
 0xa1b   : > { %3060 = vadd.xlane.f32.xlu2 %v3050_v45  ;;  %3483 = vmatpush.bf16.msra.mxu3 %v4577_v18 }
 0xa1e   : > { %v3035_v27 = vpop.f32.mrf.mxu1 }
 0xa1f   : > { %v3036_v3 = vadd.f32 %v4996_v38, %v3035_v27  ;;  %v4792_v27 = vld [vmem:[%s7016_s10 + $0xcc] sm:$0xf] }
 0xa21   : > { %v3051_v46 = vadd.f32 %v3036_v3, %v5534_v24  ;;  %v4582_v3 = vld [vmem:[%s7016_s10 + $0xd8] sm:$0xf0] }
 0xa23   : > { %3062 = vadd.xlane.f32.xlu0 %v3051_v46 }
 0xa26   : > { %v3038_v56 = vpop.f32.mrf.mxu1 }
 0xa27   : > { %v3039_v4 = vadd.f32 %v4996_v38, %v3038_v56  ;;  %v4789_v56 = vld [vmem:[%s7016_s10 + $0xac] sm:$0xf0] }
 0xa29   : > { %v3052_v54 = vadd.f32 %v3039_v4, %v5565_v42  ;;  %v6388_v42 = vsel %vm3077_vm6, %v5131_v6, %v3076_v13  ;;  %v4787_v4 = vld [vmem:[%s7016_s10 + $0xa4] sm:$0xf]  ;;  %v4566_v13 = vld [vmem:[%s7016_s10 + $0xb8] sm:$0xf0] }
 0xa2a   : > { %v4561_v29 = vor.u32 %v4787_v4, %v4558_v5  ;;  %v4774_v5 = vld [vmem:[%s7016_s10 + $0x34] sm:$0xf0] }
 0xa2b   : > { %3064 = vadd.xlane.f32.xlu1 %v3052_v54 }
 0xa2c   : > { %3484 = vmatpush.bf16.msra.mxu3 %v4561_v29  ;;  %v4772_v29 = vld [vmem:[%s7016_s10 + $0x2c] sm:$0xf] }
 0xa2e   : > { %v3040_v7 = vpop.f32.mrf.mxu1 }
 0xa2f   : > { %v3041_v47 = vadd.f32 %v4996_v38, %v3040_v7  ;;  %v4564_v7 = vld [vmem:[%s7016_s10 + $0xa8] sm:$0xf] }
 0xa31   : > { %v6381_v23 = vadd.f32 %v3041_v47, %v5568_v43  ;;  %v4790_v47 = vld [vmem:[%s7016_s10 + $0xb4] sm:$0xf0] }
 0xa33   : > { %3066 = vadd.xlane.f32.xlu2 %v6381_v23 }
 0xa36   : > { %v3043_v24 = vpop.f32.mrf.mxu1 }
 0xa37   : > { %v3044_v41 = vadd.f32 %v4996_v38, %v3043_v24  ;;  %v4565_v24 = vor.u32 %v4790_v47, %v4564_v7 }
 0xa39   : > { %v6385_v33 = vadd.f32 %v3044_v41, %v5575_v49  ;;  %v4788_v41 = vld [vmem:[%s7016_s10 + $0xac] sm:$0xf] }
 0xa3b   : > { %3068 = vadd.xlane.f32.xlu2 %v6385_v33 }
 0xa3d   : > { %v3057_v10 = vpop.xlane.xlu0 %3056 }
 0xa3e   : > { %v3079_v37 = vmul.f32 %v6388_v42, %v3057_v10  ;;  %v3045_v39 = vpop.f32.mrf.mxu1  ;;  %v4569_v10 = vor.u32 %v4788_v41, %v4566_v13 }
 0xa3f   : > { %v3046_v30 = vadd.f32 %v4996_v38, %v3045_v39  ;;  %v4572_v38 = vld [vmem:[%s7016_s10 + $0xc0] sm:$0xf]  ;;  %v4785_v39 = vld [vmem:[%s7016_s10 + $0x8c] sm:$0xf0] }
 0xa40   : > { %v6391_v57 = vsub.f32 %v3048_v9, %v3079_v37  ;;  %v4573_v9 = vor.u32 %v4793_v22, %v4572_v38  ;;  %v4508_v38 = vld [vmem:[%s7016_s10 + $0x40] sm:$0xf]  ;;  %v4777_v22 = vld [vmem:[%s7016_s10 + $0x4c] sm:$0xf0] }
 0xa41   : > { %v6401_v40 = vadd.f32 %v3046_v30, %v7045_v28 }
 0xa42   : > { %v3095_v43 = vmul.f32 %v6391_v57, %v6391_v57  ;;  %3454 = vmatpush.bf16.msra.mxu2 %v4573_v9  ;;  %v4509_v9 = vor.u32 %v4777_v22, %v4508_v38 }
 0xa44   : > { %3103 = vadd.xlane.f32.xlu0 %v3095_v43  ;;  %v4540_v43 = vld [vmem:[%s7016_s10 + $0x80] sm:$0xf] }
 0xa45   : > { %v3059_v51 = vpop.xlane.xlu1 %3058  ;;  %v4541_v30 = vor.u32 %v4785_v39, %v4540_v43  ;;  %v4769_v43 = vld [vmem:[%s7016_s10 + $0xc] sm:$0xf0]  ;;  %v4767_v39 = vld [vmem:[%s7016_s10 + $0x4] sm:$0xf] }
 0xa46   : > { %v3080_v11 = vmul.f32 %v6388_v42, %v3059_v51  ;;  %v4783_v51 = vld [vmem:[%s7016_s10 + $0x84] sm:$0xf] }
 0xa48   : > { %v6396_v49 = vsub.f32 %v3049_v35, %v3080_v11  ;;  %v4794_v35 = vld [vmem:[%s7016_s10 + $0xd4] sm:$0xf0]  ;;  %v4548_v11 = vld [vmem:[%s7016_s10 + $0x88] sm:$0xf] }
 0xa4a   : > { %v3096_v44 = vmul.f32 %v6396_v49, %v6396_v49 }
 0xa4c   : > { %3105 = vadd.xlane.f32.xlu1 %v3096_v44  ;;  %3070 = vadd.xlane.f32.xlu0 %v6401_v40  ;;  %v4786_v44 = vld [vmem:[%s7016_s10 + $0x94] sm:$0xf0] }
 0xa8e   : > { %v3061_v31 = vpop.xlane.xlu2 %3060 }
 0xa8f   : > { %v3081_v58 = vmul.f32 %v6388_v42, %v3061_v31 }
 0xa91   : > { %v6405_v53 = vsub.f32 %v3050_v45, %v3081_v58  ;;  %v4581_v45 = vor.u32 %v4794_v35, %v4580_v19  ;;  %v4549_v58 = vor.u32 %v4786_v44, %v4548_v11  ;;  %v4778_v19 = vld [vmem:[%s7016_s10 + $0x54] sm:$0xf0]  ;;  %v4484_v11 = vld [vmem:[%s7016_s10 + $0x8] sm:$0xf] }
 0xa92   : > { %v4517_v18 = vor.u32 %v4778_v19, %v4516_v60 }
 0xa93   : > { %v3097_v59 = vmul.f32 %v6405_v53, %v6405_v53  ;;  %3512 = vmatpush.bf16.msra.mxu0 %v4581_v45  ;;  %v4776_v45 = vld [vmem:[%s7016_s10 + $0x4c] sm:$0xf] }
 0xa95   : > { %3107 = vadd.xlane.f32.xlu1 %v3097_v59  ;;  %v4784_v59 = vld [vmem:[%s7016_s10 + $0x8c] sm:$0xf] }
 0xa96   : > { %v3063_v17 = vpop.xlane.xlu0 %3062 }
 0xa97   : > { %v3082_v55 = vmul.f32 %v6388_v42, %v3063_v17  ;;  %3513 = vmatpush.bf16.msra.mxu0 %v4565_v24  ;;  %v4550_v17 = vld [vmem:[%s7016_s10 + $0x98] sm:$0xf0] }
 0xa98   : > { %v4502_v24 = vld [vmem:[%s7016_s10 + $0x38] sm:$0xf0] }
 0xa99   : > { %v6410_v32 = vsub.f32 %v3051_v46, %v3082_v55  ;;  %v4585_v46 = vor.u32 %v4792_v27, %v4582_v3  ;;  %v4553_v55 = vor.u32 %v4784_v59, %v4550_v17  ;;  %v4518_v27 = vld [vmem:[%s7016_s10 + $0x58] sm:$0xf0]  ;;  %v4505_v13 = vor.u32 %v4772_v29, %v4502_v24 }
 0xa9a   : > { %v4521_v3 = vor.u32 %v4776_v45, %v4518_v27 }
 0xa9b   : > { %v3098_v8 = vmul.f32 %v6410_v32, %v6410_v32  ;;  %3541 = vmatpush.bf16.msra.mxu1 %v4585_v46  ;;  %3514 = vmatpush.bf16.msra.mxu0 %v4549_v58  ;;  %v4492_v46 = vld [vmem:[%s7016_s10 + $0x20] sm:$0xf]  ;;  %v4486_v58 = vld [vmem:[%s7016_s10 + $0x18] sm:$0xf0] }
 0xa9d   : > { %3109 = vadd.xlane.f32.xlu2 %v3098_v8  ;;  %v4524_v8 = vld [vmem:[%s7016_s10 + $0x60] sm:$0xf] }
 0xa9e   : > { %v3065_v15 = vpop.xlane.xlu1 %3064 }
 0xa9f   : > { %v3083_v16 = vmul.f32 %v6388_v42, %v3065_v15  ;;  %3542 = vmatpush.bf16.msra.mxu1 %v4569_v10  ;;  %v4525_v15 = vor.u32 %v4781_v21, %v4524_v8  ;;  %3515 = vmatpush.bf16.msra.mxu0 %v4533_v25  ;;  %v4476_v10 = vld [vmem:[%s7016_s10] sm:$0xf] }
 0xaa1   : > { %v6439_v36 = vsub.f32 %v3052_v54, %v3083_v16  ;;  %v4557_v54 = vor.u32 %v4789_v56, %v4556_v12  ;;  %v4529_v16 = vor.u32 %v4779_v14, %v4526_v20  ;;  %v4773_v12 = vld [vmem:[%s7016_s10 + $0x2c] sm:$0xf0]  ;;  %v4771_v56 = vld [vmem:[%s7016_s10 + $0x24] sm:$0xf] }
 0xaa2   : > { %v4493_v4 = vor.u32 %v4773_v12, %v4492_v46 }
 0xaa3   : > { %v3099_v2 = vmul.f32 %v6439_v36, %v6439_v36  ;;  %3455 = vmatpush.bf16.msra.mxu2 %v4557_v54  ;;  %3543 = vmatpush.bf16.msra.mxu1 %v4553_v55  ;;  %v4500_v54 = vld [vmem:[%s7016_s10 + $0x28] sm:$0xf] }
 0xaa4   : > { %3516 = vmatpush.bf16.msra.mxu0 %v4517_v18 }
 0xaa5   : > { %3111 = vadd.xlane.f32.xlu0 %v3099_v2 }
 0xaa6   : > { %v3067_v6 = vpop.xlane.xlu2 %3066 }
 0xaa7   : > { %v3084_v52 = vmul.f32 %v6388_v42, %v3067_v6  ;;  %3456 = vmatpush.bf16.msra.mxu2 %v4541_v30  ;;  %3544 = vmatpush.bf16.msra.mxu1 %v4537_v1  ;;  %v4494_v6 = vld [vmem:[%s7016_s10 + $0x30] sm:$0xf0]  ;;  %v4477_v30 = vor.u32 %v4769_v43, %v4476_v10 }
 0xaa8   : > { %v4497_v47 = vor.u32 %v4771_v56, %v4494_v6 }
 0xaa9   : > { %v6493_v37 = vsub.f32 %v6381_v23, %v3084_v52  ;;  %v4542_v23 = vld [vmem:[%s7016_s10 + $0x90] sm:$0xf0]  ;;  %v4501_v52 = vor.u32 %v4774_v5, %v4500_v54 }
 0xaaa   : > { %v4545_v31 = vor.u32 %v4783_v51, %v4542_v23  ;;  %v4478_v23 = vld [vmem:[%s7016_s10 + $0x10] sm:$0xf0] }
 0xaab   : > { %v3100_v28 = vmul.f32 %v6493_v37, %v6493_v37  ;;  %3457 = vmatpush.bf16.msra.mxu2 %v4525_v15  ;;  %3545 = vmatpush.bf16.msra.mxu1 %v4521_v3  ;;  %v4481_v44 = vor.u32 %v4767_v39, %v4478_v23 }
 0xaac   : > { %3485 = vmatpush.bf16.msra.mxu3 %v4545_v31  ;;  %3517 = vmatpush.bf16.msra.mxu0 %v4501_v52  ;;  %v4768_v31 = vld [vmem:[%s7016_s10 + $0xc] sm:$0xf] }
 0xaad   : > { %3113 = vadd.xlane.f32.xlu1 %v3100_v28  ;;  %v4770_v28 = vld [vmem:[%s7016_s10 + $0x14] sm:$0xf0]  ;;  %v4489_v17 = vor.u32 %v4768_v31, %v4486_v58 }
 0xaae   : > { %v3069_v0 = vpop.xlane.xlu2 %3068  ;;  %v4485_v59 = vor.u32 %v4770_v28, %v4484_v11 }
 0xaaf   : > { %v3085_v26 = vmul.f32 %v6388_v42, %v3069_v0  ;;  %3458 = vmatpush.bf16.msra.mxu2 %v4509_v9  ;;  %3546 = vmatpush.bf16.msra.mxu1 %v4505_v13  ;;  %v6634_v9 = vld [vmem:[%s7014_s8] ss:$0 sm:$0xff] }
 0xab0   : > { %3486 = vmatpush.bf16.msra.mxu3 %v4529_v16  ;;  %3518 = vmatpush.bf16.msra.mxu0 %v4485_v59 }
 0xab1   : > { %v6547_v34 = vsub.f32 %v6385_v33, %v3085_v26  ;;  %v4510_v33 = vld [vmem:[%s7016_s10 + $0x50] sm:$0xf0] }
 0xab2   : > { %v4513_v2 = vor.u32 %v4775_v48, %v4510_v33 }
 0xab3   : > { %v3101_v35 = vmul.f32 %v6547_v34, %v6547_v34  ;;  %3459 = vmatpush.bf16.msra.mxu2 %v4493_v4  ;;  %3547 = vmatpush.bf16.msra.mxu1 %v4489_v17 }
 0xab4   : > { %3487 = vmatpush.bf16.msra.mxu3 %v4513_v2 }
 0xab5   : > { %3115 = vadd.xlane.f32.xlu2 %v3101_v35  ;;  %v6640_v35 = vld [vmem:[%s7015_s9] ss:$0 sm:$0xff] }
 0xab7   : > { %v3104_v7 = vpop.xlane.xlu0 %3103  ;;  %3460 = vmatpush.bf16.msra.mxu2 %v4477_v30 }
 0xab8   : > { %v3119_v41 = vmul.f32 %v3104_v7, %v6388_v42  ;;  %3488 = vmatpush.bf16.msra.mxu3 %v4497_v47 }
 0xaba   : > { %v3127_v51 = vadd.f32 1e-05, %v3119_v41 }
 0xabc   : > { %5132 = vrsqrt.f32 %v3127_v51  ;;  %3489 = vmatpush.bf16.msra.mxu3 %v4481_v44  ;;  %vm3141_vm8 = vweird.f32 %v3127_v51 }
 0xabf   : > { %v3106_v55 = vpop.xlane.xlu1 %3105  ;;  %v3071_v8 = vpop.xlane.xlu0 %3070 }
 0xac0   : > { %v3120_v21 = vmul.f32 %v3106_v55, %v6388_v42  ;;  %v3086_v14 = vmul.f32 %v6388_v42, %v3071_v8 }
 0xac2   : > { %v5133_v0 = vpop.eup %5132  ;;  %v3128_v15 = vadd.f32 1e-05, %v3120_v21  ;;  %v6627_v20 = vsub.f32 %v6401_v40, %v3086_v14 }
 0xac3   : > { %v3136_v62 = vmul.f32 %v5133_v0, %v3127_v51  ;;  %vm3142_vm7 = vweird.f32 %v5133_v0 }
 0xac4   : > { %5134 = vrsqrt.f32 %v3128_v15  ;;  %v3102_v61 = vmul.f32 %v6627_v20, %v6627_v20  ;;  %vm3143_vm9 = vmor %vm3141_vm8, %vm3142_vm7  ;;  %vm3151_vm11 = vweird.f32 %v3128_v15 }
 0xac5   : > { %v3137_v26 = vmul.f32 %v5133_v0, %v3136_v62 }
 0xac6   : > { %3117 = vadd.xlane.f32.xlu0 %v3102_v61 }
 0xac7   : > { %v3138_v16 = vmul.f32 0.5, %v3137_v26 }
 0xac9   : > { %v3139_v25 = vsub.f32 1.5, %v3138_v16  ;;  %v4830_v16 = vld [vmem:[%s7018_s12 + $0xf8] sm:$0xff] }
 0xaca   : > { %v5135_v50 = vpop.eup %5134  ;;  %3964 = vmatpush.bf16.msrb.mxu1 %v4830_v16  ;;  %v4815_v16 = vld [vmem:[%s7018_s12 + $0x80] sm:$0xff] }
 0xacb   : > { %v3140_v63 = vmul.f32 %v5133_v0, %v3139_v25  ;;  %v3146_v1 = vmul.f32 %v5135_v50, %v3128_v15  ;;  %vm3152_vm10 = vweird.f32 %v5135_v50 }
 0xacc   : > { %vm3153_vm12 = vmor %vm3151_vm11, %vm3152_vm10 }
 0xacd   : > { %v3147_v38 = vmul.f32 %v5135_v50, %v3146_v1  ;;  %v3144_v22 = vsel %vm3143_vm9, %v5133_v0, %v3140_v63 }
 0xace   : > { %v3215_v33 = vmul.f32 %v3144_v22, %v6391_v57 }
 0xacf   : > { %v3148_v48 = vmul.f32 0.5, %v3147_v38 }
 0xad0   : > { %v3227_v2 = vmul.f32 %v6634_v9, %v3215_v33  ;;  %v4829_v33 = vld [vmem:[%s7018_s12 + $0xf0] sm:$0xff] }
 0xad1   : > { %v3149_v40 = vsub.f32 1.5, %v3148_v48  ;;  %3965 = vmatpush.bf16.msrb.mxu1 %v4829_v33 }
 0xad2   : > { %v6646_v27 = vadd.f32 %v6640_v35, %v3227_v2 }
 0xad3   : > { %v3150_v60 = vmul.f32 %v5135_v50, %v3149_v40  ;;  %v4821_v40 = vld [vmem:[%s7018_s12 + $0xb0] sm:$0xff] }
 0xad5   : > { %v3154_v19 = vsel %vm3153_vm12, %v5135_v50, %v3150_v60  ;;  %v4799_v60 = vld [vmem:[%s7018_s12] sm:$0xff] }
 0xad6   : > { %v3216_v18 = vmul.f32 %v3154_v19, %v6396_v49 }
 0xad8   : > { %v3228_v45 = vmul.f32 %v6634_v9, %v3216_v18  ;;  %v4806_v18 = vld [vmem:[%s7018_s12 + $0x38] sm:$0xff] }
 0xad9   : > { %3877 = vmatpush.bf16.msrb.mxu2 %v4806_v18 }
 0xada   : > { %v6649_v57 = vadd.f32 %v6640_v35, %v3228_v45  ;;  %v4814_v45 = vld [vmem:[%s7018_s12 + $0x78] sm:$0xff] }
 0xadb   : > { %3906 = vmatpush.bf16.msrb.mxu3 %v4814_v45 }
 0xadc   : > { %v3247_v3 = vpack.c.bf16 %v6649_v57, %v6646_v27 }
 0xade   : > { %3461 = vmatmul.bf16.vlgmr.msra.gmra.mxu2 %v3247_v3  ;;  %3490 = vmatmul.bf16.vlgmr.msra.gmra.mxu3 %v3247_v3 }
 0xadf   : > { %3519 = vmatmul.bf16.vlgmr.msra.gmra.mxu0 %v3247_v3  ;;  %3548 = vmatmul.bf16.vlgmr.msra.gmra.mxu1 %v3247_v3  ;;  %v4820_v3 = vld [vmem:[%s7018_s12 + $0xa8] sm:$0xff] }
 0xb08   : > { %v3108_v46 = vpop.xlane.xlu1 %3107 }
 0xb09   : > { %v3121_v12 = vmul.f32 %v3108_v46, %v6388_v42  ;;  %v4828_v46 = vld [vmem:[%s7018_s12 + $0xe8] sm:$0xff] }
 0xb0a   : > { %3966 = vmatpush.bf16.msrb.mxu1 %v4828_v46 }
 0xb0b   : > { %v3129_v56 = vadd.f32 1e-05, %v3121_v12 }
 0xb0d   : > { %5136 = vrsqrt.f32 %v3129_v56  ;;  %vm3161_vm14 = vweird.f32 %v3129_v56 }
 0xb10   : > { %v3110_v49 = vpop.xlane.xlu2 %3109 }
 0xb11   : > { %v3122_v4 = vmul.f32 %v3110_v49, %v6388_v42  ;;  %v4813_v49 = vld [vmem:[%s7018_s12 + $0x70] sm:$0xff] }
 0xb12   : > { %3907 = vmatpush.bf16.msrb.mxu3 %v4813_v49 }
 0xb13   : > { %v5137_v6 = vpop.eup %5136  ;;  %v3130_v54 = vadd.f32 1e-05, %v3122_v4 }
 0xb14   : > { %v3156_v5 = vmul.f32 %v5137_v6, %v3129_v56  ;;  %vm3162_vm13 = vweird.f32 %v5137_v6  ;;  %v4805_v56 = vld [vmem:[%s7018_s12 + $0x30] sm:$0xff] }
 0xb15   : > { %5138 = vrsqrt.f32 %v3130_v54  ;;  %vm3163_vm15 = vmor %vm3161_vm14, %vm3162_vm13  ;;  %vm3171_vm1 = vweird.f32 %v3130_v54  ;;  %3878 = vmatpush.bf16.msrb.mxu2 %v4805_v56 }
 0xb16   : > { %v3157_v7 = vmul.f32 %v5137_v6, %v3156_v5 }
 0xb18   : > { %v3158_v47 = vmul.f32 0.5, %v3157_v7  ;;  %v3112_v52 = vpop.xlane.xlu0 %3111  ;;  %v4819_v7 = vld [vmem:[%s7018_s12 + $0xa0] sm:$0xff] }
 0xb19   : > { %v3123_v29 = vmul.f32 %v3112_v52, %v6388_v42 }
 0xb1a   : > { %v3159_v24 = vsub.f32 1.5, %v3158_v47  ;;  %v4827_v47 = vld [vmem:[%s7018_s12 + $0xe0] sm:$0xff] }
 0xb1b   : > { %v5139_v41 = vpop.eup %5138  ;;  %v3131_v13 = vadd.f32 1e-05, %v3123_v29  ;;  %3967 = vmatpush.bf16.msrb.mxu1 %v4827_v47 }
 0xb1c   : > { %v3160_v10 = vmul.f32 %v5137_v6, %v3159_v24  ;;  %v3166_v43 = vmul.f32 %v5139_v41, %v3130_v54  ;;  %vm3172_vm0 = vweird.f32 %v5139_v41  ;;  %v4804_v24 = vld [vmem:[%s7018_s12 + $0x28] sm:$0xff] }
 0xb1d   : > { %5140 = vrsqrt.f32 %v3131_v13  ;;  %vm3173_vm2 = vmor %vm3171_vm1, %vm3172_vm0  ;;  %vm3181_vm4 = vweird.f32 %v3131_v13  ;;  %3879 = vmatpush.bf16.msrb.mxu2 %v4804_v24 }
 0xb1e   : > { %v3167_v39 = vmul.f32 %v5139_v41, %v3166_v43  ;;  %v3164_v51 = vsel %vm3163_vm15, %v5137_v6, %v3160_v10 }
 0xb1f   : > { %v3217_v31 = vmul.f32 %v3164_v51, %v6405_v53  ;;  %v4822_v53 = vld [vmem:[%s7018_s12 + $0xb8] sm:$0xff] }
 0xb20   : > { %v3168_v30 = vmul.f32 0.5, %v3167_v39  ;;  %v3114_v23 = vpop.xlane.xlu1 %3113  ;;  %3935 = vmatpush.bf16.msrb.mxu0 %v4822_v53  ;;  %v4826_v51 = vld [vmem:[%s7018_s12 + $0xd8] sm:$0xff] }
 0xb21   : > { %v3124_v11 = vmul.f32 %v3114_v23, %v6388_v42  ;;  %v3229_v14 = vmul.f32 %v6634_v9, %v3217_v31  ;;  %3968 = vmatpush.bf16.msrb.mxu1 %v4826_v51 }
 0xb22   : > { %v3169_v44 = vsub.f32 1.5, %v3168_v30 }
 0xb23   : > { %v5141_v28 = vpop.eup %5140  ;;  %v3132_v58 = vadd.f32 1e-05, %v3124_v11 }
 0xb24   : > { %v3170_v59 = vmul.f32 %v5139_v41, %v3169_v44  ;;  %v3176_v17 = vmul.f32 %v5141_v28, %v3131_v13  ;;  %vm3182_vm3 = vweird.f32 %v5141_v28  ;;  %3936 = vmatpush.bf16.msrb.mxu0 %v4821_v40  ;;  %v4803_v44 = vld [vmem:[%s7018_s12 + $0x20] sm:$0xff] }
 0xb25   : > { %5142 = vrsqrt.f32 %v3132_v58  ;;  %vm6685_vm5 = vmor %vm3181_vm4, %vm3182_vm3  ;;  %vm3191_vm7 = vweird.f32 %v3132_v58  ;;  %3880 = vmatpush.bf16.msrb.mxu2 %v4803_v44 }
 0xb26   : > { %v3174_v55 = vsel %vm3173_vm2, %v5139_v41, %v3170_v59  ;;  %v3177_v8 = vmul.f32 %v5141_v28, %v3176_v17  ;;  %v4812_v41 = vld [vmem:[%s7018_s12 + $0x68] sm:$0xff]  ;;  %v4817_v59 = vld [vmem:[%s7018_s12 + $0x90] sm:$0xff] }
 0xb27   : > { %v3218_v21 = vmul.f32 %v3174_v55, %v6410_v32  ;;  %v6671_v32 = vadd.f32 %v6640_v35, %v3229_v14  ;;  %3908 = vmatpush.bf16.msrb.mxu3 %v4812_v41  ;;  %v4825_v17 = vld [vmem:[%s7018_s12 + $0xd0] sm:$0xff]  ;;  %v4802_v55 = vld [vmem:[%s7018_s12 + $0x18] sm:$0xff]  ;;  %v4816_v14 = vld [vmem:[%s7018_s12 + $0x88] sm:$0xff] }
 0xb28   : > { %v3178_v0 = vmul.f32 0.5, %v3177_v8  ;;  %v3116_v15 = vpop.xlane.xlu2 %3115  ;;  %3937 = vmatpush.bf16.msrb.mxu0 %v4820_v3  ;;  %v4810_v8 = vld [vmem:[%s7018_s12 + $0x58] sm:$0xff]  ;;  %3969 = vmatpush.bf16.msrb.mxu1 %v4825_v17 }
 0xb29   : > { %v3125_v62 = vmul.f32 %v3116_v15, %v6388_v42  ;;  %v3230_v61 = vmul.f32 %v6634_v9, %v3218_v21  ;;  %3881 = vmatpush.bf16.msrb.mxu2 %v4802_v55 }
 0xb2a   : > { %v3179_v26 = vsub.f32 1.5, %v3178_v0  ;;  %v4824_v0 = vld [vmem:[%s7018_s12 + $0xc8] sm:$0xff] }
 0xb2b   : > { %v5143_v25 = vpop.eup %5142  ;;  %v6668_v50 = vadd.f32 1e-05, %v3125_v62  ;;  %v6674_v63 = vadd.f32 %v6640_v35, %v3230_v61  ;;  %v4801_v62 = vld [vmem:[%s7018_s12 + $0x10] sm:$0xff] }
 0xb2c   : > { %v3180_v1 = vmul.f32 %v5141_v28, %v3179_v26  ;;  %v3186_v38 = vmul.f32 %v5143_v25, %v3132_v58  ;;  %vm3192_vm6 = vweird.f32 %v5143_v25  ;;  %3938 = vmatpush.bf16.msrb.mxu0 %v4819_v7  ;;  %v4809_v61 = vld [vmem:[%s7018_s12 + $0x50] sm:$0xff]  ;;  %3970 = vmatpush.bf16.msrb.mxu1 %v4824_v0 }
 0xb2d   : > { %5144 = vrsqrt.f32 %v6668_v50  ;;  %v3248_v22 = vpack.c.bf16 %v6674_v63, %v6671_v32  ;;  %vm3193_vm8 = vmor %vm3191_vm7, %vm3192_vm6  ;;  %3882 = vmatpush.bf16.msrb.mxu2 %v4801_v62  ;;  %vm3201_vm10 = vweird.f32 %v6668_v50 }
 0xb2e   : > { %v3187_v48 = vmul.f32 %v5143_v25, %v3186_v38  ;;  %v3184_v19 = vsel %vm6685_vm5, %v5141_v28, %v3180_v1  ;;  %v4811_v28 = vld [vmem:[%s7018_s12 + $0x60] sm:$0xff]  ;;  %v4800_v38 = vld [vmem:[%s7018_s12 + $0x8] sm:$0xff] }
 0xb2f   : > { %3466 = vmatmul.bf16.gmra.mxu2 %v3248_v22  ;;  %3495 = vmatmul.bf16.gmra.mxu3 %v3248_v22  ;;  %v3219_v6 = vmul.f32 %v3184_v19, %v6439_v36  ;;  %v4807_v19 = vld [vmem:[%s7018_s12 + $0x40] sm:$0xff] }
 0xb30   : > { %v3188_v2 = vmul.f32 0.5, %v3187_v48  ;;  %3524 = vmatmul.bf16.gmra.mxu0 %v3248_v22  ;;  %3553 = vmatmul.bf16.gmra.mxu1 %v3248_v22  ;;  %v4808_v22 = vld [vmem:[%s7018_s12 + $0x48] sm:$0xff] }
 0xb31   : > { %v3231_v29 = vmul.f32 %v6634_v9, %v3219_v6  ;;  %3909 = vmatpush.bf16.msrb.mxu3 %v4811_v28  ;;  %3883 = vmatpush.bf16.msrb.mxu2 %v4800_v38 }
 0xb32   : > { %v3189_v12 = vsub.f32 1.5, %v3188_v2 }
 0xb33   : > { %v6709_v4 = vpop.eup %5144  ;;  %v6738_v30 = vadd.f32 %v6640_v35, %v3231_v29 }
 0xb34   : > { %v3190_v54 = vmul.f32 %v5143_v25, %v3189_v12  ;;  %v3196_v5 = vmul.f32 %v6709_v4, %v6668_v50  ;;  %vm3202_vm9 = vweird.f32 %v6709_v4 }
 0xb35   : > { %3910 = vmatpush.bf16.msrb.mxu3 %v4810_v8  ;;  %vm3203_vm11 = vmor %vm3201_vm10, %vm3202_vm9  ;;  %3884 = vmatpush.bf16.msrb.mxu2 %v4799_v60 }
 0xb36   : > { %v3194_v52 = vsel %vm3193_vm8, %v5143_v25, %v3190_v54  ;;  %v3197_v13 = vmul.f32 %v6709_v4, %v3196_v5  ;;  %v4823_v25 = vld [vmem:[%s7018_s12 + $0xc0] sm:$0xff] }
 0xb37   : > { %v3220_v36 = vmul.f32 %v3194_v52, %v6493_v37  ;;  %v4818_v37 = vld [vmem:[%s7018_s12 + $0x98] sm:$0xff]  ;;  %3971 = vmatpush.bf16.msrb.mxu1 %v4823_v25 }
 0xb38   : > { %v3198_v31 = vmul.f32 0.5, %v3197_v13  ;;  %3939 = vmatpush.bf16.msrb.mxu0 %v4818_v37 }
 0xb39   : > { %v3118_v10 = vpop.xlane.xlu0 %3117  ;;  %v3232_v43 = vmul.f32 %v6634_v9, %v3220_v36  ;;  %3911 = vmatpush.bf16.msrb.mxu3 %v4809_v61 }
 0xb3a   : > { %v3126_v39 = vmul.f32 %v3118_v10, %v6388_v42  ;;  %v3199_v21 = vsub.f32 1.5, %v3198_v31 }
 0xb3b   : > { %v6741_v23 = vadd.f32 %v6640_v35, %v3232_v43 }
 0xb3c   : > { %v3134_v11 = vadd.f32 1e-05, %v3126_v39  ;;  %3940 = vmatpush.bf16.msrb.mxu0 %v4817_v59  ;;  %v3200_v26 = vmul.f32 %v6709_v4, %v3199_v21 }
 0xb3d   : > { %v3249_v58 = vpack.c.bf16 %v6741_v23, %v6738_v30  ;;  %3912 = vmatpush.bf16.msrb.mxu3 %v4808_v22 }
 0xb3e   : > { %5146 = vrsqrt.f32 %v3134_v11  ;;  %v3204_v48 = vsel %vm3203_vm11, %v6709_v4, %v3200_v26  ;;  %vm3211_vm13 = vweird.f32 %v3134_v11 }
 0xb3f   : > { %3471 = vmatmul.bf16.gmra.mxu2 %v3249_v58  ;;  %3500 = vmatmul.bf16.gmra.mxu3 %v3249_v58  ;;  %v3221_v50 = vmul.f32 %v3204_v48, %v6547_v34 }
 0xb40   : > { %3529 = vmatmul.bf16.gmra.mxu0 %v3249_v58  ;;  %3558 = vmatmul.bf16.gmra.mxu1 %v3249_v58 }
 0xb41   : > { %3941 = vmatpush.bf16.msrb.mxu0 %v4816_v14  ;;  %3913 = vmatpush.bf16.msrb.mxu3 %v4807_v19  ;;  %v3233_v3 = vmul.f32 %v6634_v9, %v3221_v50 }
 0xb43   : > { %v6802_v46 = vadd.f32 %v6640_v35, %v3233_v3 }
 0xb44   : > { %v5147_v15 = vpop.eup %5146 }
 0xb45   : > { %v3206_v53 = vmul.f32 %v5147_v15, %v3134_v11  ;;  %3942 = vmatpush.bf16.msrb.mxu0 %v4815_v16  ;;  %vm3212_vm12 = vweird.f32 %v5147_v15 }
 0xb46   : > { %vm3213_vm14 = vmor %vm3211_vm13, %vm3212_vm12 }
 0xb47   : > { %v3207_v1 = vmul.f32 %v5147_v15, %v3206_v53 }
 0xb49   : > { %v3208_v40 = vmul.f32 0.5, %v3207_v1 }
 0xb4b   : > { %v3209_v33 = vsub.f32 1.5, %v3208_v40 }
 0xb4d   : > { %v3210_v2 = vmul.f32 %v5147_v15, %v3209_v33 }
 0xb4f   : > { %v3214_v18 = vsel %vm3213_vm14, %v5147_v15, %v3210_v2 }
 0xb50   : > { %v3222_v45 = vmul.f32 %v3214_v18, %v6627_v20  ;;  %v3283_v20 = vld [vmem:[%s7017_s11] sm:$0xf] }
 0xb51   : > { %v6814_v6 = vperm.slane %v3283_v20, 3  ;;  %v6818_v47 = vperm.slane %v3283_v20, 0  ;;  %v6820_v52 = vperm.slane %v3283_v20, 1 }
 0xb52   : > { %v3234_v34 = vmul.f32 %v6634_v9, %v3222_v45  ;;  %v6812_v9 = vperm.slane %v3283_v20, 2 }
 0xb54   : > { %v6805_v12 = vadd.f32 %v6640_v35, %v3234_v34 }
 0xb56   : > { %v3250_v56 = vpack.c.bf16 %v6805_v12, %v6802_v46 }
 0xb58   : > { %3476 = vmatmul.bf16.gmra.mxu2 %v3250_v56  ;;  %3505 = vmatmul.bf16.gmra.mxu3 %v3250_v56 }
 0xb59   : > { %3534 = vmatmul.bf16.gmra.mxu0 %v3250_v56  ;;  %3563 = vmatmul.bf16.gmra.mxu1 %v3250_v56 }
 0xb5c   : > { %v3520_v49 = vpop.f32.mrf.mxu0  ;;  %v3549_v4 = vpop.f32.mrf.mxu1 }
 0xb5d   : > { %v3521_v5 = vadd.f32 %v3520_v49, %v6812_v9  ;;  %v3550_v7 = vadd.f32 %v3549_v4, %v6814_v6 }
 0xb5f   : > { %v3571_v13 = vmax.f32 %v3521_v5, 0.0  ;;  %v3572_v10 = vmax.f32 %v3550_v7, 0.0 }
 0xb61   : > { %v3462_v54 = vpop.f32.mrf.mxu2  ;;  %v3491_v35 = vpop.f32.mrf.mxu3 }
 0xb62   : > { %v3463_v37 = vadd.f32 %v3462_v54, %v6818_v47  ;;  %v3492_v51 = vadd.f32 %v3491_v35, %v6820_v52 }
 0xb64   : > { %v3522_v36 = vpop.f32.mrf.mxu0  ;;  %v3551_v29 = vpop.f32.mrf.mxu1  ;;  %v3569_v17 = vmax.f32 %v3463_v37, 0.0  ;;  %v3570_v55 = vmax.f32 %v3492_v51, 0.0 }
 0xb65   : > { %v3523_v24 = vadd.f32 %v3522_v36, %v6812_v9  ;;  %v3552_v41 = vadd.f32 %v3551_v29, %v6814_v6 }
 0xb67   : > { %v3575_v43 = vmax.f32 %v3523_v24, 0.0  ;;  %v3576_v39 = vmax.f32 %v3552_v41, 0.0 }
 0xb69   : > { %v3603_v11 = vpack.c.bf16 %v3575_v43, %v3571_v13  ;;  %v3604_v44 = vpack.c.bf16 %v3576_v39, %v3572_v10  ;;  %v3464_v28 = vpop.f32.mrf.mxu2  ;;  %v3493_v31 = vpop.f32.mrf.mxu3 }
 0xb6a   : > { %v3465_v58 = vadd.f32 %v3464_v28, %v6818_v47  ;;  %v3494_v59 = vadd.f32 %v3493_v31, %v6820_v52 }
 0xb6b   : > { %3943 = vmatmul.bf16.vlgmr.msrb.gmra.mxu0 %v3603_v11  ;;  %3972 = vmatmul.bf16.vlgmr.msrb.gmra.mxu1 %v3604_v44 }
 0xb6c   : > { %v3573_v8 = vmax.f32 %v3465_v58, 0.0  ;;  %v3574_v21 = vmax.f32 %v3494_v59, 0.0 }
 0xb6e   : > { %v3601_v14 = vpack.c.bf16 %v3573_v8, %v3569_v17  ;;  %v3602_v0 = vpack.c.bf16 %v3574_v21, %v3570_v55 }
 0xb70   : > { %3885 = vmatmul.bf16.vlgmr.msrb.gmra.mxu2 %v3601_v14  ;;  %3914 = vmatmul.bf16.vlgmr.msrb.gmra.mxu3 %v3602_v0 }
 0xbad   : > { %v3525_v15 = vpop.f32.mrf.mxu0  ;;  %v3554_v62 = vpop.f32.mrf.mxu1 }
 0xbae   : > { %v3526_v53 = vadd.f32 %v3525_v15, %v6812_v9  ;;  %v3555_v16 = vadd.f32 %v3554_v62, %v6814_v6 }
 0xbb0   : > { %v3579_v48 = vmax.f32 %v3526_v53, 0.0  ;;  %v3580_v40 = vmax.f32 %v3555_v16, 0.0 }
 0xbb2   : > { %v3467_v61 = vpop.f32.mrf.mxu2  ;;  %v3496_v26 = vpop.f32.mrf.mxu3 }
 0xbb3   : > { %v3468_v60 = vadd.f32 %v3467_v61, %v6818_v47  ;;  %v3497_v19 = vadd.f32 %v3496_v26, %v6820_v52 }
 0xbb5   : > { %v3527_v25 = vpop.f32.mrf.mxu0  ;;  %v3556_v1 = vpop.f32.mrf.mxu1  ;;  %v3577_v20 = vmax.f32 %v3468_v60, 0.0  ;;  %v3578_v49 = vmax.f32 %v3497_v19, 0.0 }
 0xbb6   : > { %v3528_v38 = vadd.f32 %v3527_v25, %v6812_v9  ;;  %v3557_v22 = vadd.f32 %v3556_v1, %v6814_v6 }
 0xbb8   : > { %v3583_v33 = vmax.f32 %v3528_v38, 0.0  ;;  %v3584_v50 = vmax.f32 %v3557_v22, 0.0 }
 0xbba   : > { %v3607_v2 = vpack.c.bf16 %v3583_v33, %v3579_v48  ;;  %v3608_v18 = vpack.c.bf16 %v3584_v50, %v3580_v40  ;;  %v3469_v45 = vpop.f32.mrf.mxu2  ;;  %v3498_v3 = vpop.f32.mrf.mxu3 }
 0xbbb   : > { %v3470_v34 = vadd.f32 %v3469_v45, %v6818_v47  ;;  %v3499_v56 = vadd.f32 %v3498_v3, %v6820_v52 }
 0xbbc   : > { %3948 = vmatmul.bf16.gmra.mxu0 %v3607_v2  ;;  %3977 = vmatmul.bf16.gmra.mxu1 %v3608_v18 }
 0xbbd   : > { %v3581_v4 = vmax.f32 %v3470_v34, 0.0  ;;  %v3582_v54 = vmax.f32 %v3499_v56, 0.0  ;;  %v3530_v35 = vpop.f32.mrf.mxu0  ;;  %v3559_v5 = vpop.f32.mrf.mxu1 }
 0xbbe   : > { %v3531_v41 = vadd.f32 %v3530_v35, %v6812_v9  ;;  %v3560_v13 = vadd.f32 %v3559_v5, %v6814_v6 }
 0xbbf   : > { %v3605_v7 = vpack.c.bf16 %v3581_v4, %v3577_v20  ;;  %v3606_v36 = vpack.c.bf16 %v3582_v54, %v3578_v49 }
 0xbc0   : > { %v3587_v51 = vmax.f32 %v3531_v41, 0.0  ;;  %v3588_v11 = vmax.f32 %v3560_v13, 0.0 }
 0xbc1   : > { %3890 = vmatmul.bf16.gmra.mxu2 %v3605_v7  ;;  %3919 = vmatmul.bf16.gmra.mxu3 %v3606_v36 }
 0xbc2   : > { %v3472_v29 = vpop.f32.mrf.mxu2  ;;  %v3501_v24 = vpop.f32.mrf.mxu3 }
 0xbc3   : > { %v3473_v31 = vadd.f32 %v3472_v29, %v6818_v47  ;;  %v3502_v58 = vadd.f32 %v3501_v24, %v6820_v52  ;;  %v6855_v24 = vld [vmem:[%s7019_s13] ss:$0 sm:$0xff] }
 0xbc5   : > { %v3532_v10 = vpop.f32.mrf.mxu0  ;;  %v3561_v43 = vpop.f32.mrf.mxu1  ;;  %v3585_v0 = vmax.f32 %v3473_v31, 0.0  ;;  %v3586_v15 = vmax.f32 %v3502_v58, 0.0 }
 0xbc6   : > { %v3533_v39 = vadd.f32 %v3532_v10, %v6812_v9  ;;  %v3562_v37 = vadd.f32 %v3561_v43, %v6814_v6 }
 0xbc8   : > { %v3591_v44 = vmax.f32 %v3533_v39, 0.0  ;;  %v3592_v28 = vmax.f32 %v3562_v37, 0.0 }
 0xbca   : > { %v3611_v59 = vpack.c.bf16 %v3591_v44, %v3587_v51  ;;  %v3612_v17 = vpack.c.bf16 %v3592_v28, %v3588_v11  ;;  %v3474_v55 = vpop.f32.mrf.mxu2  ;;  %v3503_v8 = vpop.f32.mrf.mxu3 }
 0xbcb   : > { %v3475_v21 = vadd.f32 %v3474_v55, %v6818_v47  ;;  %v3504_v14 = vadd.f32 %v3503_v8, %v6820_v52 }
 0xbcc   : > { %3953 = vmatmul.bf16.gmra.mxu0 %v3611_v59  ;;  %3982 = vmatmul.bf16.gmra.mxu1 %v3612_v17 }
 0xbcd   : > { %v3589_v62 = vmax.f32 %v3475_v21, 0.0  ;;  %v3590_v61 = vmax.f32 %v3504_v14, 0.0 }
 0xbcf   : > { %v3609_v26 = vpack.c.bf16 %v3589_v62, %v3585_v0  ;;  %v3610_v53 = vpack.c.bf16 %v3590_v61, %v3586_v15 }
 0xbd1   : > { %3895 = vmatmul.bf16.gmra.mxu2 %v3609_v26  ;;  %3924 = vmatmul.bf16.gmra.mxu3 %v3610_v53 }
 0xbd6   : > { %v3535_v16 = vpop.f32.mrf.mxu0  ;;  %v3564_v25 = vpop.f32.mrf.mxu1 }
 0xbd7   : > { %v3536_v22 = vadd.f32 %v3535_v16, %v6812_v9  ;;  %v3565_v48 = vadd.f32 %v3564_v25, %v6814_v6 }
 0xbd9   : > { %v3595_v19 = vmax.f32 %v3536_v22, 0.0  ;;  %v3596_v2 = vmax.f32 %v3565_v48, 0.0 }
 0xbdb   : > { %v3477_v1 = vpop.f32.mrf.mxu2  ;;  %v3506_v38 = vpop.f32.mrf.mxu3 }
 0xbdc   : > { %v3478_v3 = vadd.f32 %v3477_v1, %v6818_v47  ;;  %v3507_v34 = vadd.f32 %v3506_v38, %v6820_v52 }
 0xbde   : > { %v3537_v40 = vpop.f32.mrf.mxu0  ;;  %v3566_v33 = vpop.f32.mrf.mxu1 }
 0xbdf   : > { %v3538_v50 = vadd.f32 %v3537_v40, %v6812_v9  ;;  %v3567_v60 = vadd.f32 %v3566_v33, %v6814_v6  ;;  %v3593_v9 = vmax.f32 %v3478_v3, 0.0  ;;  %v3594_v6 = vmax.f32 %v3507_v34, 0.0 }
 0xbe1   : > { %v3599_v18 = vmax.f32 %v3538_v50, 0.0  ;;  %v3600_v45 = vmax.f32 %v3567_v60, 0.0 }
 0xbe3   : > { %v3615_v56 = vpack.c.bf16 %v3599_v18, %v3595_v19  ;;  %v3616_v20 = vpack.c.bf16 %v3600_v45, %v3596_v2  ;;  %v3479_v49 = vpop.f32.mrf.mxu2  ;;  %v3508_v4 = vpop.f32.mrf.mxu3 }
 0xbe4   : > { %v3480_v54 = vadd.f32 %v3479_v49, %v6818_v47  ;;  %v3509_v35 = vadd.f32 %v3508_v4, %v6820_v52 }
 0xbe5   : > { %3958 = vmatmul.bf16.gmra.mxu0 %v3615_v56  ;;  %3987 = vmatmul.bf16.gmra.mxu1 %v3616_v20 }
 0xbe6   : > { %v3597_v5 = vmax.f32 %v3480_v54, 0.0  ;;  %v3598_v7 = vmax.f32 %v3509_v35, 0.0 }
 0xbe8   : > { %v3613_v36 = vpack.c.bf16 %v3597_v5, %v3593_v9  ;;  %v3614_v29 = vpack.c.bf16 %v3598_v7, %v3594_v6  ;;  %v3944_v52 = vpop.f32.mrf.mxu0  ;;  %v3973_v43 = vpop.f32.mrf.mxu1 }
 0xbea   : > { %3900 = vmatmul.bf16.gmra.mxu2 %v3613_v36  ;;  %3929 = vmatmul.bf16.gmra.mxu3 %v3614_v29 }
 0xbf0   : > { %v3946_v58 = vpop.f32.mrf.mxu0  ;;  %v3975_v17 = vpop.f32.mrf.mxu1 }
 0xbf3   : > { %v3886_v41 = vpop.f32.mrf.mxu2  ;;  %v3915_v13 = vpop.f32.mrf.mxu3 }
 0xbf4   : > { %v3887_v47 = vadd.f32 %v6855_v24, %v3886_v41 }
 0xbf6   : > { %v3916_v10 = vadd.f32 %v3915_v13, %v3887_v47 }
 0xbf8   : > { %v3945_v39 = vadd.f32 %v3944_v52, %v3916_v10 }
 0xbfa   : > { %v3974_v37 = vadd.f32 %v3973_v43, %v3945_v39 }
 0xbfb   : > { %v3888_v51 = vpop.f32.mrf.mxu2  ;;  %v3917_v28 = vpop.f32.mrf.mxu3 }
 0xbfc   : > { %v3889_v11 = vadd.f32 %v6855_v24, %v3888_v51  ;;  %v3993_v44 = vadd.f32 %v3974_v37, %v6646_v27 }
 0xbfe   : > { %v3918_v31 = vadd.f32 %v3917_v28, %v3889_v11  ;;  %4001 = vadd.xlane.f32.xlu1 %v3993_v44 }
 0xc00   : > { %v3947_v59 = vadd.f32 %v3946_v58, %v3918_v31 }
 0xc02   : > { %v3976_v55 = vadd.f32 %v3975_v17, %v3947_v59 }
 0xc04   : > { %v6861_v8 = vadd.f32 %v3976_v55, %v6649_v57 }
 0xc06   : > { %4003 = vadd.xlane.f32.xlu2 %v6861_v8 }
 0xc39   : > { %v3949_v21 = vpop.f32.mrf.mxu0  ;;  %v3978_v14 = vpop.f32.mrf.mxu1 }
 0xc41   : > { %v3951_v26 = vpop.f32.mrf.mxu0  ;;  %v3980_v57 = vpop.f32.mrf.mxu1 }
 0xc44   : > { %v3891_v0 = vpop.f32.mrf.mxu2  ;;  %v3920_v15 = vpop.f32.mrf.mxu3 }
 0xc45   : > { %v3892_v62 = vadd.f32 %v6855_v24, %v3891_v0 }
 0xc47   : > { %v3921_v61 = vadd.f32 %v3920_v15, %v3892_v62 }
 0xc49   : > { %v3950_v27 = vadd.f32 %v3949_v21, %v3921_v61  ;;  %v3954_v2 = vpop.f32.mrf.mxu0  ;;  %v3983_v45 = vpop.f32.mrf.mxu1 }
 0xc4b   : > { %v3979_v53 = vadd.f32 %v3978_v14, %v3950_v27 }
 0xc4c   : > { %v3893_v16 = vpop.f32.mrf.mxu2  ;;  %v3922_v25 = vpop.f32.mrf.mxu3 }
 0xc4d   : > { %v3894_v1 = vadd.f32 %v6855_v24, %v3893_v16  ;;  %v3995_v38 = vadd.f32 %v3979_v53, %v6671_v32 }
 0xc4f   : > { %v3923_v22 = vadd.f32 %v3922_v25, %v3894_v1  ;;  %4005 = vadd.xlane.f32.xlu0 %v3995_v38 }
 0xc51   : > { %v3952_v48 = vadd.f32 %v3951_v26, %v3923_v22  ;;  %v3956_v54 = vpop.f32.mrf.mxu0  ;;  %v3985_v9 = vpop.f32.mrf.mxu1 }
 0xc53   : > { %v3981_v40 = vadd.f32 %v3980_v57, %v3952_v48 }
 0xc54   : > { %v3896_v33 = vpop.f32.mrf.mxu2  ;;  %v3925_v50 = vpop.f32.mrf.mxu3 }
 0xc55   : > { %v3897_v60 = vadd.f32 %v6855_v24, %v3896_v33  ;;  %v3996_v19 = vadd.f32 %v3981_v40, %v6674_v63 }
 0xc57   : > { %v3926_v18 = vadd.f32 %v3925_v50, %v3897_v60  ;;  %4007 = vadd.xlane.f32.xlu1 %v3996_v19 }
 0xc59   : > { %v3955_v3 = vadd.f32 %v3954_v2, %v3926_v18 }
 0xc5b   : > { %v3984_v34 = vadd.f32 %v3983_v45, %v3955_v3 }
 0xc5c   : > { %v3898_v56 = vpop.f32.mrf.mxu2  ;;  %v3927_v49 = vpop.f32.mrf.mxu3 }
 0xc5d   : > { %v3899_v32 = vadd.f32 %v6855_v24, %v3898_v56  ;;  %v3997_v20 = vadd.f32 %v3984_v34, %v6738_v30 }
 0xc5f   : > { %v3928_v4 = vadd.f32 %v3927_v49, %v3899_v32  ;;  %4009 = vadd.xlane.f32.xlu2 %v3997_v20 }
 0xc61   : > { %v3957_v35 = vadd.f32 %v3956_v54, %v3928_v4 }
 0xc62   : > { %v3959_v29 = vpop.f32.mrf.mxu0  ;;  %v3988_v13 = vpop.f32.mrf.mxu1 }
 0xc63   : > { %v3986_v6 = vadd.f32 %v3985_v9, %v3957_v35 }
 0xc65   : > { %v3998_v63 = vadd.f32 %v3986_v6, %v6741_v23 }
 0xc67   : > { %4011 = vadd.xlane.f32.xlu0 %v3998_v63 }
 0xc6a   : > { %v3961_v31 = vpop.f32.mrf.mxu0  ;;  %v3990_v55 = vpop.f32.mrf.mxu1 }
 0xc6d   : > { %v3901_v5 = vpop.f32.mrf.mxu2  ;;  %v3930_v7 = vpop.f32.mrf.mxu3 }
 0xc6e   : > { %v3902_v36 = vadd.f32 %v6855_v24, %v3901_v5 }
 0xc70   : > { %v3931_v41 = vadd.f32 %v3930_v7, %v3902_v36  ;;  %v6923_v7 = vld [vmem:[%s7020_s14] ss:$0 sm:$0xff] }
 0xc71   : > { %v4002_v47 = vpop.xlane.xlu1 %4001 }
 0xc72   : > { %v3960_v52 = vadd.f32 %v3959_v29, %v3931_v41  ;;  %v4017_v30 = vmul.f32 %v4002_v47, %v6388_v42  ;;  %v6928_v41 = vld [vmem:[%s7021_s15] ss:$0 sm:$0xff] }
 0xc74   : > { %v3989_v10 = vadd.f32 %v3988_v13, %v3960_v52  ;;  %v6874_v43 = vsub.f32 %v3993_v44, %v4017_v30 }
 0xc75   : > { %v3903_v39 = vpop.f32.mrf.mxu2  ;;  %v3932_v11 = vpop.f32.mrf.mxu3 }
 0xc76   : > { %v3904_v37 = vadd.f32 %v6855_v24, %v3903_v39  ;;  %v3999_v23 = vadd.f32 %v3989_v10, %v6802_v46  ;;  %v4033_v51 = vmul.f32 %v6874_v43, %v6874_v43 }
 0xc78   : > { %v3933_v28 = vadd.f32 %v3932_v11, %v3904_v37  ;;  %4013 = vadd.xlane.f32.xlu1 %v3999_v23  ;;  %4041 = vadd.xlane.f32.xlu0 %v4033_v51 }
 0xc79   : > { %v4004_v58 = vpop.xlane.xlu2 %4003 }
 0xc7a   : > { %v3962_v59 = vadd.f32 %v3961_v31, %v3933_v28  ;;  %v4018_v17 = vmul.f32 %v4004_v58, %v6388_v42 }
 0xc7c   : > { %v3991_v44 = vadd.f32 %v3990_v55, %v3962_v59  ;;  %v6882_v21 = vsub.f32 %v6861_v8, %v4018_v17 }
 0xc7e   : > { %v4000_v24 = vadd.f32 %v3991_v44, %v6805_v12  ;;  %v4034_v46 = vmul.f32 %v6882_v21, %v6882_v21 }
 0xc80   : > { %4015 = vadd.xlane.f32.xlu2 %v4000_v24  ;;  %4043 = vadd.xlane.f32.xlu1 %v4034_v46 }
 0xcc2   : > { %v4006_v14 = vpop.xlane.xlu0 %4005 }
 0xcc3   : > { %v4019_v0 = vmul.f32 %v4006_v14, %v6388_v42 }
 0xcc5   : > { %v6888_v15 = vsub.f32 %v3995_v38, %v4019_v0 }
 0xcc7   : > { %v4035_v62 = vmul.f32 %v6888_v15, %v6888_v15 }
 0xcc9   : > { %4045 = vadd.xlane.f32.xlu2 %v4035_v62 }
 0xcca   : > { %v4008_v61 = vpop.xlane.xlu1 %4007 }
 0xccb   : > { %v4020_v8 = vmul.f32 %v4008_v61, %v6388_v42 }
 0xccd   : > { %v6893_v27 = vsub.f32 %v3996_v19, %v4020_v8 }
 0xccf   : > { %v4036_v12 = vmul.f32 %v6893_v27, %v6893_v27 }
 0xcd1   : > { %4047 = vadd.xlane.f32.xlu0 %v4036_v12 }
 0xcd2   : > { %v4010_v26 = vpop.xlane.xlu2 %4009 }
 0xcd3   : > { %v4021_v53 = vmul.f32 %v4010_v26, %v6388_v42 }
 0xcd5   : > { %v6898_v16 = vsub.f32 %v3997_v20, %v4021_v53 }
 0xcd7   : > { %v4037_v25 = vmul.f32 %v6898_v16, %v6898_v16 }
 0xcd9   : > { %4049 = vadd.xlane.f32.xlu1 %v4037_v25 }
 0xcda   : > { %v4012_v1 = vpop.xlane.xlu0 %4011 }
 0xcdb   : > { %v4022_v38 = vmul.f32 %v4012_v1, %v6388_v42 }
 0xcdd   : > { %v6903_v57 = vsub.f32 %v3998_v63, %v4022_v38 }
 0xcdf   : > { %v4038_v22 = vmul.f32 %v6903_v57, %v6903_v57 }
 0xce1   : > { %4051 = vadd.xlane.f32.xlu2 %v4038_v22 }
 0xceb   : > { %v4042_v48 = vpop.xlane.xlu0 %4041  ;;  %v4014_v40 = vpop.xlane.xlu1 %4013 }
 0xcec   : > { %v4057_v33 = vmul.f32 %v4042_v48, %v6388_v42  ;;  %v4023_v50 = vmul.f32 %v4014_v40, %v6388_v42 }
 0xcee   : > { %v4065_v60 = vadd.f32 1e-05, %v4057_v33  ;;  %v6909_v19 = vsub.f32 %v3999_v23, %v4023_v50 }
 0xcf0   : > { %5148 = vrsqrt.f32 %v4065_v60  ;;  %v4039_v2 = vmul.f32 %v6909_v19, %v6909_v19  ;;  %vm4079_vm0 = vweird.f32 %v4065_v60 }
 0xcf2   : > { %4053 = vadd.xlane.f32.xlu0 %v4039_v2 }
 0xcf3   : > { %v4016_v18 = vpop.xlane.xlu2 %4015  ;;  %v4044_v45 = vpop.xlane.xlu1 %4043 }
 0xcf4   : > { %v4024_v3 = vmul.f32 %v4016_v18, %v6388_v42  ;;  %v4058_v34 = vmul.f32 %v4044_v45, %v6388_v42 }
 0xcf6   : > { %v5149_v56 = vpop.eup %5148  ;;  %v6915_v32 = vsub.f32 %v4000_v24, %v4024_v3  ;;  %v4066_v20 = vadd.f32 1e-05, %v4058_v34 }
 0xcf7   : > { %v4074_v49 = vmul.f32 %v5149_v56, %v4065_v60  ;;  %vm4080_vm15 = vweird.f32 %v5149_v56 }
 0xcf8   : > { %5150 = vrsqrt.f32 %v4066_v20  ;;  %v4040_v4 = vmul.f32 %v6915_v32, %v6915_v32  ;;  %vm4081_vm1 = vmor %vm4079_vm0, %vm4080_vm15  ;;  %vm4089_vm3 = vweird.f32 %v4066_v20 }
 0xcf9   : > { %v4075_v54 = vmul.f32 %v5149_v56, %v4074_v49 }
 0xcfa   : > { %4055 = vadd.xlane.f32.xlu1 %v4040_v4 }
 0xcfb   : > { %v4076_v35 = vmul.f32 0.5, %v4075_v54 }
 0xcfd   : > { %v4077_v9 = vsub.f32 1.5, %v4076_v35 }
 0xcfe   : > { %v5151_v6 = vpop.eup %5150 }
 0xcff   : > { %v4078_v63 = vmul.f32 %v5149_v56, %v4077_v9  ;;  %v4084_v5 = vmul.f32 %v5151_v6, %v4066_v20  ;;  %vm4090_vm2 = vweird.f32 %v5151_v6 }
 0xd00   : > { %vm4091_vm4 = vmor %vm4089_vm3, %vm4090_vm2 }
 0xd01   : > { %v4082_v36 = vsel %vm4081_vm1, %v5149_v56, %v4078_v63  ;;  %v4085_v29 = vmul.f32 %v5151_v6, %v4084_v5 }
 0xd02   : > { %v4153_v13 = vmul.f32 %v4082_v36, %v6874_v43 }
 0xd03   : > { %v4086_v47 = vmul.f32 0.5, %v4085_v29 }
 0xd04   : > { %v4165_v52 = vmul.f32 %v6923_v7, %v4153_v13 }
 0xd05   : > { %v4087_v30 = vsub.f32 1.5, %v4086_v47 }
 0xd06   : > { %v4177_v10 = vadd.f32 %v6928_v41, %v4165_v52 }
 0xd07   : > { %v4088_v39 = vmul.f32 %v5151_v6, %v4087_v30 }
 0xd08   : > { %4185 = vst [vmem:[%s6935_s21] sm:$0xff] %v4177_v10 }
 0xd09   : > { %v4092_v37 = vsel %vm4091_vm4, %v5151_v6, %v4088_v39 }
 0xd0a   : > { %v4154_v23 = vmul.f32 %v4092_v37, %v6882_v21 }
 0xd0c   : > { %v4166_v43 = vmul.f32 %v6923_v7, %v4154_v23 }
 0xd0e   : > { %v4178_v51 = vadd.f32 %v6928_v41, %v4166_v43 }
 0xd10   : > { %4186 = vst [vmem:[%s6935_s21 + $0x8] sm:$0xff] %v4178_v51 }
 0xd3c   : > { %v4046_v11 = vpop.xlane.xlu2 %4045 }
 0xd3d   : > { %v4059_v28 = vmul.f32 %v4046_v11, %v6388_v42 }
 0xd3f   : > { %v4067_v31 = vadd.f32 1e-05, %v4059_v28 }
 0xd41   : > { %5152 = vrsqrt.f32 %v4067_v31  ;;  %vm4099_vm6 = vweird.f32 %v4067_v31 }
 0xd44   : > { %v4048_v58 = vpop.xlane.xlu0 %4047 }
 0xd45   : > { %v4060_v59 = vmul.f32 %v4048_v58, %v6388_v42 }
 0xd47   : > { %v5153_v17 = vpop.eup %5152  ;;  %v4068_v55 = vadd.f32 1e-05, %v4060_v59 }
 0xd48   : > { %v4094_v44 = vmul.f32 %v5153_v17, %v4067_v31  ;;  %vm4100_vm5 = vweird.f32 %v5153_v17 }
 0xd49   : > { %5154 = vrsqrt.f32 %v4068_v55  ;;  %vm4101_vm7 = vmor %vm4099_vm6, %vm4100_vm5  ;;  %vm4109_vm9 = vweird.f32 %v4068_v55 }
 0xd4a   : > { %v4095_v24 = vmul.f32 %v5153_v17, %v4094_v44 }
 0xd4c   : > { %v4096_v46 = vmul.f32 0.5, %v4095_v24  ;;  %v4050_v21 = vpop.xlane.xlu1 %4049 }
 0xd4d   : > { %v4061_v14 = vmul.f32 %v4050_v21, %v6388_v42 }
 0xd4e   : > { %v4097_v0 = vsub.f32 1.5, %v4096_v46 }
 0xd4f   : > { %v5155_v62 = vpop.eup %5154  ;;  %v4069_v61 = vadd.f32 1e-05, %v4061_v14 }
 0xd50   : > { %v4098_v8 = vmul.f32 %v5153_v17, %v4097_v0  ;;  %v4104_v12 = vmul.f32 %v5155_v62, %v4068_v55  ;;  %vm4110_vm8 = vweird.f32 %v5155_v62 }
 0xd51   : > { %5156 = vrsqrt.f32 %v4069_v61  ;;  %vm4111_vm10 = vmor %vm4109_vm9, %vm4110_vm8  ;;  %vm4119_vm12 = vweird.f32 %v4069_v61 }
 0xd52   : > { %v4102_v26 = vsel %vm4101_vm7, %v5153_v17, %v4098_v8  ;;  %v4105_v53 = vmul.f32 %v5155_v62, %v4104_v12 }
 0xd53   : > { %v4155_v25 = vmul.f32 %v4102_v26, %v6888_v15 }
 0xd54   : > { %v4106_v1 = vmul.f32 0.5, %v4105_v53  ;;  %v4052_v38 = vpop.xlane.xlu2 %4051 }
 0xd55   : > { %v4167_v22 = vmul.f32 %v6923_v7, %v4155_v25  ;;  %v4062_v48 = vmul.f32 %v4052_v38, %v6388_v42 }
 0xd56   : > { %v4107_v40 = vsub.f32 1.5, %v4106_v1 }
 0xd57   : > { %v5157_v33 = vpop.eup %5156  ;;  %v4179_v50 = vadd.f32 %v6928_v41, %v4167_v22  ;;  %v4070_v60 = vadd.f32 1e-05, %v4062_v48 }
 0xd58   : > { %v4108_v2 = vmul.f32 %v5155_v62, %v4107_v40  ;;  %v4114_v18 = vmul.f32 %v5157_v33, %v4069_v61  ;;  %vm4120_vm11 = vweird.f32 %v5157_v33 }
 0xd59   : > { %4187 = vst [vmem:[%s6935_s21 + $0x10] sm:$0xff] %v4179_v50  ;;  %5158 = vrsqrt.f32 %v4070_v60  ;;  %vm4121_vm13 = vmor %vm4119_vm12, %vm4120_vm11  ;;  %vm4129_vm15 = vweird.f32 %v4070_v60 }
 0xd5a   : > { %v4112_v15 = vsel %vm4111_vm10, %v5155_v62, %v4108_v2  ;;  %v4115_v45 = vmul.f32 %v5157_v33, %v4114_v18 }
 0xd5b   : > { %v4156_v3 = vmul.f32 %v4112_v15, %v6893_v27 }
 0xd5c   : > { %v4116_v34 = vmul.f32 0.5, %v4115_v45 }
 0xd5d   : > { %v4168_v56 = vmul.f32 %v6923_v7, %v4156_v3 }
 0xd5e   : > { %v4117_v20 = vsub.f32 1.5, %v4116_v34 }
 0xd5f   : > { %v5159_v49 = vpop.eup %5158  ;;  %v4180_v4 = vadd.f32 %v6928_v41, %v4168_v56 }
 0xd60   : > { %v4118_v54 = vmul.f32 %v5157_v33, %v4117_v20  ;;  %v4124_v35 = vmul.f32 %v5159_v49, %v4070_v60  ;;  %vm4130_vm14 = vweird.f32 %v5159_v49 }
 0xd61   : > { %4188 = vst [vmem:[%s6935_s21 + $0x18] sm:$0xff] %v4180_v4  ;;  %vm4131_vm0 = vmor %vm4129_vm15, %vm4130_vm14 }
 0xd62   : > { %v4122_v9 = vsel %vm4121_vm13, %v5157_v33, %v4118_v54  ;;  %v4125_v6 = vmul.f32 %v5159_v49, %v4124_v35 }
 0xd63   : > { %v4157_v63 = vmul.f32 %v4122_v9, %v6898_v16 }
 0xd64   : > { %v4126_v5 = vmul.f32 0.5, %v4125_v6 }
 0xd65   : > { %v4169_v27 = vmul.f32 %v6923_v7, %v4157_v63  ;;  %v4054_v36 = vpop.xlane.xlu0 %4053 }
 0xd66   : > { %v4127_v29 = vsub.f32 1.5, %v4126_v5  ;;  %v4063_v13 = vmul.f32 %v4054_v36, %v6388_v42 }
 0xd67   : > { %v4181_v47 = vadd.f32 %v6928_v41, %v4169_v27 }
 0xd68   : > { %v4128_v52 = vmul.f32 %v5159_v49, %v4127_v29  ;;  %v4071_v30 = vadd.f32 1e-05, %v4063_v13 }
 0xd69   : > { %4189 = vst [vmem:[%s6935_s21 + $0x20] sm:$0xff] %v4181_v47 }
 0xd6a   : > { %v4132_v10 = vsel %vm4131_vm0, %v5159_v49, %v4128_v52  ;;  %5160 = vrsqrt.f32 %v4071_v30  ;;  %vm4139_vm2 = vweird.f32 %v4071_v30 }
 0xd6b   : > { %v4158_v16 = vmul.f32 %v4132_v10, %v6903_v57 }
 0xd6d   : > { %v4170_v39 = vmul.f32 %v6923_v7, %v4158_v16  ;;  %v4056_v37 = vpop.xlane.xlu1 %4055 }
 0xd6e   : > { %v4064_v23 = vmul.f32 %v4056_v37, %v6388_v42 }
 0xd6f   : > { %v4182_v43 = vadd.f32 %v6928_v41, %v4170_v39 }
 0xd70   : > { %v5161_v51 = vpop.eup %5160  ;;  %v4072_v11 = vadd.f32 1e-05, %v4064_v23 }
 0xd71   : > { %4190 = vst [vmem:[%s6935_s21 + $0x28] sm:$0xff] %v4182_v43  ;;  %v4134_v28 = vmul.f32 %v5161_v51, %v4071_v30  ;;  %vm4140_vm1 = vweird.f32 %v5161_v51 }
 0xd72   : > { %5162 = vrsqrt.f32 %v4072_v11  ;;  %vm4141_vm3 = vmor %vm4139_vm2, %vm4140_vm1  ;;  %vm4149_vm5 = vweird.f32 %v4072_v11 }
 0xd73   : > { %v4135_v31 = vmul.f32 %v5161_v51, %v4134_v28 }
 0xd75   : > { %v4136_v58 = vmul.f32 0.5, %v4135_v31 }
 0xd77   : > { %v4137_v59 = vsub.f32 1.5, %v4136_v58 }
 0xd78   : > { %v5163_v17 = vpop.eup %5162 }
 0xd79   : > { %v4138_v55 = vmul.f32 %v5161_v51, %v4137_v59  ;;  %v4144_v57 = vmul.f32 %v5163_v17, %v4072_v11  ;;  %vm4150_vm4 = vweird.f32 %v5163_v17 }
 0xd7a   : > { %vm4151_vm6 = vmor %vm4149_vm5, %vm4150_vm4 }
 0xd7b   : > { %v4142_v44 = vsel %vm4141_vm3, %v5161_v51, %v4138_v55  ;;  %v4145_v42 = vmul.f32 %v5163_v17, %v4144_v57 }
 0xd7c   : > { %v4159_v24 = vmul.f32 %v4142_v44, %v6909_v19 }
 0xd7d   : > { %v4146_v46 = vmul.f32 0.5, %v4145_v42 }
 0xd7e   : > { %v4171_v21 = vmul.f32 %v6923_v7, %v4159_v24 }
 0xd7f   : > { %v4147_v14 = vsub.f32 1.5, %v4146_v46 }
 0xd80   : > { %v4183_v0 = vadd.f32 %v6928_v41, %v4171_v21 }
 0xd81   : > { %v4148_v62 = vmul.f32 %v5163_v17, %v4147_v14 }
 0xd82   : > { %4191 = vst [vmem:[%s6935_s21 + $0x30] sm:$0xff] %v4183_v0 }
 0xd83   : > { %v4152_v19 = vsel %vm4151_vm6, %v5163_v17, %v4148_v62 }
 0xd84   : > { %v4160_v61 = vmul.f32 %v4152_v19, %v6915_v32 }
 0xd86   : > { %v4172_v8 = vmul.f32 %v6923_v7, %v4160_v61 }
 0xd88   : > { %v4184_v12 = vadd.f32 %v6928_v41, %v4172_v8 }
 0xd8a   : > { %4192 = vst [vmem:[%s6935_s21 + $0x38] sm:$0xff] %v4184_v12 }
 0xd8b   : > { %5191 = shalt.err (!%p5188_p3)
}
 0xd8c   : > { %s5232_s26 = smov 128   ;;  %s5233_s21 = smov 8  }
 0xd8d   : > { %4840 = dma.vmem_to_hbm [thread:$0]  (%p5357_p5), %s4207_s20, 1024, %s4209_s25, %s4194_s1, %s5232_s26, %s5232_s26, %s5233_s21  }
 0xd8e PF: > { %s7048_s30 = sld [smem:[#allocation5_spill]]  ;;  %p4846_p4 = scmp.ge.s32.totalorder %s5226_s24, 2 }
 0xd90   : > { %p4843_p7 = pnand %p4846_p4, %p5361_p6 }
 0xd92   : > { %p4844_p8 = pneg %p4843_p7 }
 0xd94   : > { %s4223_s27 = sand.u32 1, %s7048_s30  }
 0xd95   : > { %s4224_s23 = scalar_lea.sflag [#allocation3], %s4223_s27 }
 0xd96   : > { %5209 = dma.done.wait (%p4844_p8), %s4224_s23, 1024  }
 0xd97   : > { %5211 = vsyncadd (%p4844_p8), %s4224_s23, 4294966272  ;;  %s7050_s24 = sld [smem:[#allocation7_spill]]  ;;  %s7053_s21 = smov %s5218_s22 }
 0xd98   : > { %s7051_s17 = sld [smem:[#allocation6_spill]] }
 0xd99   : > { %s7052_s23 = sld [smem:[#allocation8_spill]] }
 0xd9d   : > { %p26_p9 = scmp.ge.s32.totalorder %s7050_s24, 4  }
 0xd9e   : > { %s7054_s22 = smov %s7051_s17 }
 0xd9f   :  { %28 = sbr.rel (!%p26_p9) target bundleno = 7 (0x7), region = 119 }
 0xda4   :  { %4230 = vsyncpa [#allocation3], 1 }
 0xda5   :  { %4232 = vsyncpa [#allocation3 + $0x1], 1 }

// kernel: encoder_forward.7
= control target key start
LH: loop header
LB: loop body
LE: loop exit
PB: predicated region body
PF: predicated region fallthrough
CT: control target
= control target key end

     0   :  { %8 = vsyncpa [#allocation3], 0  ;;  %s564_s0 = inlined_call_operand.vmem [shape: f32[128,4], index: 0, kind: input, shape index: {}]   ;;  %s565_s1 = inlined_call_operand.vmem [shape: bf16[4,128], index: 1, kind: input, shape index: {}]   ;;  %s566_s2 = inlined_call_operand.vmem [shape: f32[1,128], index: 2, kind: input, shape index: {}]   ;;  %s567_s3 = inlined_call_operand.hbm [shape: f32[128,128], index: 3, kind: output, shape index: {}]  }
   0x1   :  { %10 = vsyncpa [#allocation3 + $0x1], 0  ;;  %s470_s12 = smov 0   ;;  %s472_s13 = smov 0  }
   0x2   :  { %s474_s14 = smov 0   ;;  %s476_s15 = smov 0  }
   0x3 LB: > { %s491_s16 = sadd.s32 4294967295, %s446_s15   ;;  %s322_s17 = sadd.s32 4294967294, %s446_s15   ;;  %s446_s15 = sphi %s476_s15, %s573_s15   ;;  %s442_s14 = sphi %s474_s14, %s572_s14   ;;  %s438_s13 = sphi %s472_s13, %s571_s13   ;;  %s434_s12 = sphi %s470_s12, %s570_s12  }
   0x4   : > { %s495_s18 = sadd.s32 1, %s446_s15   ;;  %s91_s19 = sadd.s32 1, %s442_s14 }
   0x5   : > { %s88_s20 = ssub.s32 %s446_s15, %s495_s18  ;;  %p101_p0 = scmp.ne.s32.totalorder %s442_s14, %s438_s13 }
   0x6   : > { %p89_p1 = scmp.eq.s32.totalorder %s88_s20, 0  ;;  %p102_p2 = scmp.eq.s32.totalorder %s491_s16, 1 }
   0x7   : > { %p107_p3 = scmp.ne.s32.totalorder %s438_s13, %s434_s12  ;;  %p108_p4 = scmp.eq.s32.totalorder %s322_s17, 1 }
   0x8   : > { %s506_s21 = scalar_select %p89_p1, %s442_s14, %s91_s19  }
   0x9   : > { %p508_p5 = por %p102_p2, %p101_p0  ;;  %p512_p6 = por %p108_p4, %p107_p3 }
   0xa   : > { %p325_p7 = scmp.ge.s32.totalorder %s446_s15, 1  ;;  %p141_p8 = scmp.lt.s32.totalorder %s446_s15, 3 }
   0xc   : > { %p142_p9 = pnand %p325_p7, %p141_p8 }
   0xd   : > { %s327_s26 = sshll.u32 (!%p142_p9), %s491_s16, 3  ;;  %s162_s4 = sand.u32 (!%p142_p9), 1, %s438_s13  }
   0xe   : > { %145 = sbr.rel (%p142_p9) target bundleno = 173 (0xad), region = 32  ;;  %p166_p10 = scmp.lt.s32.totalorder (!%p142_p9), %s327_s26, 15 }
   0xf   : > { %s326_s5 = sshll.u32 (!%p142_p9), %s162_s4, 6  ;;  %s338_s9 = sshll.u32 (!%p142_p9), %s491_s16, 6 }
  0x10   : > { %s164_s8 = scalar_lea.vmem (!%p142_p9), [#allocation2], %s326_s5  ;;  %s256_s17 = scalar_lea.hbm (!%p142_p9), %s567_s3, %s338_s9 }
  0x11   : > { %s257_s19 = sshll.u32 (!%p142_p9), %s164_s8, 4  ;;  %s259_s20 = sshll.u32 (!%p142_p9), %s256_s17, 4  ;;  %s258_s19 = int_to_ptr.vmem [resolvable:$true] %s257_s19  ;;  %s260_s20 = int_to_ptr.hbm [resolvable:$true] %s259_s20 }
  0x12   : > { %s245_s16 = scalar_lea.sflag (!%p142_p9), [#allocation3], %s162_s4  ;;  %s398_s24 = sshra.s32 (!%p142_p9), %s260_s20, 4  ;;  %s399_s24 = int_to_ptr.hbm [resolvable:$true] %s398_s24 }
  0x13   : > { %v185_v0 = vld [vmem:[%s565_s1] sm:$0x3]  ;;  %vm203_vm0 = vcmask 1041408   ;;  %s575_s26 = smov (!%p166_p10, %s327_s26), 15  ;;  %vm190_vm1 = vcmask 31744   ;;  %s400_s25 = scalar_lea.hbm %s399_s24, 64 }
  0x14   : > { %v205_v1 = vsel %vm203_vm0, %v185_v0, 0  ;;  %s328_s27 = sshll.u32 %s575_s26, 3  ;;  %v383_v14 = vld [vmem:[%s566_s2] ss:$0 sm:$0xff]  ;;  %p401_p11 = scmp.ne.s32.totalorder %s399_s24, %s400_s25 }
  0x15   : > { %214 = vmatpush.bf16.msra.mxu0 %v205_v1  ;;  %339 = vmatpush.bf16.msra.mxu1 %v205_v1  ;;  %s169_s30 = scalar_lea.vmem %s564_s0, %s328_s27  ;;  %s404_s28 = scalar_lea.hbm %s567_s3, 128 }
  0x16   : > { %340 = vmatpush.bf16.msra.mxu2 %v205_v1  ;;  %341 = vmatpush.bf16.msra.mxu3 %v205_v1  ;;  %v173_v2 = vld [vmem:[%s169_s30] sm:$0xff]  ;;  %v174_v3 = vld [vmem:[%s169_s30 + $0x8] sm:$0xff]  ;;  %v175_v4 = vld [vmem:[%s169_s30 + $0x10] sm:$0xff]  ;;  %p402_p12 = pnand %p401_p11, %p508_p5  ;;  %p405_p0 = scmp.lt.s32.totalorder %s399_s24, %s567_s3 }
  0x17   : > { %v181_v5 = vpack.c.bf16 %v174_v3, %v173_v2  ;;  %v176_v6 = vld [vmem:[%s169_s30 + $0x18] sm:$0xff]  ;;  %v177_v7 = vld [vmem:[%s169_s30 + $0x20] sm:$0xff]  ;;  %v178_v8 = vld [vmem:[%s169_s30 + $0x28] sm:$0xff]  ;;  %p406_p1 = scmp.lt.s32.totalorder %s404_s28, %s400_s25 }
  0x18   : > { %v182_v9 = vpack.c.bf16 %v176_v6, %v175_v4  ;;  %v183_v10 = vpack.c.bf16 %v178_v8, %v177_v7  ;;  %v179_v11 = vld [vmem:[%s169_s30 + $0x30] sm:$0xff]  ;;  %v180_v12 = vld [vmem:[%s169_s30 + $0x38] sm:$0xff]  ;;  %p403_p13 = pneg %p402_p12 }
  0x19   : > { %329 = vmatmul.msk.bf16.vlgmr.msra.gmra.mxu0 %vm190_vm1, %v181_v5  ;;  %v184_v13 = vpack.c.bf16 %v180_v12, %v179_v11  ;;  %p407_p2 = por %p406_p1, %p405_p0 }
  0x1a   : > { %330 = vmatmul.msk.bf16.vlgmr.msra.gmra.mxu1 %vm190_vm1, %v182_v9  ;;  %331 = vmatmul.msk.bf16.vlgmr.msra.gmra.mxu2 %vm190_vm1, %v183_v10 }
  0x1b   : > { %332 = vmatmul.msk.bf16.vlgmr.msra.gmra.mxu3 %vm190_vm1, %v184_v13  ;;  %p408_p3 = pnand %p407_p2, %p403_p13 }
  0x96   : > { %v216_v15 = vpop.f32.mrf.mxu0 }
  0x97   : > { %v217_v16 = vadd.f32 %v383_v14, %v216_v15  ;;  %v221_v17 = vpop.f32.mrf.mxu1 }
  0x98   : > { %v222_v18 = vadd.f32 %v383_v14, %v221_v17 }
  0x99   : > { %236 = vst [vmem:[%s164_s8] sm:$0xff] %v217_v16 }
  0x9a   : > { %238 = vst [vmem:[%s164_s8 + $0x10] sm:$0xff] %v222_v18 }
  0x9d   : > { %v226_v19 = vpop.f32.mrf.mxu2 }
  0x9e   : > { %v227_v20 = vadd.f32 %v383_v14, %v226_v19  ;;  %v231_v21 = vpop.f32.mrf.mxu3  ;;  %v218_v22 = vpop.f32.mrf.mxu0 }
  0x9f   : > { %v232_v23 = vadd.f32 %v383_v14, %v231_v21  ;;  %v219_v24 = vadd.f32 %v383_v14, %v218_v22  ;;  %v223_v25 = vpop.f32.mrf.mxu1 }
  0xa0   : > { %240 = vst [vmem:[%s164_s8 + $0x20] sm:$0xff] %v227_v20  ;;  %v224_v26 = vadd.f32 %v383_v14, %v223_v25 }
  0xa1   : > { %242 = vst [vmem:[%s164_s8 + $0x30] sm:$0xff] %v232_v23 }
  0xa2   : > { %237 = vst [vmem:[%s164_s8 + $0x8] sm:$0xff] %v219_v24 }
  0xa3   : > { %239 = vst [vmem:[%s164_s8 + $0x18] sm:$0xff] %v224_v26 }
  0xa5   : > { %v228_v27 = vpop.f32.mrf.mxu2 }
  0xa6   : > { %v229_v28 = vadd.f32 %v383_v14, %v228_v27  ;;  %v233_v29 = vpop.f32.mrf.mxu3 }
  0xa7   : > { %v234_v30 = vadd.f32 %v383_v14, %v233_v29 }
  0xa8   : > { %241 = vst [vmem:[%s164_s8 + $0x28] sm:$0xff] %v229_v28 }
  0xa9   : > { %243 = vst [vmem:[%s164_s8 + $0x38] sm:$0xff] %v234_v30 }
  0xaa   : > { %411 = shalt.err (!%p408_p3)
}
  0xab   : > { %s448_s4 = smov 128   ;;  %s449_s5 = smov 8  }
  0xac   : > { %342 = dma.vmem_to_hbm [thread:$0]  (%p508_p5), %s258_s19, 1024, %s260_s20, %s245_s16, %s448_s4, %s448_s4, %s449_s5  }
  0xad PF: > { %p348_p4 = scmp.ge.s32.totalorder %s446_s15, 2  ;;  %s274_s6 = sand.u32 1, %s434_s12  }
  0xae   : > { %s275_s7 = scalar_lea.sflag [#allocation3], %s274_s6 }
  0xaf   : > { %p345_p7 = pnand %p348_p4, %p512_p6 }
  0xb1   : > { %p346_p8 = pneg %p345_p7 }
  0xb3   : > { %429 = dma.done.wait (%p346_p8), %s275_s7, 1024  }
  0xb4   : > { %431 = vsyncadd (%p346_p8), %s275_s7, 4294966272  ;;  %p13_p9 = scmp.ge.s32.totalorder %s495_s18, 4   ;;  %s570_s12 = smov %s438_s13 }
  0xb5   : > { %s571_s13 = smov %s442_s14  ;;  %s572_s14 = smov %s506_s21 }
  0xb6   : > { %s573_s15 = smov %s495_s18  ;;  %15 = sbr.rel (!%p13_p9) target bundleno = 3 (0x3), region = 67 }
  0xbb   :  { %281 = vsyncpa [#allocation3], 1 }
  0xbc   :  { %283 = vsyncpa [#allocation3 + $0x1], 1 }

</bundles_post_ra>
